<compile_context>
chip_gen: v6e
topology: v6e:2x2x1
jax: 0.10.0
libtpu: 0.0.40
codegen_flags: <defaults>
</compile_context>

<pallas_src>
import jax
import jax.numpy as jnp
from jax import lax
from jax.experimental import pallas as pl
from jax.experimental.pallas import tpu as pltpu

EPS = 1e-5          # nn.BatchNorm1d default eps
NEG_SLOPE = 0.01    # nn.LeakyReLU default negative_slope


# ---------------------------------------------------------------------------
# Kernel: block of molecules -> (norm + GML stack + spect head)
# ---------------------------------------------------------------------------
def graph_vert_spect_kernel(
    vf_ref, mask_ref, adj_ref, subset_ref, massmat_ref,
    mean_ref, var_ref, gamma_ref, beta_ref,
    w0_ref, b0_ref, wr_ref, br_ref,
    wh1_ref, bh1_ref, wh2_ref, bh2_ref,
    spect_ref, probs_ref,
):
    Bt, N, Fdim = vf_ref.shape
    GS = adj_ref.shape[1]
    S = subset_ref.shape[1]
    D = wh1_ref.shape[0]
    H = wh1_ref.shape[1]
    n_rest = wr_ref.shape[0]

    # ---- MaskedBatchNorm1d (apply_masked_1d_norm): normalize, zero masked rows
    x2d = vf_ref[...].reshape(Bt * N, Fdim)          # (Bt*N, F) lane-dense
    mask2d = mask_ref[...].reshape(Bt * N, 1)
    inv = lax.rsqrt(var_ref[...] + EPS)
    xn = (x2d - mean_ref[...]) * inv * gamma_ref[...] + beta_ref[...]
    xn = xn * mask2d

    adj = adj_ref[...]                               # (Bt, GS, N, N)

    def leaky(v):
        return jnp.where(v > 0, v, NEG_SLOPE * v)

    def gml_layer(h2d, w_cat, b_cat):
        # Fused per-relation Linear: one (Bt*N, C) @ (C, GS*D) MXU matmul,
        # bias pre-packed as (1, GS*D) and added once (hoisted).
        y_all = jnp.dot(h2d, w_cat, preferred_element_type=jnp.float32) + b_cat
        agg = None
        for g in range(GS):                          # static GS loop
            y_g = y_all[:, g * D:(g + 1) * D].reshape(Bt, N, D)
            z = jnp.einsum('bnm,bmd->bnd', adj[:, g], y_g,
                           preferred_element_type=jnp.float32)
            z = leaky(z)
            agg = z if agg is None else jnp.maximum(agg, z)
        return agg                                   # (Bt, N, D)

    # layer 0: F -> D (shapes differ => no resnet skip, matching PyTorch)
    h = gml_layer(xn, w0_ref[...], b0_ref[...])

    # layers 1..L-1: D -> D with resnet skip (visible loop, dynamic weight idx)
    def layer_body(li, h):
        h2 = gml_layer(h.reshape(Bt * N, D), wr_ref[li], br_ref[li])
        return h + h2

    h = lax.fori_loop(0, n_rest, layer_body, h)

    # ---- spect_out head (dense mass-matrix mode)
    pooled = jnp.einsum('bsn,bnd->bsd', subset_ref[...], h,
                        preferred_element_type=jnp.float32)        # (Bt, S, D)
    hid2d = jnp.dot(pooled.reshape(Bt * S, D), wh1_ref[...],
                    preferred_element_type=jnp.float32) + bh1_ref[...]
    hid = jnp.maximum(hid2d, 0.0).reshape(Bt, S, H)                # (Bt, S, H)

    # logits lane-dense as (Bt, S): contract H on lanes, add scalar bias
    logits = jnp.sum(hid * wh2_ref[...].reshape(1, 1, H), axis=-1) + bh2_ref[...]

    # softmax over subsets (lane axis)
    logits = logits - jnp.max(logits, axis=-1, keepdims=True)
    e = jnp.exp(logits)
    probs = e / jnp.sum(e, axis=-1, keepdims=True)                 # (Bt, S)

    probs3 = probs.reshape(Bt, 1, S)
    probs_ref[...] = probs3

    # spect[b, m] = sum_s probs[b, s] * mass_matrix[b, s, m]  -> batched matmul
    spect = jnp.einsum('bis,bsm->bim', probs3, massmat_ref[...],
                       preferred_element_type=jnp.float32)         # (Bt, 1, M)
    spect_ref[...] = spect


# ---------------------------------------------------------------------------
# Wrapper
# ---------------------------------------------------------------------------
def graph_vert_spect_forward(adj, vect_feat, input_mask, atom_subsets,
                             mass_matrix, params, block_b=None):
    B, N, F = vect_feat.shape
    GS = adj.shape[1]
    S = atom_subsets.shape[1]
    M = mass_matrix.shape[2]
    D = params["wh1"].shape[0]
    H = params["wh1"].shape[1]
    L_rest = params["wr"].shape[0]

    # Masked batch-norm statistics (training-mode, biased variance) in plain XLA.
    x_flat = vect_feat.reshape(B * N, F).astype(jnp.float32)
    m_flat = input_mask.reshape(B * N, 1).astype(jnp.float32)
    cnt = jnp.maximum(jnp.sum(m_flat), 1.0)          # guard divide-by-zero
    mean = jnp.sum(x_flat * m_flat, axis=0, keepdims=True) / cnt
    var = jnp.sum(m_flat * (x_flat - mean) ** 2, axis=0, keepdims=True) / cnt

    # Fuse per-relation weights along the output axis: (GS, C, D) -> (C, GS*D).
    w0_cat = jnp.transpose(params["w0"], (1, 0, 2)).reshape(F, GS * D)
    b0_cat = jnp.transpose(params["b0"], (1, 0, 2)).reshape(1, GS * D)
    wr_cat = jnp.transpose(params["wr"], (0, 2, 1, 3)).reshape(L_rest, D, GS * D)
    br_cat = jnp.transpose(params["br"], (0, 2, 1, 3)).reshape(L_rest, 1, GS * D)
    wh2_row = params["wh2"].reshape(1, H)

    # Fold several molecules per grid step so block_b * N ~ 128 sublanes.
    if block_b is None:
        block_b = max(1, min(B, max(1, 128 // N)))
    Bp = ((B + block_b - 1) // block_b) * block_b
    if Bp != B:
        pad = Bp - B
        padfn = lambda a: jnp.pad(a, [(0, pad)] + [(0, 0)] * (a.ndim - 1))
        adj_p, vf_p, mask_p, sub_p, mm_p = map(
            padfn, (adj, vect_feat, input_mask, atom_subsets, mass_matrix))
    else:
        adj_p, vf_p, mask_p, sub_p, mm_p = (adj, vect_feat, input_mask,
                                            atom_subsets, mass_matrix)

    def full(arr):
        shape = arr.shape
        return pl.BlockSpec(shape, lambda b, shape=shape: (0,) * len(shape))

    def per_b(arr):
        nd = arr.ndim
        return pl.BlockSpec((block_b,) + tuple(arr.shape[1:]),
                            lambda b, nd=nd: (b,) + (0,) * (nd - 1))

    spect3, probs3 = pl.pallas_call(
        graph_vert_spect_kernel,
        out_shape=(jax.ShapeDtypeStruct((Bp, 1, M), jnp.float32),
                   jax.ShapeDtypeStruct((Bp, 1, S), jnp.float32)),
        grid=(Bp // block_b,),
        in_specs=[
            per_b(vf_p), per_b(mask_p), per_b(adj_p), per_b(sub_p), per_b(mm_p),
            full(mean), full(var), full(params["gamma"]), full(params["beta"]),
            full(w0_cat), full(b0_cat), full(wr_cat), full(br_cat),
            full(params["wh1"]), full(params["bh1"]),
            full(wh2_row), full(params["bh2"]),
        ],
        out_specs=(pl.BlockSpec((block_b, 1, M), lambda b: (b, 0, 0)),
                   pl.BlockSpec((block_b, 1, S), lambda b: (b, 0, 0))),
        compiler_params=pltpu.CompilerParams(dimension_semantics=("parallel",)),
    )(vf_p, mask_p, adj_p, sub_p, mm_p,
      mean, var, params["gamma"], params["beta"],
      w0_cat, b0_cat, wr_cat, br_cat,
      params["wh1"], params["bh1"], wh2_row, params["bh2"])

    spect = spect3.reshape(Bp, M)[:B]
    probs = probs3.reshape(Bp, S)[:B]
    return {"spect": spect, "masses": None, "probs": None, "subset_probs": probs}


# ---------------------------------------------------------------------------
# Pure-JAX reference (same math) used for a correctness check.
# ---------------------------------------------------------------------------
def reference_forward(adj, vect_feat, input_mask, atom_subsets, mass_matrix, params):
    B, N, F = vect_feat.shape
    m_flat = input_mask.reshape(-1, 1)
    x_flat = vect_feat.reshape(-1, F)
    cnt = jnp.maximum(jnp.sum(m_flat), 1.0)
    mean = jnp.sum(x_flat * m_flat, axis=0) / cnt
    var = jnp.sum(m_flat * (x_flat - mean) ** 2, axis=0) / cnt
    xn = (vect_feat - mean) * lax.rsqrt(var + EPS) * params["gamma"][0] + params["beta"][0]
    xn = xn * input_mask

    def leaky(v):
        return jnp.where(v > 0, v, NEG_SLOPE * v)

    def layer(x_in, W, bvec):
        y = jnp.einsum("bnc,gcp->gbnp", x_in, W) + bvec[:, None]
        z = jnp.einsum("bgnm,gbmp->gbnp", adj, y)
        return jnp.max(leaky(z), axis=0)

    h = layer(xn, params["w0"], params["b0"])
    for li in range(params["wr"].shape[0]):
        h = h + layer(h, params["wr"][li], params["br"][li])

    pooled = jnp.einsum("bsn,bnd->bsd", atom_subsets, h)
    hid = jnp.maximum(jnp.einsum("bsd,dh->bsh", pooled, params["wh1"]) + params["bh1"][0], 0.0)
    logits = jnp.einsum("bsh,ho->bso", hid, params["wh2"])[..., 0] + params["bh2"][0, 0]
    probs = jax.nn.softmax(logits, axis=-1)
    spect = jnp.einsum("bs,bsm->bm", probs, mass_matrix)
    return spect, probs


if __name__ == "__main__":
    key = jax.random.PRNGKey(0)
    B, N, F, GS = 8, 16, 16, 4          # batch, MAX_N, g_feature_n, GS relations
    D, LAYER_N, H = 32, 3, 32           # int_d, layer_n, head hidden
    S, M = 8, 128                       # num atom subsets, spect_bin

    keys = jax.random.split(key, 12)

    adj = (jax.random.uniform(keys[0], (B, GS, N, N)) < 0.3).astype(jnp.float32)
    adj = adj + jnp.transpose(adj, (0, 1, 3, 2))
    vect_feat = jax.random.normal(keys[1], (B, N, F), dtype=jnp.float32)

    n_valid = jnp.array([16, 11, 9, 16, 13, 7, 15, 12])
    input_mask = (jnp.arange(N)[None, :] < n_valid[:, None]).astype(jnp.float32)[..., None]

    atom_subsets = (jax.random.uniform(keys[2], (B, S, N)) < 0.4).astype(jnp.float32)
    atom_subsets = atom_subsets * jnp.transpose(input_mask, (0, 2, 1))

    mass_raw = jax.random.uniform(keys[3], (B, S, M), dtype=jnp.float32)
    mass_matrix = mass_raw / jnp.sum(mass_raw, axis=-1, keepdims=True)

    def nrm(k, shape, scale=0.1):
        return (scale * jax.random.normal(k, shape)).astype(jnp.float32)

    params = dict(
        gamma=jnp.ones((1, F), jnp.float32),        # BatchNorm1d affine init
        beta=jnp.zeros((1, F), jnp.float32),
        w0=nrm(keys[4], (GS, F, D)),                # GraphMatLayerFast layer 0
        b0=nrm(keys[5], (GS, 1, D)),
        wr=nrm(keys[6], (LAYER_N - 1, GS, D, D)),   # remaining layers
        br=nrm(keys[7], (LAYER_N - 1, GS, 1, D)),
        wh1=nrm(keys[8], (D, H)),                   # spect_out head
        bh1=nrm(keys[9], (1, H)),
        wh2=nrm(keys[10], (H, 1)),
        bh2=nrm(keys[11], (1, 1)),
    )

    out = graph_vert_spect_forward(adj, vect_feat, input_mask, atom_subsets,
                                   mass_matrix, params)
    jax.block_until_ready(out["spect"])
    jax.block_until_ready(out["subset_probs"])

    ref_spect, ref_probs = reference_forward(adj, vect_feat, input_mask,
                                             atom_subsets, mass_matrix, params)
    assert bool(jnp.allclose(out["spect"], ref_spect, atol=1e-4, rtol=1e-4))
    assert bool(jnp.allclose(out["subset_probs"], ref_probs, atol=1e-4, rtol=1e-4))

    print("KERNEL_OK")
</pallas_src>

<mosaic_0001>
module attributes {stable_mosaic.version = 11 : i64} {
  func.func @graph_vert_spect_kernel(%arg0: i32, %arg1: memref<8x16x16xf32, #tpu.memory_space<vmem>>, %arg2: memref<8x16x1xf32, #tpu.memory_space<vmem>>, %arg3: memref<8x4x16x16xf32, #tpu.memory_space<vmem>>, %arg4: memref<8x8x16xf32, #tpu.memory_space<vmem>>, %arg5: memref<8x8x128xf32, #tpu.memory_space<vmem>>, %arg6: memref<1x16xf32, #tpu.memory_space<vmem>>, %arg7: memref<1x16xf32, #tpu.memory_space<vmem>>, %arg8: memref<1x16xf32, #tpu.memory_space<vmem>>, %arg9: memref<1x16xf32, #tpu.memory_space<vmem>>, %arg10: memref<16x128xf32, #tpu.memory_space<vmem>>, %arg11: memref<1x128xf32, #tpu.memory_space<vmem>>, %arg12: memref<2x32x128xf32, #tpu.memory_space<vmem>>, %arg13: memref<2x1x128xf32, #tpu.memory_space<vmem>>, %arg14: memref<32x32xf32, #tpu.memory_space<vmem>>, %arg15: memref<1x32xf32, #tpu.memory_space<vmem>>, %arg16: memref<1x32xf32, #tpu.memory_space<vmem>>, %arg17: memref<1x1xf32, #tpu.memory_space<vmem>>, %arg18: memref<8x1x128xf32, #tpu.memory_space<vmem>>, %arg19: memref<8x1x8xf32, #tpu.memory_space<vmem>>) attributes {dimension_semantics = [#tpu.dimension_semantics<parallel>], iteration_bounds = array<i64: 1>, scalar_prefetch = 0 : i64, scratch_operands = 0 : i64, tpu.core_type = #tpu.core_type<tc>, window_params = [{transform_indices = @transform_0, window_bounds = array<i64: 8, 16, 16>}, {transform_indices = @transform_1, window_bounds = array<i64: 8, 16, 1>}, {transform_indices = @transform_2, window_bounds = array<i64: 8, 4, 16, 16>}, {transform_indices = @transform_3, window_bounds = array<i64: 8, 8, 16>}, {transform_indices = @transform_4, window_bounds = array<i64: 8, 8, 128>}, {pipeline_mode = #tpu.pipeline_mode<synchronous>, transform_indices = @transform_5, window_bounds = array<i64: 1, 16>}, {pipeline_mode = #tpu.pipeline_mode<synchronous>, transform_indices = @transform_6, window_bounds = array<i64: 1, 16>}, {pipeline_mode = #tpu.pipeline_mode<synchronous>, transform_indices = @transform_7, window_bounds = array<i64: 1, 16>}, {pipeline_mode = #tpu.pipeline_mode<synchronous>, transform_indices = @transform_8, window_bounds = array<i64: 1, 16>}, {pipeline_mode = #tpu.pipeline_mode<synchronous>, transform_indices = @transform_9, window_bounds = array<i64: 16, 128>}, {pipeline_mode = #tpu.pipeline_mode<synchronous>, transform_indices = @transform_10, window_bounds = array<i64: 1, 128>}, {pipeline_mode = #tpu.pipeline_mode<synchronous>, transform_indices = @transform_11, window_bounds = array<i64: 2, 32, 128>}, {pipeline_mode = #tpu.pipeline_mode<synchronous>, transform_indices = @transform_12, window_bounds = array<i64: 2, 1, 128>}, {pipeline_mode = #tpu.pipeline_mode<synchronous>, transform_indices = @transform_13, window_bounds = array<i64: 32, 32>}, {pipeline_mode = #tpu.pipeline_mode<synchronous>, transform_indices = @transform_14, window_bounds = array<i64: 1, 32>}, {pipeline_mode = #tpu.pipeline_mode<synchronous>, transform_indices = @transform_15, window_bounds = array<i64: 1, 32>}, {pipeline_mode = #tpu.pipeline_mode<synchronous>, transform_indices = @transform_16, window_bounds = array<i64: 1, 1>}, {transform_indices = @transform_17, window_bounds = array<i64: 8, 1, 128>}, {transform_indices = @transform_18, window_bounds = array<i64: 8, 1, 8>}]} {
    %c0 = arith.constant 0 : index
    %c0_0 = arith.constant 0 : index
    %c0_1 = arith.constant 0 : index
    %0 = vector.load %arg1[%c0, %c0_0, %c0_1] : memref<8x16x16xf32, #tpu.memory_space<vmem>>, vector<8x16x16xf32>
    %1 = vector.shape_cast %0 : vector<8x16x16xf32> to vector<128x16xf32>
    %c0_2 = arith.constant 0 : index
    %c0_3 = arith.constant 0 : index
    %c0_4 = arith.constant 0 : index
    %2 = vector.load %arg2[%c0_2, %c0_3, %c0_4] : memref<8x16x1xf32, #tpu.memory_space<vmem>>, vector<8x16x1xf32>
    %3 = vector.shape_cast %2 : vector<8x16x1xf32> to vector<128x1xf32>
    %c0_5 = arith.constant 0 : index
    %c0_6 = arith.constant 0 : index
    %4 = vector.load %arg7[%c0_5, %c0_6] : memref<1x16xf32, #tpu.memory_space<vmem>>, vector<1x16xf32>
    %cst = arith.constant 9.99999974E-6 : f32
    %5 = vector.broadcast %cst : f32 to vector<1x16xf32>
    %6 = arith.addf %4, %5 : vector<1x16xf32>
    %7 = math.rsqrt %6 : vector<1x16xf32>
    %c0_7 = arith.constant 0 : index
    %c0_8 = arith.constant 0 : index
    %8 = vector.load %arg6[%c0_7, %c0_8] : memref<1x16xf32, #tpu.memory_space<vmem>>, vector<1x16xf32>
    %9 = vector.broadcast %8 : vector<1x16xf32> to vector<128x16xf32>
    %10 = arith.subf %1, %9 : vector<128x16xf32>
    %11 = vector.broadcast %7 : vector<1x16xf32> to vector<128x16xf32>
    %12 = arith.mulf %10, %11 : vector<128x16xf32>
    %c0_9 = arith.constant 0 : index
    %c0_10 = arith.constant 0 : index
    %13 = vector.load %arg8[%c0_9, %c0_10] : memref<1x16xf32, #tpu.memory_space<vmem>>, vector<1x16xf32>
    %14 = vector.broadcast %13 : vector<1x16xf32> to vector<128x16xf32>
    %15 = arith.mulf %12, %14 : vector<128x16xf32>
    %c0_11 = arith.constant 0 : index
    %c0_12 = arith.constant 0 : index
    %16 = vector.load %arg9[%c0_11, %c0_12] : memref<1x16xf32, #tpu.memory_space<vmem>>, vector<1x16xf32>
    %17 = vector.broadcast %16 : vector<1x16xf32> to vector<128x16xf32>
    %18 = arith.addf %15, %17 : vector<128x16xf32>
    %19 = vector.broadcast %3 : vector<128x1xf32> to vector<128x16xf32>
    %20 = arith.mulf %18, %19 : vector<128x16xf32>
    %c0_13 = arith.constant 0 : index
    %c0_14 = arith.constant 0 : index
    %c0_15 = arith.constant 0 : index
    %c0_16 = arith.constant 0 : index
    %21 = vector.load %arg3[%c0_13, %c0_14, %c0_15, %c0_16] : memref<8x4x16x16xf32, #tpu.memory_space<vmem>>, vector<8x4x16x16xf32>
    %c0_17 = arith.constant 0 : index
    %c0_18 = arith.constant 0 : index
    %22 = vector.load %arg10[%c0_17, %c0_18] : memref<16x128xf32, #tpu.memory_space<vmem>>, vector<16x128xf32>
    %c0_19 = arith.constant 0 : index
    %c0_20 = arith.constant 0 : index
    %23 = vector.load %arg11[%c0_19, %c0_20] : memref<1x128xf32, #tpu.memory_space<vmem>>, vector<1x128xf32>
    %cst_21 = arith.constant dense<0.000000e+00> : vector<128x128xf32>
    %24 = tpu.matmul %20, %22, %cst_21 {dimension_numbers = #tpu.dot_dimension_numbers<[1], [0], [0], [1], [0, 0, 1, 1], [], []>} : vector<128x16xf32>, vector<16x128xf32>, vector<128x128xf32> -> vector<128x128xf32>
    %25 = vector.broadcast %23 : vector<1x128xf32> to vector<128x128xf32>
    %26 = arith.addf %24, %25 : vector<128x128xf32>
    %27 = vector.extract_strided_slice %26 {offsets = [0, 0], sizes = [128, 32], strides = [1, 1]} : vector<128x128xf32> to vector<128x32xf32>
    %28 = vector.shape_cast %27 : vector<128x32xf32> to vector<8x16x32xf32>
    %29 = vector.extract_strided_slice %21 {offsets = [0, 0, 0, 0], sizes = [8, 1, 16, 16], strides = [1, 1, 1, 1]} : vector<8x4x16x16xf32> to vector<8x1x16x16xf32>
    %30 = vector.shape_cast %29 : vector<8x1x16x16xf32> to vector<8x16x16xf32>
    "tpu.trace_start"() <{level = 10 : i32, message = "bnm,bmd->bnd"}> : () -> ()
    %cst_22 = arith.constant dense<0.000000e+00> : vector<8x16x32xf32>
    %31 = tpu.matmul %30, %28, %cst_22 {dimension_numbers = #tpu.dot_dimension_numbers<[2], [1], [1], [2], [0, 0, 0, 1, 1, 2], [0], [0]>} : vector<8x16x16xf32>, vector<8x16x32xf32>, vector<8x16x32xf32> -> vector<8x16x32xf32>
    %cst_23 = arith.constant 0.000000e+00 : f32
    "tpu.trace_stop"() : () -> ()
    %32 = vector.broadcast %cst_23 : f32 to vector<8x16x32xf32>
    %33 = arith.cmpf ogt, %31, %32 : vector<8x16x32xf32>
    %cst_24 = arith.constant 0.00999999977 : f32
    %34 = vector.broadcast %cst_24 : f32 to vector<8x16x32xf32>
    %35 = arith.mulf %34, %31 : vector<8x16x32xf32>
    %36 = arith.select %33, %31, %35 : vector<8x16x32xi1>, vector<8x16x32xf32>
    %37 = vector.extract_strided_slice %26 {offsets = [0, 32], sizes = [128, 32], strides = [1, 1]} : vector<128x128xf32> to vector<128x32xf32>
    %38 = vector.shape_cast %37 : vector<128x32xf32> to vector<8x16x32xf32>
    %39 = vector.extract_strided_slice %21 {offsets = [0, 1, 0, 0], sizes = [8, 1, 16, 16], strides = [1, 1, 1, 1]} : vector<8x4x16x16xf32> to vector<8x1x16x16xf32>
    %40 = vector.shape_cast %39 : vector<8x1x16x16xf32> to vector<8x16x16xf32>
    "tpu.trace_start"() <{level = 10 : i32, message = "bnm,bmd->bnd"}> : () -> ()
    %cst_25 = arith.constant dense<0.000000e+00> : vector<8x16x32xf32>
    %41 = tpu.matmul %40, %38, %cst_25 {dimension_numbers = #tpu.dot_dimension_numbers<[2], [1], [1], [2], [0, 0, 0, 1, 1, 2], [0], [0]>} : vector<8x16x16xf32>, vector<8x16x32xf32>, vector<8x16x32xf32> -> vector<8x16x32xf32>
    %cst_26 = arith.constant 0.000000e+00 : f32
    "tpu.trace_stop"() : () -> ()
    %42 = vector.broadcast %cst_26 : f32 to vector<8x16x32xf32>
    %43 = arith.cmpf ogt, %41, %42 : vector<8x16x32xf32>
    %cst_27 = arith.constant 0.00999999977 : f32
    %44 = vector.broadcast %cst_27 : f32 to vector<8x16x32xf32>
    %45 = arith.mulf %44, %41 : vector<8x16x32xf32>
    %46 = arith.select %43, %41, %45 : vector<8x16x32xi1>, vector<8x16x32xf32>
    %47 = arith.maximumf %36, %46 : vector<8x16x32xf32>
    %48 = vector.extract_strided_slice %26 {offsets = [0, 64], sizes = [128, 32], strides = [1, 1]} : vector<128x128xf32> to vector<128x32xf32>
    %49 = vector.shape_cast %48 : vector<128x32xf32> to vector<8x16x32xf32>
    %50 = vector.extract_strided_slice %21 {offsets = [0, 2, 0, 0], sizes = [8, 1, 16, 16], strides = [1, 1, 1, 1]} : vector<8x4x16x16xf32> to vector<8x1x16x16xf32>
    %51 = vector.shape_cast %50 : vector<8x1x16x16xf32> to vector<8x16x16xf32>
    "tpu.trace_start"() <{level = 10 : i32, message = "bnm,bmd->bnd"}> : () -> ()
    %cst_28 = arith.constant dense<0.000000e+00> : vector<8x16x32xf32>
    %52 = tpu.matmul %51, %49, %cst_28 {dimension_numbers = #tpu.dot_dimension_numbers<[2], [1], [1], [2], [0, 0, 0, 1, 1, 2], [0], [0]>} : vector<8x16x16xf32>, vector<8x16x32xf32>, vector<8x16x32xf32> -> vector<8x16x32xf32>
    %cst_29 = arith.constant 0.000000e+00 : f32
    "tpu.trace_stop"() : () -> ()
    %53 = vector.broadcast %cst_29 : f32 to vector<8x16x32xf32>
    %54 = arith.cmpf ogt, %52, %53 : vector<8x16x32xf32>
    %cst_30 = arith.constant 0.00999999977 : f32
    %55 = vector.broadcast %cst_30 : f32 to vector<8x16x32xf32>
    %56 = arith.mulf %55, %52 : vector<8x16x32xf32>
    %57 = arith.select %54, %52, %56 : vector<8x16x32xi1>, vector<8x16x32xf32>
    %58 = arith.maximumf %47, %57 : vector<8x16x32xf32>
    %59 = vector.extract_strided_slice %26 {offsets = [0, 96], sizes = [128, 32], strides = [1, 1]} : vector<128x128xf32> to vector<128x32xf32>
    %60 = vector.shape_cast %59 : vector<128x32xf32> to vector<8x16x32xf32>
    %61 = vector.extract_strided_slice %21 {offsets = [0, 3, 0, 0], sizes = [8, 1, 16, 16], strides = [1, 1, 1, 1]} : vector<8x4x16x16xf32> to vector<8x1x16x16xf32>
    %62 = vector.shape_cast %61 : vector<8x1x16x16xf32> to vector<8x16x16xf32>
    "tpu.trace_start"() <{level = 10 : i32, message = "bnm,bmd->bnd"}> : () -> ()
    %cst_31 = arith.constant dense<0.000000e+00> : vector<8x16x32xf32>
    %63 = tpu.matmul %62, %60, %cst_31 {dimension_numbers = #tpu.dot_dimension_numbers<[2], [1], [1], [2], [0, 0, 0, 1, 1, 2], [0], [0]>} : vector<8x16x16xf32>, vector<8x16x32xf32>, vector<8x16x32xf32> -> vector<8x16x32xf32>
    %cst_32 = arith.constant 0.000000e+00 : f32
    "tpu.trace_stop"() : () -> ()
    %64 = vector.broadcast %cst_32 : f32 to vector<8x16x32xf32>
    %65 = arith.cmpf ogt, %63, %64 : vector<8x16x32xf32>
    %cst_33 = arith.constant 0.00999999977 : f32
    %66 = vector.broadcast %cst_33 : f32 to vector<8x16x32xf32>
    %67 = arith.mulf %66, %63 : vector<8x16x32xf32>
    %68 = arith.select %65, %63, %67 : vector<8x16x32xi1>, vector<8x16x32xf32>
    %69 = arith.maximumf %58, %68 : vector<8x16x32xf32>
    %c0_i32 = arith.constant 0 : i32
    %c2_i32 = arith.constant 2 : i32
    %70 = arith.addi %c0_i32, %c2_i32 : i32
    %c1_i32 = arith.constant 1 : i32
    %71 = scf.for %arg20 = %c0_i32 to %70 step %c1_i32 iter_args(%arg21 = %69) -> (vector<8x16x32xf32>)  : i32 {
      %105 = vector.shape_cast %arg21 : vector<8x16x32xf32> to vector<128x32xf32>
      %106 = arith.index_cast %arg20 : i32 to index
      %c0_62 = arith.constant 0 : index
      %c0_63 = arith.constant 0 : index
      %107 = vector.load %arg12[%106, %c0_62, %c0_63] : memref<2x32x128xf32, #tpu.memory_space<vmem>>, vector<1x32x128xf32>
      %108 = vector.shape_cast %107 : vector<1x32x128xf32> to vector<32x128xf32>
      %109 = arith.index_cast %arg20 : i32 to index
      %c0_64 = arith.constant 0 : index
      %c0_65 = arith.constant 0 : index
      %110 = vector.load %arg13[%109, %c0_64, %c0_65] : memref<2x1x128xf32, #tpu.memory_space<vmem>>, vector<1x1x128xf32>
      %111 = vector.shape_cast %110 : vector<1x1x128xf32> to vector<1x128xf32>
      %cst_66 = arith.constant dense<0.000000e+00> : vector<128x128xf32>
      %112 = tpu.matmul %105, %108, %cst_66 {dimension_numbers = #tpu.dot_dimension_numbers<[1], [0], [0], [1], [0, 0, 1, 1], [], []>} : vector<128x32xf32>, vector<32x128xf32>, vector<128x128xf32> -> vector<128x128xf32>
      %113 = vector.broadcast %111 : vector<1x128xf32> to vector<128x128xf32>
      %114 = arith.addf %112, %113 : vector<128x128xf32>
      %115 = vector.extract_strided_slice %114 {offsets = [0, 0], sizes = [128, 32], strides = [1, 1]} : vector<128x128xf32> to vector<128x32xf32>
      %116 = vector.shape_cast %115 : vector<128x32xf32> to vector<8x16x32xf32>
      %117 = vector.extract_strided_slice %21 {offsets = [0, 0, 0, 0], sizes = [8, 1, 16, 16], strides = [1, 1, 1, 1]} : vector<8x4x16x16xf32> to vector<8x1x16x16xf32>
      %118 = vector.shape_cast %117 : vector<8x1x16x16xf32> to vector<8x16x16xf32>
      "tpu.trace_start"() <{level = 10 : i32, message = "bnm,bmd->bnd"}> : () -> ()
      %cst_67 = arith.constant dense<0.000000e+00> : vector<8x16x32xf32>
      %119 = tpu.matmul %118, %116, %cst_67 {dimension_numbers = #tpu.dot_dimension_numbers<[2], [1], [1], [2], [0, 0, 0, 1, 1, 2], [0], [0]>} : vector<8x16x16xf32>, vector<8x16x32xf32>, vector<8x16x32xf32> -> vector<8x16x32xf32>
      %cst_68 = arith.constant 0.000000e+00 : f32
      "tpu.trace_stop"() : () -> ()
      %120 = vector.broadcast %cst_68 : f32 to vector<8x16x32xf32>
      %121 = arith.cmpf ogt, %119, %120 : vector<8x16x32xf32>
      %cst_69 = arith.constant 0.00999999977 : f32
      %122 = vector.broadcast %cst_69 : f32 to vector<8x16x32xf32>
      %123 = arith.mulf %122, %119 : vector<8x16x32xf32>
      %124 = arith.select %121, %119, %123 : vector<8x16x32xi1>, vector<8x16x32xf32>
      %125 = vector.extract_strided_slice %114 {offsets = [0, 32], sizes = [128, 32], strides = [1, 1]} : vector<128x128xf32> to vector<128x32xf32>
      %126 = vector.shape_cast %125 : vector<128x32xf32> to vector<8x16x32xf32>
      %127 = vector.extract_strided_slice %21 {offsets = [0, 1, 0, 0], sizes = [8, 1, 16, 16], strides = [1, 1, 1, 1]} : vector<8x4x16x16xf32> to vector<8x1x16x16xf32>
      %128 = vector.shape_cast %127 : vector<8x1x16x16xf32> to vector<8x16x16xf32>
      "tpu.trace_start"() <{level = 10 : i32, message = "bnm,bmd->bnd"}> : () -> ()
      %cst_70 = arith.constant dense<0.000000e+00> : vector<8x16x32xf32>
      %129 = tpu.matmul %128, %126, %cst_70 {dimension_numbers = #tpu.dot_dimension_numbers<[2], [1], [1], [2], [0, 0, 0, 1, 1, 2], [0], [0]>} : vector<8x16x16xf32>, vector<8x16x32xf32>, vector<8x16x32xf32> -> vector<8x16x32xf32>
      %cst_71 = arith.constant 0.000000e+00 : f32
      "tpu.trace_stop"() : () -> ()
      %130 = vector.broadcast %cst_71 : f32 to vector<8x16x32xf32>
      %131 = arith.cmpf ogt, %129, %130 : vector<8x16x32xf32>
      %cst_72 = arith.constant 0.00999999977 : f32
      %132 = vector.broadcast %cst_72 : f32 to vector<8x16x32xf32>
      %133 = arith.mulf %132, %129 : vector<8x16x32xf32>
      %134 = arith.select %131, %129, %133 : vector<8x16x32xi1>, vector<8x16x32xf32>
      %135 = arith.maximumf %124, %134 : vector<8x16x32xf32>
      %136 = vector.extract_strided_slice %114 {offsets = [0, 64], sizes = [128, 32], strides = [1, 1]} : vector<128x128xf32> to vector<128x32xf32>
      %137 = vector.shape_cast %136 : vector<128x32xf32> to vector<8x16x32xf32>
      %138 = vector.extract_strided_slice %21 {offsets = [0, 2, 0, 0], sizes = [8, 1, 16, 16], strides = [1, 1, 1, 1]} : vector<8x4x16x16xf32> to vector<8x1x16x16xf32>
      %139 = vector.shape_cast %138 : vector<8x1x16x16xf32> to vector<8x16x16xf32>
      "tpu.trace_start"() <{level = 10 : i32, message = "bnm,bmd->bnd"}> : () -> ()
      %cst_73 = arith.constant dense<0.000000e+00> : vector<8x16x32xf32>
      %140 = tpu.matmul %139, %137, %cst_73 {dimension_numbers = #tpu.dot_dimension_numbers<[2], [1], [1], [2], [0, 0, 0, 1, 1, 2], [0], [0]>} : vector<8x16x16xf32>, vector<8x16x32xf32>, vector<8x16x32xf32> -> vector<8x16x32xf32>
      %cst_74 = arith.constant 0.000000e+00 : f32
      "tpu.trace_stop"() : () -> ()
      %141 = vector.broadcast %cst_74 : f32 to vector<8x16x32xf32>
      %142 = arith.cmpf ogt, %140, %141 : vector<8x16x32xf32>
      %cst_75 = arith.constant 0.00999999977 : f32
      %143 = vector.broadcast %cst_75 : f32 to vector<8x16x32xf32>
      %144 = arith.mulf %143, %140 : vector<8x16x32xf32>
      %145 = arith.select %142, %140, %144 : vector<8x16x32xi1>, vector<8x16x32xf32>
      %146 = arith.maximumf %135, %145 : vector<8x16x32xf32>
      %147 = vector.extract_strided_slice %114 {offsets = [0, 96], sizes = [128, 32], strides = [1, 1]} : vector<128x128xf32> to vector<128x32xf32>
      %148 = vector.shape_cast %147 : vector<128x32xf32> to vector<8x16x32xf32>
      %149 = vector.extract_strided_slice %21 {offsets = [0, 3, 0, 0], sizes = [8, 1, 16, 16], strides = [1, 1, 1, 1]} : vector<8x4x16x16xf32> to vector<8x1x16x16xf32>
      %150 = vector.shape_cast %149 : vector<8x1x16x16xf32> to vector<8x16x16xf32>
      "tpu.trace_start"() <{level = 10 : i32, message = "bnm,bmd->bnd"}> : () -> ()
      %cst_76 = arith.constant dense<0.000000e+00> : vector<8x16x32xf32>
      %151 = tpu.matmul %150, %148, %cst_76 {dimension_numbers = #tpu.dot_dimension_numbers<[2], [1], [1], [2], [0, 0, 0, 1, 1, 2], [0], [0]>} : vector<8x16x16xf32>, vector<8x16x32xf32>, vector<8x16x32xf32> -> vector<8x16x32xf32>
      %cst_77 = arith.constant 0.000000e+00 : f32
      "tpu.trace_stop"() : () -> ()
      %152 = vector.broadcast %cst_77 : f32 to vector<8x16x32xf32>
      %153 = arith.cmpf ogt, %151, %152 : vector<8x16x32xf32>
      %cst_78 = arith.constant 0.00999999977 : f32
      %154 = vector.broadcast %cst_78 : f32 to vector<8x16x32xf32>
      %155 = arith.mulf %154, %151 : vector<8x16x32xf32>
      %156 = arith.select %153, %151, %155 : vector<8x16x32xi1>, vector<8x16x32xf32>
      %157 = arith.maximumf %146, %156 : vector<8x16x32xf32>
      %158 = arith.addf %arg21, %157 : vector<8x16x32xf32>
      scf.yield %158 : vector<8x16x32xf32>
    }
    %c2_i32_34 = arith.constant 2 : i32
    %c0_35 = arith.constant 0 : index
    %c0_36 = arith.constant 0 : index
    %c0_37 = arith.constant 0 : index
    %72 = vector.load %arg4[%c0_35, %c0_36, %c0_37] : memref<8x8x16xf32, #tpu.memory_space<vmem>>, vector<8x8x16xf32>
    "tpu.trace_start"() <{level = 10 : i32, message = "bsn,bnd->bsd"}> : () -> ()
    %cst_38 = arith.constant dense<0.000000e+00> : vector<8x8x32xf32>
    %73 = tpu.matmul %72, %71, %cst_38 {dimension_numbers = #tpu.dot_dimension_numbers<[2], [1], [1], [2], [0, 0, 0, 1, 1, 2], [0], [0]>} : vector<8x8x16xf32>, vector<8x16x32xf32>, vector<8x8x32xf32> -> vector<8x8x32xf32>
    "tpu.trace_stop"() : () -> ()
    %74 = vector.shape_cast %73 : vector<8x8x32xf32> to vector<64x32xf32>
    %c0_39 = arith.constant 0 : index
    %c0_40 = arith.constant 0 : index
    %75 = vector.load %arg14[%c0_39, %c0_40] : memref<32x32xf32, #tpu.memory_space<vmem>>, vector<32x32xf32>
    %cst_41 = arith.constant dense<0.000000e+00> : vector<64x32xf32>
    %76 = tpu.matmul %74, %75, %cst_41 {dimension_numbers = #tpu.dot_dimension_numbers<[1], [0], [0], [1], [0, 0, 1, 1], [], []>} : vector<64x32xf32>, vector<32x32xf32>, vector<64x32xf32> -> vector<64x32xf32>
    %c0_42 = arith.constant 0 : index
    %c0_43 = arith.constant 0 : index
    %77 = vector.load %arg15[%c0_42, %c0_43] : memref<1x32xf32, #tpu.memory_space<vmem>>, vector<1x32xf32>
    %78 = vector.broadcast %77 : vector<1x32xf32> to vector<64x32xf32>
    %79 = arith.addf %76, %78 : vector<64x32xf32>
    %cst_44 = arith.constant 0.000000e+00 : f32
    %80 = vector.broadcast %cst_44 : f32 to vector<64x32xf32>
    %81 = arith.maximumf %79, %80 : vector<64x32xf32>
    %82 = vector.shape_cast %81 : vector<64x32xf32> to vector<8x8x32xf32>
    %c0_45 = arith.constant 0 : index
    %c0_46 = arith.constant 0 : index
    %83 = vector.load %arg16[%c0_45, %c0_46] : memref<1x32xf32, #tpu.memory_space<vmem>>, vector<1x32xf32>
    %84 = vector.shape_cast %83 : vector<1x32xf32> to vector<1x1x32xf32>
    %85 = vector.broadcast %84 : vector<1x1x32xf32> to vector<8x8x32xf32>
    %86 = arith.mulf %82, %85 : vector<8x8x32xf32>
    %cst_47 = arith.constant dense<0.000000e+00> : vector<8x8xf32>
    %87 = vector.multi_reduction <add>, %86, %cst_47 [2] : vector<8x8x32xf32> to vector<8x8xf32>
    %c0_48 = arith.constant 0 : index
    %c0_49 = arith.constant 0 : index
    %88 = vector.load %arg17[%c0_48, %c0_49] : memref<1x1xf32, #tpu.memory_space<vmem>>, vector<1x1xf32>
    %89 = vector.broadcast %88 : vector<1x1xf32> to vector<8x8xf32>
    %90 = arith.addf %87, %89 : vector<8x8xf32>
    %cst_50 = arith.constant dense<0xFF800000> : vector<8xf32>
    %91 = vector.multi_reduction <maximumf>, %90, %cst_50 [1] : vector<8x8xf32> to vector<8xf32>
    %92 = vector.shape_cast %91 : vector<8xf32> to vector<8x1xf32>
    %93 = vector.broadcast %92 : vector<8x1xf32> to vector<8x8xf32>
    %94 = arith.subf %90, %93 : vector<8x8xf32>
    %95 = math.exp %94 : vector<8x8xf32>
    %cst_51 = arith.constant dense<0.000000e+00> : vector<8xf32>
    %96 = vector.multi_reduction <add>, %95, %cst_51 [1] : vector<8x8xf32> to vector<8xf32>
    %97 = vector.shape_cast %96 : vector<8xf32> to vector<8x1xf32>
    %98 = vector.broadcast %97 : vector<8x1xf32> to vector<8x8xf32>
    %99 = arith.divf %95, %98 : vector<8x8xf32>
    %100 = vector.shape_cast %99 : vector<8x8xf32> to vector<8x1x8xf32>
    %c0_52 = arith.constant 0 : index
    %c0_53 = arith.constant 0 : index
    %c0_54 = arith.constant 0 : index
    %101 = vector.load %arg19[%c0_52, %c0_53, %c0_54] : memref<8x1x8xf32, #tpu.memory_space<vmem>>, vector<8x1x8xf32>
    tpu.vector_store %arg19[%c0_52, %c0_53, %c0_54], %100 {strides = array<i32>} : memref<8x1x8xf32, #tpu.memory_space<vmem>>, vector<8x1x8xf32>,
    %c0_55 = arith.constant 0 : index
    %c0_56 = arith.constant 0 : index
    %c0_57 = arith.constant 0 : index
    %102 = vector.load %arg5[%c0_55, %c0_56, %c0_57] : memref<8x8x128xf32, #tpu.memory_space<vmem>>, vector<8x8x128xf32>
    "tpu.trace_start"() <{level = 10 : i32, message = "bis,bsm->bim"}> : () -> ()
    %cst_58 = arith.constant dense<0.000000e+00> : vector<8x1x128xf32>
    %103 = tpu.matmul %100, %102, %cst_58 {dimension_numbers = #tpu.dot_dimension_numbers<[2], [1], [1], [2], [0, 0, 0, 1, 1, 2], [0], [0]>} : vector<8x1x8xf32>, vector<8x8x128xf32>, vector<8x1x128xf32> -> vector<8x1x128xf32>
    "tpu.trace_stop"() : () -> ()
    %c0_59 = arith.constant 0 : index
    %c0_60 = arith.constant 0 : index
    %c0_61 = arith.constant 0 : index
    %104 = vector.load %arg18[%c0_59, %c0_60, %c0_61] : memref<8x1x128xf32, #tpu.memory_space<vmem>>, vector<8x1x128xf32>
    tpu.vector_store %arg18[%c0_59, %c0_60, %c0_61], %103 {strides = array<i32>} : memref<8x1x128xf32, #tpu.memory_space<vmem>>, vector<8x1x128xf32>,
    return
  }
  func.func @transform_0(%arg0: i32) -> (i32, i32, i32) {
    %c0_i32 = arith.constant 0 : i32
    %c0_i32_0 = arith.constant 0 : i32
    %c0_i32_1 = arith.constant 0 : i32
    return %arg0, %c0_i32, %c0_i32_0 : i32, i32, i32
  }
  func.func @transform_1(%arg0: i32) -> (i32, i32, i32) {
    %c0_i32 = arith.constant 0 : i32
    %c0_i32_0 = arith.constant 0 : i32
    %c0_i32_1 = arith.constant 0 : i32
    return %arg0, %c0_i32, %c0_i32_0 : i32, i32, i32
  }
  func.func @transform_2(%arg0: i32) -> (i32, i32, i32, i32) {
    %c0_i32 = arith.constant 0 : i32
    %c0_i32_0 = arith.constant 0 : i32
    %c0_i32_1 = arith.constant 0 : i32
    %c0_i32_2 = arith.constant 0 : i32
    return %arg0, %c0_i32, %c0_i32_0, %c0_i32_1 : i32, i32, i32, i32
  }
  func.func @transform_3(%arg0: i32) -> (i32, i32, i32) {
    %c0_i32 = arith.constant 0 : i32
    %c0_i32_0 = arith.constant 0 : i32
    %c0_i32_1 = arith.constant 0 : i32
    return %arg0, %c0_i32, %c0_i32_0 : i32, i32, i32
  }
  func.func @transform_4(%arg0: i32) -> (i32, i32, i32) {
    %c0_i32 = arith.constant 0 : i32
    %c0_i32_0 = arith.constant 0 : i32
    %c0_i32_1 = arith.constant 0 : i32
    return %arg0, %c0_i32, %c0_i32_0 : i32, i32, i32
  }
  func.func @transform_5(%arg0: i32) -> (i32, i32) {
    %c0_i32 = arith.constant 0 : i32
    %c0_i32_0 = arith.constant 0 : i32
    %c0_i32_1 = arith.constant 0 : i32
    return %c0_i32, %c0_i32_0 : i32, i32
  }
  func.func @transform_6(%arg0: i32) -> (i32, i32) {
    %c0_i32 = arith.constant 0 : i32
    %c0_i32_0 = arith.constant 0 : i32
    %c0_i32_1 = arith.constant 0 : i32
    return %c0_i32, %c0_i32_0 : i32, i32
  }
  func.func @transform_7(%arg0: i32) -> (i32, i32) {
    %c0_i32 = arith.constant 0 : i32
    %c0_i32_0 = arith.constant 0 : i32
    %c0_i32_1 = arith.constant 0 : i32
    return %c0_i32, %c0_i32_0 : i32, i32
  }
  func.func @transform_8(%arg0: i32) -> (i32, i32) {
    %c0_i32 = arith.constant 0 : i32
    %c0_i32_0 = arith.constant 0 : i32
    %c0_i32_1 = arith.constant 0 : i32
    return %c0_i32, %c0_i32_0 : i32, i32
  }
  func.func @transform_9(%arg0: i32) -> (i32, i32) {
    %c0_i32 = arith.constant 0 : i32
    %c0_i32_0 = arith.constant 0 : i32
    %c0_i32_1 = arith.constant 0 : i32
    return %c0_i32, %c0_i32_0 : i32, i32
  }
  func.func @transform_10(%arg0: i32) -> (i32, i32) {
    %c0_i32 = arith.constant 0 : i32
    %c0_i32_0 = arith.constant 0 : i32
    %c0_i32_1 = arith.constant 0 : i32
    return %c0_i32, %c0_i32_0 : i32, i32
  }
  func.func @transform_11(%arg0: i32) -> (i32, i32, i32) {
    %c0_i32 = arith.constant 0 : i32
    %c0_i32_0 = arith.constant 0 : i32
    %c0_i32_1 = arith.constant 0 : i32
    %c0_i32_2 = arith.constant 0 : i32
    return %c0_i32, %c0_i32_0, %c0_i32_1 : i32, i32, i32
  }
  func.func @transform_12(%arg0: i32) -> (i32, i32, i32) {
    %c0_i32 = arith.constant 0 : i32
    %c0_i32_0 = arith.constant 0 : i32
    %c0_i32_1 = arith.constant 0 : i32
    %c0_i32_2 = arith.constant 0 : i32
    return %c0_i32, %c0_i32_0, %c0_i32_1 : i32, i32, i32
  }
  func.func @transform_13(%arg0: i32) -> (i32, i32) {
    %c0_i32 = arith.constant 0 : i32
    %c0_i32_0 = arith.constant 0 : i32
    %c0_i32_1 = arith.constant 0 : i32
    return %c0_i32, %c0_i32_0 : i32, i32
  }
  func.func @transform_14(%arg0: i32) -> (i32, i32) {
    %c0_i32 = arith.constant 0 : i32
    %c0_i32_0 = arith.constant 0 : i32
    %c0_i32_1 = arith.constant 0 : i32
    return %c0_i32, %c0_i32_0 : i32, i32
  }
  func.func @transform_15(%arg0: i32) -> (i32, i32) {
    %c0_i32 = arith.constant 0 : i32
    %c0_i32_0 = arith.constant 0 : i32
    %c0_i32_1 = arith.constant 0 : i32
    return %c0_i32, %c0_i32_0 : i32, i32
  }
  func.func @transform_16(%arg0: i32) -> (i32, i32) {
    %c0_i32 = arith.constant 0 : i32
    %c0_i32_0 = arith.constant 0 : i32
    %c0_i32_1 = arith.constant 0 : i32
    return %c0_i32, %c0_i32_0 : i32, i32
  }
  func.func @transform_17(%arg0: i32) -> (i32, i32, i32) {
    %c0_i32 = arith.constant 0 : i32
    %c0_i32_0 = arith.constant 0 : i32
    %c0_i32_1 = arith.constant 0 : i32
    return %arg0, %c0_i32, %c0_i32_0 : i32, i32, i32
  }
  func.func @transform_18(%arg0: i32) -> (i32, i32, i32) {
    %c0_i32 = arith.constant 0 : i32
    %c0_i32_0 = arith.constant 0 : i32
    %c0_i32_1 = arith.constant 0 : i32
    return %arg0, %c0_i32, %c0_i32_0 : i32, i32, i32
  }
}

</mosaic_0001>

<bundles_post_ra>
// kernel: tpu_custom_call.1
= control target key start
LH: loop header
LB: loop body
LE: loop exit
PB: predicated region body
PF: predicated region fallthrough
CT: control target
= control target key end

     0   :  { %s12702_s0 = inlined_call_operand.vmem [shape: f32[8,16,16], index: 0, kind: input, shape index: {}]   ;;  %s12703_s1 = inlined_call_operand.vmem [shape: f32[8,16,1], index: 1, kind: input, shape index: {}]   ;;  %s12704_s2 = inlined_call_operand.hbm [shape: f32[8,4,16,16], index: 2, kind: input, shape index: {}]   ;;  %s12705_s3 = inlined_call_operand.hbm [shape: f32[8,8,16], index: 3, kind: input, shape index: {}]   ;;  %s12706_s4 = inlined_call_operand.hbm [shape: f32[8,8,128], index: 4, kind: input, shape index: {}]   ;;  %s12707_s5 = inlined_call_operand.vmem [shape: f32[1,16], index: 5, kind: input, shape index: {}]   ;;  %s12708_s6 = inlined_call_operand.hbm [shape: f32[1,16], index: 6, kind: input, shape index: {}]   ;;  %s12709_s7 = inlined_call_operand.hbm [shape: f32[1,16], index: 7, kind: input, shape index: {}]   ;;  %s12710_s8 = inlined_call_operand.hbm [shape: f32[1,16], index: 8, kind: input, shape index: {}]   ;;  %s12711_s9 = inlined_call_operand.hbm [shape: f32[16,128], index: 9, kind: input, shape index: {}]   ;;  %s12712_s10 = inlined_call_operand.hbm [shape: f32[1,128], index: 10, kind: input, shape index: {}]   ;;  %s12713_s11 = inlined_call_operand.hbm [shape: f32[2,32,128], index: 11, kind: input, shape index: {}]   ;;  %s12714_s12 = inlined_call_operand.hbm [shape: f32[2,1,128], index: 12, kind: input, shape index: {}]   ;;  %s12715_s13 = inlined_call_operand.vmem [shape: f32[32,32], index: 13, kind: input, shape index: {}]   ;;  %s12716_s14 = inlined_call_operand.vmem [shape: f32[1,32], index: 14, kind: input, shape index: {}]   ;;  %s12717_s15 = inlined_call_operand.vmem [shape: f32[1,32], index: 15, kind: input, shape index: {}]   ;;  %s12718_s16 = inlined_call_operand.<no memory space> [shape: f32[1,1], index: 16, kind: input, shape index: {}]   ;;  %s12719_s17 = inlined_call_operand.hbm [shape: f32[8,1,128], index: 17, kind: output, shape index: {0}]   ;;  %s12720_s18 = inlined_call_operand.hbm [shape: f32[8,1,8], index: 18, kind: output, shape index: {1}]  }
   0x1   :  { %12805 = sst [smem:[#allocation108_spill]] %s12702_s0  ;;  %v24_v0 = vstv %s12718_s16 }
   0x2   :  { %12806 = sst [smem:[#allocation109_spill]] %s12703_s1  ;;  %25 = vst [vmem:[#allocation2] sm:$0x1] %v24_v0 }
   0x3   :  { %12807 = sst [smem:[#allocation110_spill]] %s12704_s2 }
   0x4   :  { %26 = vsyncpa [#allocation4], 0 }
   0x5   :  { %27 = vsyncpa [#allocation7], 0 }
   0x6   :  { %28 = vsyncpa [#allocation10], 0 }
   0x7   :  { %29 = vsyncpa [#allocation13], 0 }
   0x8   :  { %30 = vsyncpa [#allocation16], 0 }
   0x9   :  { %31 = vsyncpa [#allocation19], 0 }
   0xa   :  { %32 = vsyncpa [#allocation5], 0 }
   0xb   :  { %33 = vsyncpa [#allocation22], 0  ;;  %s10294_s29 = smov [#allocation6]   ;;  %s10295_s0 = smov [#allocation9]  }
   0xc   :  { %s55_s30 = sshll.u32 %s10294_s29, 4  ;;  %s82_s19 = sshll.u32 %s10295_s0, 4  ;;  %s56_s30 = int_to_ptr.vmem [resolvable:$true] %s55_s30  ;;  %s83_s19 = int_to_ptr.vmem [resolvable:$true] %s82_s19 }
   0xd   :  { %s9910_s1 = scalar_lea.vmem %s56_s30, 1024  ;;  %p9915_p1 = scmp.lt.s32.totalorder %s56_s30, %s56_s30 }
   0xe   :  { %p9911_p0 = scmp.ne.s32.totalorder %s56_s30, %s9910_s1  ;;  %p9916_p2 = scmp.lt.s32.totalorder %s9910_s1, %s9910_s1 }
  0x10   :  { %p9917_p3 = por %p9916_p2, %p9915_p1 }
  0x12   :  { %p9918_p4 = pnand %p9917_p3, %p9911_p0 }
  0x14   :  { %9921 = shalt.err (!%p9918_p4)
}
  0x15   :  { %s10296_s16 = smov 128   ;;  %s10297_s20 = smov 8  }
  0x16   :  { %61 = dma.hbm_to_vmem [thread:$0]  %s12705_s3, 1024, %s56_s30, [#allocation7], %s10296_s16, %s10296_s16, %s10297_s20  }
  0x17   :  { %s9930_s2 = scalar_lea.vmem %s83_s19, 16  ;;  %s9934_s23 = scalar_lea.vmem %s83_s19, 32 }
  0x18   :  { %p9931_p5 = scmp.ne.s32.totalorder %s83_s19, %s9930_s2  ;;  %p9935_p6 = scmp.lt.s32.totalorder %s83_s19, %s83_s19 }
  0x19   :  { %p9936_p7 = scmp.lt.s32.totalorder %s9934_s23, %s9930_s2 }
  0x1b   :  { %p9937_p8 = por %p9936_p7, %p9935_p6 }
  0x1d   :  { %p9938_p9 = pnand %p9937_p8, %p9931_p5 }
  0x1f   :  { %9941 = shalt.err (!%p9938_p9)
}
  0x20   :  { %85 = dma.hbm_to_vmem [thread:$0]  %s12708_s6, 16, %s83_s19, [#allocation10]  }
  0x21   :  { %s10298_s26 = smov [#allocation12]   ;;  %s10299_s28 = smov [#allocation15]  }
  0x22   :  { %s102_s27 = sshll.u32 %s10298_s26, 4  ;;  %s124_s29 = sshll.u32 %s10299_s28, 4  ;;  %s103_s27 = int_to_ptr.vmem [resolvable:$true] %s102_s27  ;;  %s125_s29 = int_to_ptr.vmem [resolvable:$true] %s124_s29 }
  0x23   :  { %s9950_s0 = scalar_lea.vmem %s103_s27, 16  ;;  %s9954_s3 = scalar_lea.vmem %s103_s27, 32 }
  0x24   :  { %p9951_p10 = scmp.ne.s32.totalorder %s103_s27, %s9950_s0  ;;  %p9955_p11 = scmp.lt.s32.totalorder %s103_s27, %s103_s27 }
  0x25   :  { %p9956_p12 = scmp.lt.s32.totalorder %s9954_s3, %s9950_s0 }
  0x27   :  { %p9957_p13 = por %p9956_p12, %p9955_p11 }
  0x29   :  { %p9958_p0 = pnand %p9957_p13, %p9951_p10 }
  0x2b   :  { %9961 = shalt.err (!%p9958_p0)
}
  0x2c   :  { %105 = dma.hbm_to_vmem [thread:$0]  %s12710_s8, 16, %s103_s27, [#allocation13]  }
  0x2d   :  { %s9970_s21 = scalar_lea.vmem %s125_s29, 16  ;;  %s9974_s6 = scalar_lea.vmem %s125_s29, 32 }
  0x2e   :  { %p9971_p1 = scmp.ne.s32.totalorder %s125_s29, %s9970_s21  ;;  %p9975_p2 = scmp.lt.s32.totalorder %s125_s29, %s125_s29 }
  0x2f   :  { %p9976_p3 = scmp.lt.s32.totalorder %s9974_s6, %s9970_s21 }
  0x31   :  { %p9977_p4 = por %p9976_p3, %p9975_p2 }
  0x33   :  { %p9978_p5 = pnand %p9977_p4, %p9971_p1 }
  0x35   :  { %9981 = shalt.err (!%p9978_p5)
}
  0x36   :  { %127 = dma.hbm_to_vmem [thread:$0]  %s12712_s10, 16, %s125_s29, [#allocation16]  }
  0x37   :  { %s10300_s2 = smov [#allocation3]   ;;  %s10301_s24 = smov [#allocation8]  }
  0x38   :  { %s43_s23 = sshll.u32 %s10300_s2, 4  ;;  %s67_s25 = sshll.u32 %s10301_s24, 4  ;;  %s44_s23 = int_to_ptr.vmem [resolvable:$true] %s43_s23  ;;  %s68_s25 = int_to_ptr.vmem [resolvable:$true] %s67_s25 }
  0x39   :  { %s9990_s26 = scalar_lea.vmem %s44_s23, 8192  ;;  %p9995_p7 = scmp.lt.s32.totalorder %s44_s23, %s44_s23 }
  0x3a   :  { %p9991_p6 = scmp.ne.s32.totalorder %s44_s23, %s9990_s26  ;;  %p9996_p8 = scmp.lt.s32.totalorder %s9990_s26, %s9990_s26 }
  0x3c   :  { %p9997_p9 = por %p9996_p8, %p9995_p7 }
  0x3e   :  { %p9998_p10 = pnand %p9997_p9, %p9991_p6 }
  0x40   :  { %10001 = shalt.err (!%p9998_p10)
}
  0x41   :  { %s12808_s28 = sld [smem:[#allocation110_spill]]  ;;  %s10010_s10 = scalar_lea.vmem %s68_s25, 1024 }
  0x42   :  { %p10011_p11 = scmp.ne.s32.totalorder %s68_s25, %s10010_s10  ;;  %p10015_p12 = scmp.lt.s32.totalorder %s68_s25, %s68_s25 }
  0x43   :  { %p10016_p13 = scmp.lt.s32.totalorder %s10010_s10, %s10010_s10 }
  0x45   :  { %p10017_p0 = por %p10016_p13, %p10015_p12 }
  0x47   :  { %49 = dma.hbm_to_vmem [thread:$0]  %s12808_s28, 8192, %s44_s23, [#allocation4], %s10296_s16, %s10296_s16, %s10297_s20  }
  0x48   :  { %p10018_p1 = pnand %p10017_p0, %p10011_p11 }
  0x4a   :  { %10021 = shalt.err (!%p10018_p1)
}
  0x4b   :  { %73 = dma.hbm_to_vmem [thread:$0]  %s12706_s4, 1024, %s68_s25, [#allocation7], %s10296_s16, %s10296_s16, %s10297_s20  }
  0x4c   :  { %s10302_s3 = smov [#allocation11]   ;;  %s10303_s1 = smov [#allocation14]  }
  0x4d   :  { %s92_s30 = sshll.u32 %s10302_s3, 4  ;;  %s111_s21 = sshll.u32 %s10303_s1, 4  ;;  %s93_s30 = int_to_ptr.vmem [resolvable:$true] %s92_s30  ;;  %s112_s21 = int_to_ptr.vmem [resolvable:$true] %s111_s21 }
  0x4e   :  { %s10030_s6 = scalar_lea.vmem %s93_s30, 16  ;;  %s10034_s19 = scalar_lea.vmem %s93_s30, 32 }
  0x4f   :  { %p10031_p2 = scmp.ne.s32.totalorder %s93_s30, %s10030_s6  ;;  %p10035_p3 = scmp.lt.s32.totalorder %s93_s30, %s93_s30 }
  0x50   :  { %p10036_p4 = scmp.lt.s32.totalorder %s10034_s19, %s10030_s6 }
  0x52   :  { %p10037_p5 = por %p10036_p4, %p10035_p3 }
  0x54   :  { %p10038_p6 = pnand %p10037_p5, %p10031_p2 }
  0x56   :  { %10041 = shalt.err (!%p10038_p6)
}
  0x57   :  { %95 = dma.hbm_to_vmem [thread:$0]  %s12709_s7, 16, %s93_s30, [#allocation10]  }
  0x58   :  { %s10050_s23 = scalar_lea.vmem %s112_s21, 256  ;;  %p10055_p8 = scmp.lt.s32.totalorder %s112_s21, %s112_s21 }
  0x59   :  { %p10051_p7 = scmp.ne.s32.totalorder %s112_s21, %s10050_s23  ;;  %p10056_p9 = scmp.lt.s32.totalorder %s10050_s23, %s10050_s23 }
  0x5b   :  { %p10057_p10 = por %p10056_p9, %p10055_p8 }
  0x5d   :  { %p10058_p11 = pnand %p10057_p10, %p10051_p7 }
  0x5f   :  { %10061 = shalt.err (!%p10058_p11)
}
  0x60   :  { %117 = dma.hbm_to_vmem [thread:$0]  %s12711_s9, 256, %s112_s21, [#allocation13], %s10296_s16, %s10296_s16, %s10297_s20  }
  0x61   :  { %s10304_s25 = smov [#allocation17]   ;;  %s10305_s8 = smov [#allocation18]  }
  0x62   :  { %s133_s26 = sshll.u32 %s10304_s25, 4  ;;  %s145_s27 = sshll.u32 %s10305_s8, 4  ;;  %s134_s26 = int_to_ptr.vmem [resolvable:$true] %s133_s26  ;;  %s146_s27 = int_to_ptr.vmem [resolvable:$true] %s145_s27 }
  0x63   :  { %s10070_s7 = scalar_lea.vmem %s134_s26, 1024  ;;  %p10075_p13 = scmp.lt.s32.totalorder %s134_s26, %s134_s26 }
  0x64   :  { %p10071_p12 = scmp.ne.s32.totalorder %s134_s26, %s10070_s7  ;;  %p10076_p0 = scmp.lt.s32.totalorder %s10070_s7, %s10070_s7 }
  0x66   :  { %p10077_p1 = por %p10076_p0, %p10075_p13 }
  0x68   :  { %p10078_p2 = pnand %p10077_p1, %p10071_p12 }
  0x6a   :  { %10081 = shalt.err (!%p10078_p2)
}
  0x6b   :  { %139 = dma.hbm_to_vmem [thread:$0]  %s12713_s11, 1024, %s134_s26, [#allocation16], %s10296_s16, %s10296_s16, %s10297_s20  }
  0x6c   :  { %s10090_s9 = scalar_lea.vmem %s146_s27, 32  ;;  %p10095_p4 = scmp.lt.s32.totalorder %s146_s27, %s146_s27 }
  0x6d   :  { %p10091_p3 = scmp.ne.s32.totalorder %s146_s27, %s10090_s9  ;;  %p10096_p5 = scmp.lt.s32.totalorder %s10090_s9, %s10090_s9 }
  0x6f   :  { %p10097_p6 = por %p10096_p5, %p10095_p4 }
  0x71   :  { %p10098_p7 = pnand %p10097_p6, %p10091_p3 }
  0x73   :  { %10101 = shalt.err (!%p10098_p7)
}
  0x74   :  { %s10306_s29 = smov 16   ;;  %s10307_s0 = smov 1  }
  0x75   :  { %151 = dma.hbm_to_vmem [thread:$0]  %s12714_s12, 32, %s146_s27, [#allocation19], %s10306_s29, %s10306_s29, %s10307_s0  }
  0x76   :  { %10210 = dma.done.wait [#allocation4], 8192  }
  0x77   :  { %10211 = vsyncadd [#allocation4], 4294959104 }
  0x78   :  { %10212 = dma.done.wait [#allocation7], 2048  }
  0x79   :  { %10213 = vsyncadd [#allocation7], 4294965248 }
  0x7a   :  { %10214 = dma.done.wait [#allocation10], 32  }
  0x7b   :  { %10215 = vsyncadd [#allocation10], 4294967264 }
  0x7c   :  { %10216 = dma.done.wait [#allocation13], 272  }
  0x7d   :  { %10217 = vsyncadd [#allocation13], 4294967024 }
  0x7e   :  { %10218 = dma.done.wait [#allocation16], 1040  }
  0x7f   :  { %10219 = vsyncadd [#allocation16], 4294966256 }
  0x80   :  { %10220 = dma.done.wait [#allocation19], 32  }
  0x81   :  { %10221 = vsyncadd [#allocation19], 4294967264  ;;  %v12724_v1 = vmov 0   ;;  %s12809_s12 = sld [smem:[#allocation109_spill]]  ;;  %v477_v8 = vld [vmem:[#allocation14 + $0x8] sm:$0xff]  ;;  %v476_v9 = vld [vmem:[#allocation14] sm:$0xff]  ;;  %v12723_v22 = vlaneseq }
  0x82   :  { %9865 = vset.pattern.permute.xlu1 %v12724_v1  ;;  %9864 = vset.pattern.permute.xlu0 %v12724_v1  ;;  %v222_v20 = vld [vmem:[#allocation9] sm:$0x1]  ;;  %v10524_v26 = vld [vmem:[%s12707_s5] ss:$0 sm:$0xff]  ;;  %s12812_s26 = sld [smem:[#allocation108_spill]]  ;;  %vm485_vm0 = vcmask 130048  }
  0x83   :  { %9079 = vmatprep.subr.mxu0 %v477_v8  ;;  %v223_v21 = vadd.f32 1e-05, %v222_v20  ;;  %v10516_v23 = vshrl.u32 %v12723_v22, 7  ;;  %v10545_v36 = vld [vmem:[#allocation11] ss:$0 sm:$0xff]  ;;  %s10310_s3 = smov 64  }
  0x84   :  { %9080 = vmatpush3.msra.mxu0 %v477_v8  ;;  %v10558_v44 = vld [vmem:[#allocation12] ss:$0 sm:$0xff]  ;;  %s10311_s30 = smov 32   ;;  %v11065_v22 = vld [vmem:[#allocation3 + $0x38] sm:$0xff]  ;;  %s11606_s11 = smov 0  }
  0x85   :  { %9081 = vmatprep.subr.mxu0 %v476_v9  ;;  %9866 = vrsqrt.f32 %v223_v21  ;;  %12810 = vst [vmem:[#allocation31_spill] sm:$0xff] %v10516_v23  ;;  %v10519_v24 = vsub.s32 0, %v10516_v23  ;;  %12862 = vst [vmem:[#allocation82_spill] sm:$0xff] %v11065_v22  ;;  %v11083_v1 = vld [vmem:[#allocation3 + $0x78] sm:$0xff] }
  0x86   :  { %9082 = vmatpush3.msra.mxu0 %v476_v9  ;;  %12865 = vst [vmem:[#allocation85_spill] sm:$0xff] %v11083_v1  ;;  %v11103_v23 = vld [vmem:[#allocation3 + $0xf8] sm:$0xff] }
  0x87   :  { %v208_v2 = vld [vmem:[%s12809_s12 + $0x10] sm:$0xff]  ;;  %v206_v3 = vld [vmem:[%s12809_s12] sm:$0xff]  ;;  %v209_v4 = vld [vmem:[%s12809_s12 + $0x18] sm:$0xff]  ;;  %12811 = vst [vmem:[#allocation32_spill] sm:$0xff] %v10519_v24 }
  0x88   :  { %328 = vperm.xlu1 %9865, %v208_v2   ;;  %318 = vperm.xlu0 %9864, %v206_v3   ;;  %v207_v5 = vld [vmem:[%s12809_s12 + $0x8] sm:$0xff]  ;;  %v210_v7 = vld [vmem:[%s12809_s12 + $0x20] sm:$0xff]  ;;  %v213_v10 = vld [vmem:[%s12809_s12 + $0x38] sm:$0xff]  ;;  %12869 = vst [vmem:[#allocation89_spill] sm:$0xff] %v11103_v23 }
  0x89   :  { %v211_v6 = vld [vmem:[%s12809_s12 + $0x28] sm:$0xff]  ;;  %v212_v11 = vld [vmem:[%s12809_s12 + $0x30] sm:$0xff]  ;;  %v214_v13 = vld [vmem:[%s12809_s12 + $0x40] sm:$0xff] }
  0x8a   :  { %v215_v12 = vld [vmem:[%s12809_s12 + $0x48] sm:$0xff]  ;;  %v217_v14 = vld [vmem:[%s12809_s12 + $0x58] sm:$0xff]  ;;  %v216_v15 = vld [vmem:[%s12809_s12 + $0x50] sm:$0xff] }
  0x8b   :  { %v219_v16 = vld [vmem:[%s12809_s12 + $0x68] sm:$0xff]  ;;  %v218_v17 = vld [vmem:[%s12809_s12 + $0x60] sm:$0xff]  ;;  %v221_v18 = vld [vmem:[%s12809_s12 + $0x78] sm:$0xff] }
  0x8c   :  { %333 = vperm.xlu1 %9865, %v209_v4   ;;  %323 = vperm.xlu0 %9864, %v207_v5   ;;  %v220_v19 = vld [vmem:[%s12809_s12 + $0x70] sm:$0xff]  ;;  %v190_v27 = vld [vmem:[%s12812_s26] sm:$0xff]  ;;  %v191_v31 = vld [vmem:[%s12812_s26 + $0x8] sm:$0xff] }
  0x8d   :  { %v192_v29 = vld [vmem:[%s12812_s26 + $0x10] sm:$0xff]  ;;  %v232_v30 = vsub.f32 %v190_v27, %v10524_v26  ;;  %v193_v34 = vld [vmem:[%s12812_s26 + $0x18] sm:$0xff]  ;;  %v233_v35 = vsub.f32 %v191_v31, %v10524_v26  ;;  %v194_v37 = vld [vmem:[%s12812_s26 + $0x20] sm:$0xff] }
  0x8e   :  { %v234_v32 = vsub.f32 %v192_v29, %v10524_v26  ;;  %v235_v39 = vsub.f32 %v193_v34, %v10524_v26  ;;  %v195_v42 = vld [vmem:[%s12812_s26 + $0x28] sm:$0xff]  ;;  %v236_v43 = vsub.f32 %v194_v37, %v10524_v26  ;;  %v196_v45 = vld [vmem:[%s12812_s26 + $0x30] sm:$0xff]  ;;  %v197_v49 = vld [vmem:[%s12812_s26 + $0x38] sm:$0xff] }
  0x8f   :  { %v237_v48 = vsub.f32 %v195_v42, %v10524_v26  ;;  %v238_v53 = vsub.f32 %v196_v45, %v10524_v26  ;;  %v198_v54 = vld [vmem:[%s12812_s26 + $0x40] sm:$0xff]  ;;  %v239_v55 = vsub.f32 %v197_v49, %v10524_v26  ;;  %v199_v61 = vld [vmem:[%s12812_s26 + $0x48] sm:$0xff]  ;;  %v200_v63 = vld [vmem:[%s12812_s26 + $0x50] sm:$0xff] }
  0x90   :  { %343 = vperm.xlu1 %9865, %v211_v6   ;;  %338 = vperm.xlu0 %9864, %v210_v7   ;;  %v240_v62 = vsub.f32 %v198_v54, %v10524_v26  ;;  %v241_v5 = vsub.f32 %v199_v61, %v10524_v26  ;;  %v242_v6 = vsub.f32 %v200_v63, %v10524_v26 }
  0x92   :  { %v9867_v25 = vpop.eup %9866 }
  0x93   :  { %v10530_v28 = vrot.slane %v9867_v25, %v10519_v24  ;;  %v11086_v24 = vld [vmem:[#allocation3 + $0xb8] sm:$0xff] }
  0x94   :  { %353 = vperm.xlu1 %9865, %v213_v10   ;;  %348 = vperm.xlu0 %9864, %v212_v11   ;;  %12866 = vst [vmem:[#allocation86_spill] sm:$0xff] %v11086_v24 }
  0x95   :  { %v254_v33 = vmul.f32 %v10530_v28, %v232_v30  ;;  %v256_v38 = vmul.f32 %v10530_v28, %v234_v32  ;;  %v255_v41 = vmul.f32 %v10530_v28, %v233_v35  ;;  %v257_v47 = vmul.f32 %v10530_v28, %v235_v39  ;;  %v203_v32 = vld [vmem:[%s12812_s26 + $0x68] sm:$0xff] }
  0x96   :  { %v258_v52 = vmul.f32 %v10530_v28, %v236_v43  ;;  %v259_v60 = vmul.f32 %v10530_v28, %v237_v48  ;;  %v260_v4 = vmul.f32 %v10530_v28, %v238_v53  ;;  %v263_v30 = vmul.f32 %v10530_v28, %v241_v5  ;;  %v205_v48 = vld [vmem:[%s12812_s26 + $0x78] sm:$0xff] }
  0x97   :  { %v277_v40 = vmul.f32 %v10545_v36, %v254_v33  ;;  %v279_v46 = vmul.f32 %v10545_v36, %v256_v38  ;;  %v278_v51 = vmul.f32 %v10545_v36, %v255_v41  ;;  %v280_v59 = vmul.f32 %v10545_v36, %v257_v47  ;;  %v204_v33 = vld [vmem:[%s12812_s26 + $0x70] sm:$0xff] }
  0x98   :  { %363 = vperm.xlu1 %9865, %v215_v12   ;;  %358 = vperm.xlu0 %9864, %v214_v13   ;;  %v281_v3 = vmul.f32 %v10545_v36, %v258_v52  ;;  %v282_v11 = vmul.f32 %v10545_v36, %v259_v60  ;;  %v261_v12 = vmul.f32 %v10530_v28, %v239_v55  ;;  %v201_v13 = vld [vmem:[%s12812_s26 + $0x58] sm:$0xff] }
  0x99   :  { %v300_v50 = vadd.f32 %v10558_v44, %v277_v40  ;;  %v302_v57 = vadd.f32 %v10558_v44, %v279_v46  ;;  %v301_v2 = vadd.f32 %v10558_v44, %v278_v51  ;;  %v303_v9 = vadd.f32 %v10558_v44, %v280_v59 }
  0x9a   :  { %v305_v25 = vadd.f32 %v10558_v44, %v282_v11  ;;  %v284_v29 = vmul.f32 %v10545_v36, %v261_v12  ;;  %v264_v31 = vmul.f32 %v10530_v28, %v242_v6  ;;  %v245_v39 = vsub.f32 %v203_v32, %v10524_v26  ;;  %v10674_v32 = vld [vmem:[#allocation3 + $0x8] sm:$0xff] }
  0x9b   :  { %v246_v40 = vsub.f32 %v204_v33, %v10524_v26  ;;  %v286_v45 = vmul.f32 %v10545_v36, %v263_v30  ;;  %v247_v53 = vsub.f32 %v205_v48, %v10524_v26  ;;  %12814 = vst [vmem:[#allocation34_spill] sm:$0xff] %v10674_v32  ;;  %v10715_v48 = vld [vmem:[#allocation3 + $0x88] sm:$0xff] }
  0x9c   :  { %373 = vperm.xlu1 %9865, %v217_v14   ;;  %368 = vperm.xlu0 %9864, %v216_v15   ;;  %v202_v14 = vld [vmem:[%s12812_s26 + $0x60] sm:$0xff]  ;;  %v307_v42 = vadd.f32 %v10558_v44, %v284_v29  ;;  %v287_v52 = vmul.f32 %v10545_v36, %v264_v31  ;;  %s10309_s26 = smov 96   ;;  %12819 = vst [vmem:[#allocation39_spill] sm:$0xff] %v10715_v48 }
  0x9d   :  { %v244_v20 = vsub.f32 %v202_v14, %v10524_v26  ;;  %v309_v55 = vadd.f32 %v10558_v44, %v286_v45  ;;  %v268_v63 = vmul.f32 %v10530_v28, %v246_v40 }
  0x9f   :  { %v266_v47 = vmul.f32 %v10530_v28, %v244_v20  ;;  %v10661_v20 = vld [vmem:[#allocation3] sm:$0xff] }
  0xa0   :  { %383 = vperm.xlu1 %9865, %v219_v16   ;;  %378 = vperm.xlu0 %9864, %v218_v17   ;;  %v304_v16 = vadd.f32 %v10558_v44, %v281_v3  ;;  %v283_v17 = vmul.f32 %v10545_v36, %v260_v4  ;;  %v269_v4 = vmul.f32 %v10530_v28, %v247_v53 }
  0xa1   :  { %v289_v59 = vmul.f32 %v10545_v36, %v266_v47  ;;  %12813 = vst [vmem:[#allocation33_spill] sm:$0xff] %v10661_v20  ;;  %9111 = vmatprep.mubr.msk.f32.mxu1 %vm485_vm0, %v10661_v20 }
  0xa2   :  { %v306_v37 = vadd.f32 %v10558_v44, %v283_v17  ;;  %v292_v11 = vmul.f32 %v10545_v36, %v269_v4  ;;  %v10786_v4 = vld [vmem:[#allocation3 + $0x180] sm:$0xff] }
  0xa3   :  { %12826 = vst [vmem:[#allocation46_spill] sm:$0xff] %v10786_v4 }
  0xa4   :  { %393 = vperm.xlu1 %9865, %v221_v18   ;;  %388 = vperm.xlu0 %9864, %v220_v19   ;;  %v262_v18 = vmul.f32 %v10530_v28, %v240_v62  ;;  %v243_v19 = vsub.f32 %v201_v13, %v10524_v26  ;;  %v310_v62 = vadd.f32 %v10558_v44, %v287_v52 }
  0xa5   :  { %v315_v17 = vadd.f32 %v10558_v44, %v292_v11  ;;  %v10811_v11 = vld [vmem:[#allocation3 + $0x1c8] sm:$0xff] }
  0xa6   :  { %v285_v38 = vmul.f32 %v10545_v36, %v262_v18  ;;  %v265_v46 = vmul.f32 %v10530_v28, %v243_v19  ;;  %12829 = vst [vmem:[#allocation49_spill] sm:$0xff] %v10811_v11 }
  0xa8   :  { %v308_v51 = vadd.f32 %v10558_v44, %v285_v38  ;;  %v10686_v38 = vld [vmem:[#allocation3 + $0x10] sm:$0xff] }
  0xa9   :  { %12816 = vst [vmem:[#allocation36_spill] sm:$0xff] %v10686_v38 }
 0x103   :  { %v329_v56 = vpop.permute.xlu1 %328  ;;  %v319_v58 = vpop.permute.xlu0 %318 }
 0x104   :  { %v396_v0 = vmul.f32 %v319_v58, %v300_v50  ;;  %v398_v7 = vmul.f32 %v329_v56, %v302_v57  ;;  %v288_v57 = vmul.f32 %v10545_v36, %v265_v46  ;;  %v267_v58 = vmul.f32 %v10530_v28, %v245_v39 }
 0x106   :  { %9083 = vmatprep.mubr.msk.f32.mxu0 %vm485_vm0, %v396_v0  ;;  %v311_v0 = vadd.f32 %v10558_v44, %v288_v57  ;;  %v290_v3 = vmul.f32 %v10545_v36, %v267_v58 }
 0x107   :  { %v334_v8 = vpop.permute.xlu1 %333  ;;  %v324_v10 = vpop.permute.xlu0 %323 }
 0x108   :  { %v397_v15 = vmul.f32 %v324_v10, %v301_v2  ;;  %v399_v34 = vmul.f32 %v334_v8, %v303_v9  ;;  %v291_v8 = vmul.f32 %v10545_v36, %v268_v63  ;;  %v313_v13 = vadd.f32 %v10558_v44, %v290_v3 }
 0x10a   :  { %9084 = vmatmul.mubr.msk.f32.vlgmr.msra.gmra.mxu0 %vm485_vm0, %v397_v15  ;;  %v314_v28 = vadd.f32 %v10558_v44, %v291_v8  ;;  %v10798_v8 = vld [vmem:[#allocation3 + $0x188] sm:$0xff] }
 0x10b   :  { %v344_v21 = vpop.permute.xlu1 %343  ;;  %v339_v27 = vpop.permute.xlu0 %338  ;;  %9086 = vmatprep.mubr.msk.f32.mxu0 %vm485_vm0, %v398_v7  ;;  %v312_v7 = vadd.f32 %v10558_v44, %v289_v59  ;;  %12827 = vst [vmem:[#allocation47_spill] sm:$0xff] %v10798_v8 }
 0x10c   :  { %v400_v35 = vmul.f32 %v339_v27, %v304_v16  ;;  %v401_v49 = vmul.f32 %v344_v21, %v305_v25  ;;  %v10665_v21 = vld [vmem:[#allocation15] ss:$0 sm:$0xff] }
 0x10e   :  { %9087 = vmatmul.mubr.msk.f32.gmra.mxu0 %vm485_vm0, %v399_v34  ;;  %v10677_v34 = vld [vmem:[#allocation3 + $0x40] sm:$0xff] }
 0x10f   :  { %v354_v41 = vpop.permute.xlu1 %353  ;;  %v349_v43 = vpop.permute.xlu0 %348  ;;  %9089 = vmatprep.mubr.msk.f32.mxu0 %vm485_vm0, %v400_v35  ;;  %12815 = vst [vmem:[#allocation35_spill] sm:$0xff] %v10677_v34 }
 0x110   :  { %v402_v50 = vmul.f32 %v349_v43, %v306_v37  ;;  %v403_v60 = vmul.f32 %v354_v41, %v307_v42  ;;  %v10694_v41 = vld [vmem:[#allocation3 + $0x48] sm:$0xff]  ;;  %v10703_v43 = vld [vmem:[#allocation3 + $0x80] sm:$0xff] }
 0x111   :  { %12817 = vst [vmem:[#allocation37_spill] sm:$0xff] %v10694_v41  ;;  %12818 = vst [vmem:[#allocation38_spill] sm:$0xff] %v10703_v43 }
 0x112   :  { %9090 = vmatmul.mubr.msk.f32.gmra.mxu0 %vm485_vm0, %v401_v49 }
 0x113   :  { %v364_v54 = vpop.permute.xlu1 %363  ;;  %v359_v56 = vpop.permute.xlu0 %358  ;;  %9092 = vmatprep.mubr.msk.f32.mxu0 %vm485_vm0, %v402_v50  ;;  %v10723_v50 = vld [vmem:[#allocation3 + $0xc0] sm:$0xff] }
 0x114   :  { %v404_v61 = vmul.f32 %v359_v56, %v308_v51  ;;  %v405_v5 = vmul.f32 %v364_v54, %v309_v55  ;;  %12820 = vst [vmem:[#allocation40_spill] sm:$0xff] %v10723_v50  ;;  %v10736_v54 = vld [vmem:[#allocation3 + $0xc8] sm:$0xff]  ;;  %v10744_v56 = vld [vmem:[#allocation3 + $0x100] sm:$0xff] }
 0x115   :  { %12821 = vst [vmem:[#allocation41_spill] sm:$0xff] %v10736_v54  ;;  %12822 = vst [vmem:[#allocation42_spill] sm:$0xff] %v10744_v56 }
 0x116   :  { %9093 = vmatmul.mubr.msk.f32.gmra.mxu0 %vm485_vm0, %v403_v60  ;;  %v10758_v60 = vld [vmem:[#allocation3 + $0x108] sm:$0xff] }
 0x117   :  { %v374_v26 = vpop.permute.xlu1 %373  ;;  %v369_v2 = vpop.permute.xlu0 %368  ;;  %9095 = vmatprep.mubr.msk.f32.mxu0 %vm485_vm0, %v404_v61  ;;  %12823 = vst [vmem:[#allocation43_spill] sm:$0xff] %v10758_v60 }
 0x118   :  { %v406_v6 = vmul.f32 %v369_v2, %v310_v62  ;;  %v407_v12 = vmul.f32 %v374_v26, %v311_v0  ;;  %v10766_v62 = vld [vmem:[#allocation3 + $0x140] sm:$0xff]  ;;  %v10780_v2 = vld [vmem:[#allocation3 + $0x148] sm:$0xff] }
 0x119   :  { %12824 = vst [vmem:[#allocation44_spill] sm:$0xff] %v10766_v62  ;;  %12825 = vst [vmem:[#allocation45_spill] sm:$0xff] %v10780_v2 }
 0x11a   :  { %9096 = vmatmul.mubr.msk.f32.gmra.mxu0 %vm485_vm0, %v405_v5 }
 0x11b   :  { %v384_v9 = vpop.permute.xlu1 %383  ;;  %v379_v10 = vpop.permute.xlu0 %378  ;;  %9098 = vmatprep.mubr.msk.f32.mxu0 %vm485_vm0, %v406_v6 }
 0x11c   :  { %v408_v14 = vmul.f32 %v379_v10, %v312_v7  ;;  %v409_v16 = vmul.f32 %v384_v9, %v313_v13  ;;  %v10803_v10 = vld [vmem:[#allocation3 + $0x1c0] sm:$0xff] }
 0x11d   :  { %12828 = vst [vmem:[#allocation48_spill] sm:$0xff] %v10803_v10 }
 0x11e   :  { %9099 = vmatmul.mubr.msk.f32.gmra.mxu0 %vm485_vm0, %v407_v12  ;;  %v10815_v12 = vld [vmem:[#allocation3 + $0x50] sm:$0xff] }
 0x11f   :  { %v389_v15 = vpop.permute.xlu0 %388  ;;  %9101 = vmatprep.mubr.msk.f32.mxu0 %vm485_vm0, %v408_v14  ;;  %v394_v19 = vpop.permute.xlu1 %393  ;;  %12830 = vst [vmem:[#allocation50_spill] sm:$0xff] %v10815_v12 }
 0x120   :  { %v410_v18 = vmul.f32 %v389_v15, %v314_v28  ;;  %v411_v36 = vmul.f32 %v394_v19, %v315_v17 }
 0x122   :  { %9102 = vmatmul.mubr.msk.f32.gmra.mxu0 %vm485_vm0, %v409_v16 }
 0x123   :  { %9104 = vmatprep.mubr.msk.f32.mxu0 %vm485_vm0, %v410_v18  ;;  %v10882_v18 = vld [vmem:[#allocation3 + $0x18] sm:$0xff] }
 0x124   :  { %12831 = vst [vmem:[#allocation51_spill] sm:$0xff] %v10882_v18 }
 0x126   :  { %9105 = vmatmul.mubr.msk.f32.gmra.mxu0 %vm485_vm0, %v411_v36  ;;  %v10886_v36 = vld [vmem:[#allocation3 + $0x90] sm:$0xff] }
 0x127   :  { %9167 = vmatprep.mubr.msk.f32.mxu0 %vm485_vm0, %v10686_v38  ;;  %12832 = vst [vmem:[#allocation52_spill] sm:$0xff] %v10886_v36 }
 0x1ca   :  { %v9085_v25 = vpop.f32.mrf.mxu0 }
 0x1cb   :  { %v606_v27 = vadd.f32 %v9085_v25, %v10665_v21 }
 0x1cc   :  { %v600_v44 = vpop.f32.mrf.mxu0 }
 0x1cd   :  { %v10669_v29 = vadd.f32 %v10665_v21, %v600_v44  ;;  %1379 = vrot.lane.b32.xlu0 %v606_v27, %s10309_s26  ;;  %9107 = vmatprep.subr.mxu1 %v606_v27  ;;  %v10896_v44 = vld [vmem:[#allocation3 + $0xd0] sm:$0xff] }
 0x1ce   :  { %v9088_v30 = vpop.f32.mrf.mxu0  ;;  %9108 = vmatpush3.msra.mxu1 %v606_v27  ;;  %12834 = vst [vmem:[#allocation54_spill] sm:$0xff] %v10896_v44 }
 0x1cf   :  { %v616_v31 = vadd.f32 %v9088_v30, %v10665_v21  ;;  %9109 = vmatprep.subr.mxu1 %v10669_v29 }
 0x1d0   :  { %v610_v33 = vpop.f32.mrf.mxu0  ;;  %9110 = vmatpush3.msra.mxu1 %v10669_v29 }
 0x1d1   :  { %v10680_v35 = vadd.f32 %v10665_v21, %v610_v33  ;;  %2153 = vrot.lane.b32.xlu0 %v606_v27, %s10310_s3  ;;  %1468 = vrot.lane.b32.xlu1 %v616_v31, %s10309_s26 }
 0x1d2   :  { %9114 = vmatprep.subr.mxu1 %v616_v31  ;;  %v9091_v37 = vpop.f32.mrf.mxu0  ;;  %9112 = vmatmul.mubr.msk.f32.vlgmr.msra.gmra.mxu1 %vm485_vm0, %v10674_v32 }
 0x1d3   :  { %v10689_v39 = vadd.f32 %v9091_v37, %v10665_v21  ;;  %9115 = vmatpush3.msra.mxu1 %v616_v31  ;;  %9118 = vmatprep.mubr.msk.f32.mxu1 %vm485_vm0, %v10677_v34  ;;  %v10906_v37 = vld [vmem:[#allocation3 + $0x98] sm:$0xff] }
 0x1d4   :  { %9116 = vmatprep.subr.mxu1 %v10680_v35  ;;  %v620_v40 = vpop.f32.mrf.mxu0  ;;  %12835 = vst [vmem:[#allocation55_spill] sm:$0xff] %v10906_v37 }
 0x1d5   :  { %v10699_v42 = vadd.f32 %v10665_v21, %v620_v40  ;;  %9117 = vmatpush3.msra.mxu1 %v10680_v35  ;;  %2913 = vrot.lane.b32.xlu0 %v606_v27, %s10311_s30  ;;  %v10894_v27 = vld [vmem:[#allocation3 + $0x58] sm:$0xff]  ;;  %v10910_v40 = vld [vmem:[#allocation3 + $0x110] sm:$0xff] }
 0x1d6   :  { %2240 = vrot.lane.b32.xlu1 %v616_v31, %s10310_s3  ;;  %9121 = vmatprep.subr.mxu1 %v10689_v39  ;;  %v9094_v45 = vpop.f32.mrf.mxu0  ;;  %12833 = vst [vmem:[#allocation53_spill] sm:$0xff] %v10894_v27  ;;  %12836 = vst [vmem:[#allocation56_spill] sm:$0xff] %v10910_v40 }
 0x1d7   :  { %v10708_v46 = vadd.f32 %v9094_v45, %v10665_v21  ;;  %9119 = vmatmul.mubr.msk.f32.vlgmr.msra.gmra.mxu1 %vm485_vm0, %v10694_v41 }
 0x1d8   :  { %9122 = vmatpush3.msra.mxu1 %v10689_v39  ;;  %v630_v47 = vpop.f32.mrf.mxu0  ;;  %9125 = vmatprep.mubr.msk.f32.mxu1 %vm485_vm0, %v10703_v43 }
 0x1d9   :  { %9123 = vmatprep.subr.mxu1 %v10699_v42  ;;  %v10719_v49 = vadd.f32 %v10665_v21, %v630_v47  ;;  %1377 = vrot.lane.b32.xlu0 %v10669_v29, %s10309_s26  ;;  %v10920_v47 = vld [vmem:[#allocation3 + $0x150] sm:$0xff] }
 0x1da   :  { %9124 = vmatpush3.msra.mxu1 %v10699_v42  ;;  %3000 = vrot.lane.b32.xlu1 %v616_v31, %s10311_s30  ;;  %v9097_v51 = vpop.f32.mrf.mxu0  ;;  %12838 = vst [vmem:[#allocation58_spill] sm:$0xff] %v10920_v47 }
 0x1db   :  { %9128 = vmatprep.subr.mxu1 %v10708_v46  ;;  %v10729_v52 = vadd.f32 %v9097_v51, %v10665_v21  ;;  %9126 = vmatmul.mubr.msk.f32.vlgmr.msra.gmra.mxu1 %vm485_vm0, %v10715_v48 }
 0x1dc   :  { %9129 = vmatpush3.msra.mxu1 %v10708_v46  ;;  %v640_v53 = vpop.f32.mrf.mxu0  ;;  %9132 = vmatprep.mubr.msk.f32.mxu1 %vm485_vm0, %v10723_v50 }
 0x1dd   :  { %9130 = vmatprep.subr.mxu1 %v10719_v49  ;;  %v10740_v55 = vadd.f32 %v10665_v21, %v640_v53  ;;  %2151 = vrot.lane.b32.xlu0 %v10669_v29, %s10310_s3 }
 0x1de   :  { %9131 = vmatpush3.msra.mxu1 %v10719_v49  ;;  %1466 = vrot.lane.b32.xlu1 %v10680_v35, %s10309_s26  ;;  %v9100_v57 = vpop.f32.mrf.mxu0 }
 0x1df   :  { %9135 = vmatprep.subr.mxu1 %v10729_v52  ;;  %v10751_v58 = vadd.f32 %v9100_v57, %v10665_v21  ;;  %9133 = vmatmul.mubr.msk.f32.vlgmr.msra.gmra.mxu1 %vm485_vm0, %v10736_v54  ;;  %v10930_v57 = vld [vmem:[#allocation3 + $0x118] sm:$0xff] }
 0x1e0   :  { %9136 = vmatpush3.msra.mxu1 %v10729_v52  ;;  %v650_v59 = vpop.f32.mrf.mxu0  ;;  %9139 = vmatprep.mubr.msk.f32.mxu1 %vm485_vm0, %v10744_v56  ;;  %12839 = vst [vmem:[#allocation59_spill] sm:$0xff] %v10930_v57 }
 0x1e1   :  { %9137 = vmatprep.subr.mxu1 %v10740_v55  ;;  %v10762_v61 = vadd.f32 %v10665_v21, %v650_v59  ;;  %1557 = vrot.lane.b32.xlu0 %v10689_v39, %s10309_s26  ;;  %v10934_v59 = vld [vmem:[#allocation3 + $0x190] sm:$0xff] }
 0x1e2   :  { %9138 = vmatpush3.msra.mxu1 %v10740_v55  ;;  %2238 = vrot.lane.b32.xlu1 %v10680_v35, %s10310_s3  ;;  %v9103_v63 = vpop.f32.mrf.mxu0  ;;  %12840 = vst [vmem:[#allocation60_spill] sm:$0xff] %v10934_v59 }
 0x1e3   :  { %9142 = vmatprep.subr.mxu1 %v10751_v58  ;;  %v10773_v26 = vadd.f32 %v9103_v63, %v10665_v21  ;;  %9140 = vmatmul.mubr.msk.f32.vlgmr.msra.gmra.mxu1 %vm485_vm0, %v10758_v60 }
 0x1e4   :  { %9143 = vmatpush3.msra.mxu1 %v10751_v58  ;;  %v660_v0 = vpop.f32.mrf.mxu0  ;;  %9146 = vmatprep.mubr.msk.f32.mxu1 %vm485_vm0, %v10766_v62 }
 0x1e5   :  { %9144 = vmatprep.subr.mxu1 %v10762_v61  ;;  %v661_v3 = vadd.f32 %v10665_v21, %v660_v0  ;;  %2327 = vrot.lane.b32.xlu0 %v10689_v39, %s10310_s3  ;;  %v10944_v0 = vld [vmem:[#allocation3 + $0x1d0] sm:$0xff] }
 0x1e6   :  { %9145 = vmatpush3.msra.mxu1 %v10762_v61  ;;  %1646 = vrot.lane.b32.xlu1 %v10708_v46, %s10309_s26  ;;  %v9106_v5 = vpop.f32.mrf.mxu0  ;;  %12842 = vst [vmem:[#allocation62_spill] sm:$0xff] %v10944_v0 }
 0x1e7   :  { %9149 = vmatprep.subr.mxu1 %v10773_v26  ;;  %v676_v6 = vadd.f32 %v9106_v5, %v10665_v21  ;;  %9147 = vmatmul.mubr.msk.f32.vlgmr.msra.gmra.mxu1 %vm485_vm0, %v10780_v2 }
 0x1e8   :  { %9150 = vmatpush3.msra.mxu1 %v10773_v26  ;;  %v670_v7 = vpop.f32.mrf.mxu0  ;;  %9153 = vmatprep.mubr.msk.f32.mxu1 %vm485_vm0, %v10786_v4 }
 0x1e9   :  { %9151 = vmatprep.subr.mxu1 %v661_v3  ;;  %v671_v9 = vadd.f32 %v10665_v21, %v670_v7  ;;  %1555 = vrot.lane.b32.xlu0 %v10699_v42, %s10309_s26 }
 0x1ea   :  { %9152 = vmatpush3.msra.mxu1 %v661_v3  ;;  %2414 = vrot.lane.b32.xlu1 %v10708_v46, %s10310_s3 }
 0x1eb   :  { %9156 = vmatprep.subr.mxu1 %v676_v6  ;;  %9154 = vmatmul.mubr.msk.f32.vlgmr.msra.gmra.mxu1 %vm485_vm0, %v10798_v8 }
 0x1ec   :  { %9157 = vmatpush3.msra.mxu1 %v676_v6  ;;  %9160 = vmatprep.mubr.msk.f32.mxu1 %vm485_vm0, %v10803_v10 }
 0x1ed   :  { %9158 = vmatprep.subr.mxu1 %v671_v9  ;;  %2325 = vrot.lane.b32.xlu0 %v10699_v42, %s10310_s3 }
 0x1ee   :  { %9159 = vmatpush3.msra.mxu1 %v671_v9  ;;  %1644 = vrot.lane.b32.xlu1 %v10719_v49, %s10309_s26 }
 0x1ef   :  { %9161 = vmatmul.mubr.msk.f32.vlgmr.msra.gmra.mxu1 %vm485_vm0, %v10811_v11 }
 0x1f0   :  { %9174 = vmatprep.mubr.msk.f32.mxu1 %vm485_vm0, %v10815_v12 }
 0x1f1   :  { %1735 = vrot.lane.b32.xlu0 %v10729_v52, %s10309_s26 }
 0x1f2   :  { %2412 = vrot.lane.b32.xlu1 %v10719_v49, %s10310_s3 }
 0x1f5   :  { %2501 = vrot.lane.b32.xlu0 %v10729_v52, %s10310_s3 }
 0x1f6   :  { %1824 = vrot.lane.b32.xlu1 %v10751_v58, %s10309_s26 }
 0x1f9   :  { %1733 = vrot.lane.b32.xlu0 %v10740_v55, %s10309_s26 }
 0x1fa   :  { %2588 = vrot.lane.b32.xlu1 %v10751_v58, %s10310_s3 }
 0x1fd   :  { %2499 = vrot.lane.b32.xlu0 %v10740_v55, %s10310_s3 }
 0x1fe   :  { %1822 = vrot.lane.b32.xlu1 %v10762_v61, %s10309_s26 }
 0x201   :  { %1913 = vrot.lane.b32.xlu0 %v10773_v26, %s10309_s26 }
 0x202   :  { %2586 = vrot.lane.b32.xlu1 %v10762_v61, %s10310_s3 }
 0x205   :  { %2675 = vrot.lane.b32.xlu0 %v10773_v26, %s10310_s3 }
 0x206   :  { %2002 = vrot.lane.b32.xlu1 %v676_v6, %s10309_s26 }
 0x209   :  { %1911 = vrot.lane.b32.xlu0 %v661_v3, %s10309_s26 }
 0x20a   :  { %2762 = vrot.lane.b32.xlu1 %v676_v6, %s10310_s3 }
 0x20d   :  { %2911 = vrot.lane.b32.xlu0 %v10669_v29, %s10311_s30 }
 0x20e   :  { %2000 = vrot.lane.b32.xlu1 %v671_v9, %s10309_s26 }
 0x211   :  { %2673 = vrot.lane.b32.xlu0 %v661_v3, %s10310_s3 }
 0x212   :  { %2998 = vrot.lane.b32.xlu1 %v10680_v35, %s10311_s30 }
 0x215   :  { %3087 = vrot.lane.b32.xlu0 %v10689_v39, %s10311_s30 }
 0x216   :  { %3174 = vrot.lane.b32.xlu1 %v10708_v46, %s10311_s30  ;;  %v10918_v46 = vld [vmem:[#allocation3 + $0xd8] sm:$0xff] }
 0x217   :  { %12837 = vst [vmem:[#allocation57_spill] sm:$0xff] %v10918_v46 }
 0x219   :  { %3085 = vrot.lane.b32.xlu0 %v10699_v42, %s10311_s30 }
 0x21a   :  { %3172 = vrot.lane.b32.xlu1 %v10719_v49, %s10311_s30 }
 0x21d   :  { %3261 = vrot.lane.b32.xlu0 %v10729_v52, %s10311_s30 }
 0x21e   :  { %2760 = vrot.lane.b32.xlu1 %v671_v9, %s10310_s3 }
 0x221   :  { %3259 = vrot.lane.b32.xlu0 %v10740_v55, %s10311_s30 }
 0x222   :  { %3348 = vrot.lane.b32.xlu1 %v10751_v58, %s10311_s30 }
 0x225   :  { %3435 = vrot.lane.b32.xlu0 %v10773_v26, %s10311_s30  ;;  %v10942_v26 = vld [vmem:[#allocation3 + $0x158] sm:$0xff] }
 0x226   :  { %3346 = vrot.lane.b32.xlu1 %v10762_v61, %s10311_s30  ;;  %12841 = vst [vmem:[#allocation61_spill] sm:$0xff] %v10942_v26 }
 0x229   :  { %3433 = vrot.lane.b32.xlu0 %v661_v3, %s10311_s30 }
 0x22a   :  { %3522 = vrot.lane.b32.xlu1 %v676_v6, %s10311_s30 }
 0x22e   :  { %3520 = vrot.lane.b32.xlu1 %v671_v9, %s10311_s30 }
 0x23f   :  { %v1380_v13 = vpop.permute.xlu0 %1379 }
 0x240   :  { %9163 = vmatprep.subr.mxu0 %v1380_v13 }
 0x241   :  { %9164 = vmatpush3.msra.mxu0 %v1380_v13  ;;  %v10954_v13 = vld [vmem:[#allocation3 + $0x198] sm:$0xff] }
 0x242   :  { %12843 = vst [vmem:[#allocation63_spill] sm:$0xff] %v10954_v13 }
 0x243   :  { %v10876_v14 = vpop.permute.xlu0 %2153  ;;  %v1469_v28 = vpop.permute.xlu1 %1468 }
 0x244   :  { %9170 = vmatprep.subr.mxu1 %v1469_v28 }
 0x245   :  { %9171 = vmatpush3.msra.mxu1 %v1469_v28 }
 0x247   :  { %v10878_v15 = vpop.permute.xlu0 %2913 }
 0x248   :  { %v10880_v16 = vpop.permute.xlu1 %2240 }
 0x24b   :  { %v1378_v17 = vpop.permute.xlu0 %1377 }
 0x24c   :  { %v10884_v19 = vpop.permute.xlu1 %3000  ;;  %9165 = vmatprep.subr.mxu0 %v1378_v17 }
 0x24d   :  { %9166 = vmatpush3.msra.mxu0 %v1378_v17  ;;  %v10958_v17 = vld [vmem:[#allocation3 + $0x20] sm:$0xff] }
 0x24e   :  { %9168 = vmatmul.mubr.msk.f32.vlgmr.msra.gmra.mxu0 %vm485_vm0, %v10882_v18  ;;  %12844 = vst [vmem:[#allocation64_spill] sm:$0xff] %v10958_v17 }
 0x24f   :  { %v10890_v21 = vpop.permute.xlu0 %2151  ;;  %9181 = vmatprep.mubr.msk.f32.mxu0 %vm485_vm0, %v10886_v36 }
 0x250   :  { %v1467_v25 = vpop.permute.xlu1 %1466 }
 0x251   :  { %9172 = vmatprep.subr.mxu1 %v1467_v25 }
 0x252   :  { %9173 = vmatpush3.msra.mxu1 %v1467_v25 }
 0x253   :  { %v1558_v29 = vpop.permute.xlu0 %1557  ;;  %9175 = vmatmul.mubr.msk.f32.vlgmr.msra.gmra.mxu1 %vm485_vm0, %v10894_v27 }
 0x254   :  { %v10900_v30 = vpop.permute.xlu1 %2238  ;;  %9177 = vmatprep.subr.mxu0 %v1558_v29  ;;  %9188 = vmatprep.mubr.msk.f32.mxu1 %vm485_vm0, %v10896_v44 }
 0x255   :  { %9178 = vmatpush3.msra.mxu0 %v1558_v29  ;;  %v10968_v29 = vld [vmem:[#allocation3 + $0x28] sm:$0xff] }
 0x256   :  { %12845 = vst [vmem:[#allocation65_spill] sm:$0xff] %v10968_v29 }
 0x257   :  { %v10904_v31 = vpop.permute.xlu0 %2327 }
 0x258   :  { %v1647_v33 = vpop.permute.xlu1 %1646 }
 0x259   :  { %9184 = vmatprep.subr.mxu1 %v1647_v33 }
 0x25a   :  { %9185 = vmatpush3.msra.mxu1 %v1647_v33 }
 0x25b   :  { %v1556_v35 = vpop.permute.xlu0 %1555 }
 0x25c   :  { %v10908_v39 = vpop.permute.xlu1 %2414  ;;  %9179 = vmatprep.subr.mxu0 %v1556_v35 }
 0x25d   :  { %9180 = vmatpush3.msra.mxu0 %v1556_v35  ;;  %v10971_v35 = vld [vmem:[#allocation3 + $0x1d8] sm:$0xff] }
 0x25e   :  { %9182 = vmatmul.mubr.msk.f32.vlgmr.msra.gmra.mxu0 %vm485_vm0, %v10906_v37  ;;  %12846 = vst [vmem:[#allocation66_spill] sm:$0xff] %v10971_v35 }
 0x25f   :  { %v10914_v42 = vpop.permute.xlu0 %2325  ;;  %9195 = vmatprep.mubr.msk.f32.mxu0 %vm485_vm0, %v10910_v40 }
 0x260   :  { %v1645_v45 = vpop.permute.xlu1 %1644 }
 0x261   :  { %9186 = vmatprep.subr.mxu1 %v1645_v45 }
 0x262   :  { %9187 = vmatpush3.msra.mxu1 %v1645_v45 }
 0x263   :  { %9189 = vmatmul.mubr.msk.f32.vlgmr.msra.gmra.mxu1 %vm485_vm0, %v10918_v46  ;;  %v1736_v49 = vpop.permute.xlu0 %1735 }
 0x264   :  { %v10924_v51 = vpop.permute.xlu1 %2412  ;;  %9191 = vmatprep.subr.mxu0 %v1736_v49  ;;  %9202 = vmatprep.mubr.msk.f32.mxu1 %vm485_vm0, %v10920_v47 }
 0x265   :  { %9192 = vmatpush3.msra.mxu0 %v1736_v49  ;;  %v10983_v49 = vld [vmem:[#allocation3 + $0x60] sm:$0xff] }
 0x266   :  { %12847 = vst [vmem:[#allocation67_spill] sm:$0xff] %v10983_v49 }
 0x267   :  { %v10928_v52 = vpop.permute.xlu0 %2501 }
 0x268   :  { %v1825_v53 = vpop.permute.xlu1 %1824 }
 0x269   :  { %9198 = vmatprep.subr.mxu1 %v1825_v53 }
 0x26a   :  { %9199 = vmatpush3.msra.mxu1 %v1825_v53  ;;  %v10989_v53 = vld [vmem:[#allocation3 + $0x68] sm:$0xff] }
 0x26b   :  { %v1734_v55 = vpop.permute.xlu0 %1733  ;;  %12849 = vst [vmem:[#allocation69_spill] sm:$0xff] %v10989_v53 }
 0x26c   :  { %v10932_v58 = vpop.permute.xlu1 %2588  ;;  %9193 = vmatprep.subr.mxu0 %v1734_v55 }
 0x26d   :  { %9194 = vmatpush3.msra.mxu0 %v1734_v55  ;;  %v10993_v55 = vld [vmem:[#allocation3 + $0xa8] sm:$0xff] }
 0x26e   :  { %9196 = vmatmul.mubr.msk.f32.vlgmr.msra.gmra.mxu0 %vm485_vm0, %v10930_v57  ;;  %12850 = vst [vmem:[#allocation70_spill] sm:$0xff] %v10993_v55 }
 0x26f   :  { %v10938_v61 = vpop.permute.xlu0 %2499  ;;  %9209 = vmatprep.mubr.msk.f32.mxu0 %vm485_vm0, %v10934_v59 }
 0x270   :  { %v1823_v63 = vpop.permute.xlu1 %1822 }
 0x271   :  { %9200 = vmatprep.subr.mxu1 %v1823_v63 }
 0x272   :  { %9201 = vmatpush3.msra.mxu1 %v1823_v63  ;;  %v11015_v63 = vld [vmem:[#allocation3 + $0xe8] sm:$0xff] }
 0x273   :  { %9203 = vmatmul.mubr.msk.f32.vlgmr.msra.gmra.mxu1 %vm485_vm0, %v10942_v26  ;;  %v1914_v3 = vpop.permute.xlu0 %1913  ;;  %12853 = vst [vmem:[#allocation73_spill] sm:$0xff] %v11015_v63 }
 0x274   :  { %v10948_v5 = vpop.permute.xlu1 %2586  ;;  %9205 = vmatprep.subr.mxu0 %v1914_v3  ;;  %9216 = vmatprep.mubr.msk.f32.mxu1 %vm485_vm0, %v10944_v0 }
 0x275   :  { %9206 = vmatpush3.msra.mxu0 %v1914_v3  ;;  %v11019_v3 = vld [vmem:[#allocation3 + $0x128] sm:$0xff] }
 0x276   :  { %12854 = vst [vmem:[#allocation74_spill] sm:$0xff] %v11019_v3 }
 0x277   :  { %v10952_v6 = vpop.permute.xlu0 %2675 }
 0x278   :  { %v2003_v7 = vpop.permute.xlu1 %2002 }
 0x279   :  { %9212 = vmatprep.subr.mxu1 %v2003_v7 }
 0x27a   :  { %9213 = vmatpush3.msra.mxu1 %v2003_v7  ;;  %v11041_v7 = vld [vmem:[#allocation3 + $0x168] sm:$0xff] }
 0x27b   :  { %v1912_v9 = vpop.permute.xlu0 %1911  ;;  %12857 = vst [vmem:[#allocation77_spill] sm:$0xff] %v11041_v7 }
 0x27c   :  { %v10956_v28 = vpop.permute.xlu1 %2762  ;;  %9207 = vmatprep.subr.mxu0 %v1912_v9 }
 0x27d   :  { %9208 = vmatpush3.msra.mxu0 %v1912_v9  ;;  %v11044_v9 = vld [vmem:[#allocation3 + $0x1a8] sm:$0xff] }
 0x27e   :  { %9210 = vmatmul.mubr.msk.f32.vlgmr.msra.gmra.mxu0 %vm485_vm0, %v10954_v13  ;;  %9219 = vmatprep.subr.mxu0 %v10876_v14  ;;  %12858 = vst [vmem:[#allocation78_spill] sm:$0xff] %v11044_v9 }
 0x27f   :  { %9220 = vmatpush3.msra.mxu0 %v10876_v14  ;;  %v10964_v25 = vpop.permute.xlu0 %2911  ;;  %9223 = vmatprep.mubr.msk.f32.mxu0 %vm485_vm0, %v10958_v17 }
 0x280   :  { %v2001_v33 = vpop.permute.xlu1 %2000  ;;  %9221 = vmatprep.subr.mxu0 %v10890_v21 }
 0x281   :  { %9214 = vmatprep.subr.mxu1 %v2001_v33  ;;  %9222 = vmatpush3.msra.mxu0 %v10890_v21  ;;  %v10987_v21 = vld [vmem:[#allocation3 + $0xa0] sm:$0xff] }
 0x282   :  { %9215 = vmatpush3.msra.mxu1 %v2001_v33  ;;  %9224 = vmatmul.mubr.msk.f32.vlgmr.msra.gmra.mxu0 %vm485_vm0, %v10968_v29  ;;  %12848 = vst [vmem:[#allocation68_spill] sm:$0xff] %v10987_v21  ;;  %v11060_v33 = vld [vmem:[#allocation3 + $0x30] sm:$0xff] }
 0x283   :  { %9217 = vmatmul.mubr.msk.f32.vlgmr.msra.gmra.mxu1 %vm485_vm0, %v10971_v35  ;;  %9226 = vmatprep.subr.mxu1 %v10880_v16  ;;  %v2674_v14 = vpop.permute.xlu0 %2673  ;;  %12860 = vst [vmem:[#allocation80_spill] sm:$0xff] %v11060_v33 }
 0x284   :  { %9233 = vmatprep.subr.mxu0 %v10904_v31  ;;  %v10980_v45 = vpop.permute.xlu1 %2998  ;;  %9227 = vmatpush3.msra.mxu1 %v10880_v16 }
 0x285   :  { %9234 = vmatpush3.msra.mxu0 %v10904_v31  ;;  %9228 = vmatprep.subr.mxu1 %v10900_v30  ;;  %v11009_v31 = vld [vmem:[#allocation3 + $0xe0] sm:$0xff] }
 0x286   :  { %9235 = vmatprep.subr.mxu0 %v10914_v42  ;;  %9229 = vmatpush3.msra.mxu1 %v10900_v30  ;;  %12851 = vst [vmem:[#allocation71_spill] sm:$0xff] %v11009_v31 }
 0x287   :  { %9230 = vmatprep.mubr.msk.f32.mxu1 %vm485_vm0, %v10983_v49  ;;  %9236 = vmatpush3.msra.mxu0 %v10914_v42  ;;  %v3088_v30 = vpop.permute.xlu0 %3087  ;;  %v11013_v42 = vld [vmem:[#allocation3 + $0x120] sm:$0xff] }
 0x288   :  { %9237 = vmatprep.mubr.msk.f32.mxu0 %vm485_vm0, %v10987_v21  ;;  %9231 = vmatmul.mubr.msk.f32.vlgmr.msra.gmra.mxu1 %vm485_vm0, %v10989_v53  ;;  %v11002_v16 = vpop.permute.xlu1 %3174  ;;  %12852 = vst [vmem:[#allocation72_spill] sm:$0xff] %v11013_v42 }
 0x289   :  { %9238 = vmatmul.mubr.msk.f32.vlgmr.msra.gmra.mxu0 %vm485_vm0, %v10993_v55  ;;  %9240 = vmatprep.subr.mxu1 %v10908_v39 }
 0x28a   :  { %9247 = vmatprep.subr.mxu0 %v10928_v52  ;;  %9241 = vmatpush3.msra.mxu1 %v10908_v39 }
 0x28b   :  { %9248 = vmatpush3.msra.mxu0 %v10928_v52  ;;  %9242 = vmatprep.subr.mxu1 %v10924_v51  ;;  %v11035_v52 = vld [vmem:[#allocation3 + $0x160] sm:$0xff] }
 0x28c   :  { %9249 = vmatprep.subr.mxu0 %v10938_v61  ;;  %9243 = vmatpush3.msra.mxu1 %v10924_v51  ;;  %v11028_v39 = vpop.permute.xlu1 %3172  ;;  %v3086_v51 = vpop.permute.xlu0 %3085  ;;  %12855 = vst [vmem:[#allocation75_spill] sm:$0xff] %v11035_v52 }
 0x28d   :  { %9244 = vmatprep.mubr.msk.f32.mxu1 %vm485_vm0, %v11009_v31  ;;  %9250 = vmatpush3.msra.mxu0 %v10938_v61  ;;  %v11039_v61 = vld [vmem:[#allocation3 + $0x1a0] sm:$0xff] }
 0x28e   :  { %9251 = vmatprep.mubr.msk.f32.mxu0 %vm485_vm0, %v11013_v42  ;;  %9245 = vmatmul.mubr.msk.f32.vlgmr.msra.gmra.mxu1 %vm485_vm0, %v11015_v63  ;;  %12856 = vst [vmem:[#allocation76_spill] sm:$0xff] %v11039_v61 }
 0x28f   :  { %9252 = vmatmul.mubr.msk.f32.vlgmr.msra.gmra.mxu0 %vm485_vm0, %v11019_v3  ;;  %9254 = vmatprep.subr.mxu1 %v10932_v58 }
 0x290   :  { %9261 = vmatprep.subr.mxu0 %v10952_v6  ;;  %9255 = vmatpush3.msra.mxu1 %v10932_v58  ;;  %v2761_v58 = vpop.permute.xlu1 %2760 }
 0x291   :  { %9262 = vmatpush3.msra.mxu0 %v10952_v6  ;;  %9256 = vmatprep.subr.mxu1 %v10948_v5  ;;  %v3262_v6 = vpop.permute.xlu0 %3261 }
 0x292   :  { %9263 = vmatprep.subr.mxu0 %v2674_v14  ;;  %9257 = vmatpush3.msra.mxu1 %v10948_v5  ;;  %v11057_v5 = vld [vmem:[#allocation3 + $0x1e0] sm:$0xff] }
 0x293   :  { %9258 = vmatprep.mubr.msk.f32.mxu1 %vm485_vm0, %v11035_v52  ;;  %9264 = vmatpush3.msra.mxu0 %v2674_v14  ;;  %12859 = vst [vmem:[#allocation79_spill] sm:$0xff] %v11057_v5  ;;  %v11062_v14 = vld [vmem:[#allocation3 + $0x1e8] sm:$0xff] }
 0x294   :  { %9265 = vmatprep.mubr.msk.f32.mxu0 %vm485_vm0, %v11039_v61  ;;  %9259 = vmatmul.mubr.msk.f32.vlgmr.msra.gmra.mxu1 %vm485_vm0, %v11041_v7  ;;  %12861 = vst [vmem:[#allocation81_spill] sm:$0xff] %v11062_v14 }
 0x295   :  { %9266 = vmatmul.mubr.msk.f32.vlgmr.msra.gmra.mxu0 %vm485_vm0, %v11044_v9  ;;  %9268 = vmatprep.subr.mxu1 %v10956_v28 }
 0x296   :  { %9275 = vmatprep.subr.mxu0 %v10878_v15  ;;  %9269 = vmatpush3.msra.mxu1 %v10956_v28  ;;  %v3260_v28 = vpop.permute.xlu0 %3259 }
 0x297   :  { %9276 = vmatpush3.msra.mxu0 %v10878_v15  ;;  %9270 = vmatprep.subr.mxu1 %v2761_v58  ;;  %v3349_v15 = vpop.permute.xlu1 %3348 }
 0x298   :  { %9277 = vmatprep.subr.mxu0 %v10964_v25  ;;  %9271 = vmatpush3.msra.mxu1 %v2761_v58  ;;  %v11078_v58 = vld [vmem:[#allocation3 + $0x70] sm:$0xff] }
 0x299   :  { %9272 = vmatprep.mubr.msk.f32.mxu1 %vm485_vm0, %v11057_v5  ;;  %9278 = vmatpush3.msra.mxu0 %v10964_v25  ;;  %12863 = vst [vmem:[#allocation83_spill] sm:$0xff] %v11078_v58  ;;  %v11081_v25 = vld [vmem:[#allocation3 + $0xb0] sm:$0xff] }
 0x29a   :  { %9279 = vmatprep.mubr.msk.f32.mxu0 %vm485_vm0, %v11060_v33  ;;  %9273 = vmatmul.mubr.msk.f32.vlgmr.msra.gmra.mxu1 %vm485_vm0, %v11062_v14  ;;  %12864 = vst [vmem:[#allocation84_spill] sm:$0xff] %v11081_v25 }
 0x29b   :  { %9280 = vmatmul.mubr.msk.f32.vlgmr.msra.gmra.mxu0 %vm485_vm0, %v11065_v22  ;;  %9282 = vmatprep.subr.mxu1 %v10884_v19 }
 0x29c   :  { %9289 = vmatprep.subr.mxu0 %v3088_v30  ;;  %9283 = vmatpush3.msra.mxu1 %v10884_v19  ;;  %v3347_v19 = vpop.permute.xlu1 %3346 }
 0x29d   :  { %9290 = vmatpush3.msra.mxu0 %v3088_v30  ;;  %9284 = vmatprep.subr.mxu1 %v10980_v45  ;;  %v3436_v30 = vpop.permute.xlu0 %3435 }
 0x29e   :  { %9291 = vmatprep.subr.mxu0 %v3086_v51  ;;  %9285 = vmatpush3.msra.mxu1 %v10980_v45  ;;  %v11098_v45 = vld [vmem:[#allocation3 + $0xf0] sm:$0xff] }
 0x29f   :  { %9286 = vmatprep.mubr.msk.f32.mxu1 %vm485_vm0, %v11078_v58  ;;  %9292 = vmatpush3.msra.mxu0 %v3086_v51  ;;  %12867 = vst [vmem:[#allocation87_spill] sm:$0xff] %v11098_v45  ;;  %v11101_v51 = vld [vmem:[#allocation3 + $0x130] sm:$0xff] }
 0x2a0   :  { %9293 = vmatprep.mubr.msk.f32.mxu0 %vm485_vm0, %v11081_v25  ;;  %9287 = vmatmul.mubr.msk.f32.vlgmr.msra.gmra.mxu1 %vm485_vm0, %v11083_v1  ;;  %12868 = vst [vmem:[#allocation88_spill] sm:$0xff] %v11101_v51  ;;  %v11106_v25 = vld [vmem:[#allocation3 + $0x138] sm:$0xff] }
 0x2a1   :  { %9294 = vmatmul.mubr.msk.f32.vlgmr.msra.gmra.mxu0 %vm485_vm0, %v11086_v24  ;;  %9296 = vmatprep.subr.mxu1 %v11002_v16  ;;  %12870 = vst [vmem:[#allocation90_spill] sm:$0xff] %v11106_v25 }
 0x2a2   :  { %9303 = vmatprep.subr.mxu0 %v3262_v6  ;;  %9297 = vmatpush3.msra.mxu1 %v11002_v16  ;;  %v3523_v16 = vpop.permute.xlu1 %3522 }
 0x2a3   :  { %9304 = vmatpush3.msra.mxu0 %v3262_v6  ;;  %9298 = vmatprep.subr.mxu1 %v11028_v39  ;;  %v3434_v6 = vpop.permute.xlu0 %3433 }
 0x2a4   :  { %9305 = vmatprep.subr.mxu0 %v3260_v28  ;;  %9299 = vmatpush3.msra.mxu1 %v11028_v39  ;;  %v11116_v39 = vld [vmem:[#allocation3 + $0x170] sm:$0xff] }
 0x2a5   :  { %9300 = vmatprep.mubr.msk.f32.mxu1 %vm485_vm0, %v11098_v45  ;;  %9306 = vmatpush3.msra.mxu0 %v3260_v28  ;;  %12871 = vst [vmem:[#allocation91_spill] sm:$0xff] %v11116_v39  ;;  %v11118_v45 = vld [vmem:[#allocation3 + $0x1b0] sm:$0xff]  ;;  %v11120_v28 = vld [vmem:[#allocation3 + $0x178] sm:$0xff] }
 0x2a6   :  { %9307 = vmatprep.mubr.msk.f32.mxu0 %vm485_vm0, %v11101_v51  ;;  %9301 = vmatmul.mubr.msk.f32.vlgmr.msra.gmra.mxu1 %vm485_vm0, %v11103_v23  ;;  %12872 = vst [vmem:[#allocation92_spill] sm:$0xff] %v11118_v45  ;;  %12873 = vst [vmem:[#allocation93_spill] sm:$0xff] %v11120_v28  ;;  %v11122_v51 = vld [vmem:[#allocation3 + $0x1b8] sm:$0xff] }
 0x2a7   :  { %9308 = vmatmul.mubr.msk.f32.vlgmr.msra.gmra.mxu0 %vm485_vm0, %v11106_v25  ;;  %9310 = vmatprep.subr.mxu1 %v3349_v15  ;;  %12874 = vst [vmem:[#allocation94_spill] sm:$0xff] %v11122_v51  ;;  %v11126_v25 = vld [vmem:[#allocation3 + $0x1f0] sm:$0xff] }
 0x2a8   :  { %9317 = vmatprep.subr.mxu0 %v3436_v30  ;;  %9311 = vmatpush3.msra.mxu1 %v3349_v15  ;;  %12875 = vst [vmem:[#allocation95_spill] sm:$0xff] %v11126_v25  ;;  %v3521_v15 = vpop.permute.xlu1 %3520 }
 0x2a9   :  { %9318 = vmatpush3.msra.mxu0 %v3436_v30  ;;  %9312 = vmatprep.subr.mxu1 %v3347_v19  ;;  %v9113_v30 = vpop.f32.mrf.mxu1 }
 0x2aa   :  { %9319 = vmatprep.subr.mxu0 %v3434_v6  ;;  %9313 = vmatpush3.msra.mxu1 %v3347_v19  ;;  %v11136_v19 = vld [vmem:[#allocation3 + $0x1f8] sm:$0xff]  ;;  %vm1328_vm1 = vcmp.gt.f32.partialorder %v9113_v30, 0.0  ;;  %v1344_v42 = vmul.f32 0.01, %v9113_v30 }
 0x2ab   :  { %9314 = vmatprep.mubr.msk.f32.mxu1 %vm485_vm0, %v11116_v39  ;;  %9320 = vmatpush3.msra.mxu0 %v3434_v6  ;;  %12876 = vst [vmem:[#allocation96_spill] sm:$0xff] %v11136_v19  ;;  %v751_v6 = vpop.f32.mrf.mxu1 }
 0x2ac   :  { %9321 = vmatprep.mubr.msk.f32.mxu0 %vm485_vm0, %v11118_v45  ;;  %9315 = vmatmul.mubr.msk.f32.vlgmr.msra.gmra.mxu1 %vm485_vm0, %v11120_v28  ;;  %vm1327_vm2 = vcmp.gt.f32.partialorder %v751_v6, 0.0  ;;  %v1343_v31 = vmul.f32 0.01, %v751_v6  ;;  %v11175_v0 = vsel %vm1328_vm1, %v9113_v30, %v1344_v42 }
 0x2ad   :  { %9322 = vmatmul.mubr.msk.f32.vlgmr.msra.gmra.mxu0 %vm485_vm0, %v11122_v51  ;;  %9324 = vmatprep.subr.mxu1 %v3523_v16  ;;  %v9120_v45 = vpop.f32.mrf.mxu1 }
 0x2ae   :  { %9325 = vmatpush3.msra.mxu1 %v3523_v16  ;;  %9328 = vmatprep.mubr.msk.f32.mxu1 %vm485_vm0, %v11126_v25  ;;  %vm1330_vm3 = vcmp.gt.f32.partialorder %v9120_v45, 0.0  ;;  %v1346_v55 = vmul.f32 0.01, %v9120_v45  ;;  %v11178_v26 = vsel %vm1327_vm2, %v751_v6, %v1343_v31 }
 0x2af   :  { %9326 = vmatprep.subr.mxu1 %v3521_v15  ;;  %v832_v28 = vpop.f32.mrf.mxu1 }
 0x2b0   :  { %9327 = vmatpush3.msra.mxu1 %v3521_v15  ;;  %vm1329_vm4 = vcmp.gt.f32.partialorder %v832_v28, 0.0  ;;  %v1345_v21 = vmul.f32 0.01, %v832_v28  ;;  %v11183_v57 = vsel %vm1330_vm3, %v9120_v45, %v1346_v55 }
 0x2b1   :  { %9329 = vmatmul.mubr.msk.f32.vlgmr.msra.gmra.mxu1 %vm485_vm0, %v11136_v19  ;;  %v9127_v39 = vpop.f32.mrf.mxu1 }
 0x2b2   :  { %v1348_v53 = vmul.f32 0.01, %v9127_v39  ;;  %vm1332_vm5 = vcmp.gt.f32.partialorder %v9127_v39, 0.0  ;;  %v11186_v47 = vsel %vm1329_vm4, %v832_v28, %v1345_v21 }
 0x2b3   :  { %v913_v23 = vpop.f32.mrf.mxu1 }
 0x2b4   :  { %v1347_v49 = vmul.f32 0.01, %v913_v23  ;;  %vm1331_vm6 = vcmp.gt.f32.partialorder %v913_v23, 0.0  ;;  %v11188_v46 = vsel %vm1332_vm5, %v9127_v39, %v1348_v53 }
 0x2b5   :  { %v9134_v24 = vpop.f32.mrf.mxu1 }
 0x2b6   :  { %v1350_v29 = vmul.f32 0.01, %v9134_v24  ;;  %vm1334_vm7 = vcmp.gt.f32.partialorder %v9134_v24, 0.0  ;;  %v11190_v40 = vsel %vm1331_vm6, %v913_v23, %v1347_v49 }
 0x2b7   :  { %v994_v51 = vpop.f32.mrf.mxu1 }
 0x2b8   :  { %v1349_v17 = vmul.f32 0.01, %v994_v51  ;;  %vm1333_vm8 = vcmp.gt.f32.partialorder %v994_v51, 0.0  ;;  %v11194_v44 = vsel %vm1334_vm7, %v9134_v24, %v1350_v29 }
 0x2b9   :  { %v9141_v1 = vpop.f32.mrf.mxu1 }
 0x2ba   :  { %v11196_v42 = vsel %vm1333_vm8, %v994_v51, %v1349_v17  ;;  %vm1336_vm9 = vcmp.gt.f32.partialorder %v9141_v1, 0.0  ;;  %v1352_v31 = vmul.f32 0.01, %v9141_v1 }
 0x2bb   :  { %v11140_v16 = vpop.f32.mrf.mxu1 }
 0x2bc   :  { %vm1335_vm10 = vcmp.gt.f32.partialorder %v11140_v16, 0.0  ;;  %v1351_v55 = vmul.f32 0.01, %v11140_v16  ;;  %v11217_v51 = vsel %vm1336_vm9, %v9141_v1, %v1352_v31 }
 0x2bd   :  { %v11142_v58 = vpop.f32.mrf.mxu1 }
 0x2be   :  { %vm1338_vm11 = vcmp.gt.f32.partialorder %v11142_v58, 0.0  ;;  %v1354_v21 = vmul.f32 0.01, %v11142_v58  ;;  %v11227_v27 = vsel %vm1335_vm10, %v11140_v16, %v1351_v55 }
 0x2bf   :  { %v11144_v25 = vpop.f32.mrf.mxu1 }
 0x2c0   :  { %vm1337_vm12 = vcmp.gt.f32.partialorder %v11144_v25, 0.0  ;;  %v1353_v23 = vmul.f32 0.01, %v11144_v25  ;;  %v11235_v1 = vsel %vm1338_vm11, %v11142_v58, %v1354_v21 }
 0x2c1   :  { %v11146_v22 = vpop.f32.mrf.mxu1 }
 0x2c2   :  { %vm1340_vm13 = vcmp.gt.f32.partialorder %v11146_v22, 0.0  ;;  %v1356_v24 = vmul.f32 0.01, %v11146_v22  ;;  %v11240_v31 = vsel %vm1337_vm12, %v11144_v25, %v1353_v23 }
 0x2c3   :  { %v11148_v15 = vpop.f32.mrf.mxu1 }
 0x2c4   :  { %vm1339_vm14 = vcmp.gt.f32.partialorder %v11148_v15, 0.0  ;;  %v1355_v29 = vmul.f32 0.01, %v11148_v15  ;;  %v11245_v16 = vsel %vm1340_vm13, %v11146_v22, %v1356_v24 }
 0x2c5   :  { %v11150_v19 = vpop.f32.mrf.mxu1 }
 0x2c6   :  { %vm1342_vm15 = vcmp.gt.f32.partialorder %v11150_v19, 0.0  ;;  %v1358_v49 = vmul.f32 0.01, %v11150_v19  ;;  %v11255_v58 = vsel %vm1339_vm14, %v11148_v15, %v1355_v29 }
 0x2c7   :  { %v11154_v14 = vpop.f32.mrf.mxu1 }
 0x2c8   :  { %v11260_v25 = vsel %vm1342_vm15, %v11150_v19, %v1358_v49  ;;  %vm1341_vm4 = vcmp.gt.f32.partialorder %v11154_v14, 0.0  ;;  %v1357_v21 = vmul.f32 0.01, %v11154_v14 }
 0x30e   :  { %v11152_v33 = vpop.f32.mrf.mxu0 }
 0x30f   :  { %v2104_v39 = vmul.f32 0.01, %v11152_v33  ;;  %vm2088_vm1 = vcmp.gt.f32.partialorder %v11152_v33, 0.0 }
 0x310   :  { %v11156_v5 = vpop.f32.mrf.mxu0 }
 0x311   :  { %v2103_v28 = vmul.f32 0.01, %v11156_v5  ;;  %vm2087_vm2 = vcmp.gt.f32.partialorder %v11156_v5, 0.0  ;;  %v11265_v22 = vsel %vm2088_vm1, %v11152_v33, %v2104_v39 }
 0x313   :  { %v11158_v9 = vpop.f32.mrf.mxu1  ;;  %v11269_v23 = vsel %vm2087_vm2, %v11156_v5, %v2103_v28 }
 0x314   :  { %v2106_v30 = vmul.f32 0.01, %v11158_v9  ;;  %vm2090_vm3 = vcmp.gt.f32.partialorder %v11158_v9, 0.0 }
 0x315   :  { %v11162_v7 = vpop.f32.mrf.mxu1 }
 0x316   :  { %v2105_v55 = vmul.f32 0.01, %v11162_v7  ;;  %vm2089_vm5 = vcmp.gt.f32.partialorder %v11162_v7, 0.0  ;;  %v11272_v15 = vsel %vm2090_vm3, %v11158_v9, %v2106_v30 }
 0x318   :  { %v11281_v33 = vsel %vm2089_vm5, %v11162_v7, %v2105_v55  ;;  %v2136_v7 = vmax.f32 %v11175_v0, %v11265_v22  ;;  %v11299_v55 = vsel %vm1341_vm4, %v11154_v14, %v1357_v21 }
 0x31e   :  { %v11160_v61 = vpop.f32.mrf.mxu0 }
 0x31f   :  { %vm2092_vm6 = vcmp.gt.f32.partialorder %v11160_v61, 0.0  ;;  %v2108_v19 = vmul.f32 0.01, %v11160_v61 }
 0x320   :  { %v11164_v52 = vpop.f32.mrf.mxu0 }
 0x321   :  { %vm2091_vm7 = vcmp.gt.f32.partialorder %v11164_v52, 0.0  ;;  %v2107_v24 = vmul.f32 0.01, %v11164_v52  ;;  %v11313_v0 = vsel %vm2092_vm6, %v11160_v61, %v2108_v19 }
 0x323   :  { %v11166_v3 = vpop.f32.mrf.mxu1  ;;  %v11318_v14 = vsel %vm2091_vm7, %v11164_v52, %v2107_v24 }
 0x324   :  { %v2110_v49 = vmul.f32 0.01, %v11166_v3  ;;  %vm2094_vm8 = vcmp.gt.f32.partialorder %v11166_v3, 0.0 }
 0x325   :  { %v11170_v35 = vpop.f32.mrf.mxu1 }
 0x326   :  { %v2109_v5 = vmul.f32 0.01, %v11170_v35  ;;  %vm2093_vm9 = vcmp.gt.f32.partialorder %v11170_v35, 0.0  ;;  %v11321_v22 = vsel %vm2094_vm8, %v11166_v3, %v2110_v49 }
 0x328   :  { %v11324_v21 = vsel %vm2093_vm9, %v11170_v35, %v2109_v5 }
 0x32e   :  { %v11168_v63 = vpop.f32.mrf.mxu0 }
 0x32f   :  { %v2112_v9 = vmul.f32 0.01, %v11168_v63  ;;  %vm2096_vm10 = vcmp.gt.f32.partialorder %v11168_v63, 0.0 }
 0x330   :  { %v11172_v13 = vpop.f32.mrf.mxu0 }
 0x331   :  { %v2111_v28 = vmul.f32 0.01, %v11172_v13  ;;  %vm2095_vm11 = vcmp.gt.f32.partialorder %v11172_v13, 0.0  ;;  %v11327_v10 = vsel %vm2096_vm10, %v11168_v63, %v2112_v9 }
 0x333   :  { %v11180_v59 = vpop.f32.mrf.mxu1  ;;  %v11331_v38 = vsel %vm2095_vm11, %v11172_v13, %v2111_v28  ;;  %v2140_v13 = vmax.f32 %v11188_v46, %v11313_v0 }
 0x334   :  { %v2114_v8 = vmul.f32 0.01, %v11180_v59  ;;  %vm2098_vm12 = vcmp.gt.f32.partialorder %v11180_v59, 0.0 }
 0x335   :  { %v11208_v17 = vpop.f32.mrf.mxu1 }
 0x336   :  { %v2113_v61 = vmul.f32 0.01, %v11208_v17  ;;  %vm2097_vm13 = vcmp.gt.f32.partialorder %v11208_v17, 0.0  ;;  %v11359_v46 = vsel %vm2098_vm12, %v11180_v59, %v2114_v8 }
 0x338   :  { %v11368_v5 = vsel %vm2097_vm13, %v11208_v17, %v2113_v61 }
 0x33e   :  { %v11192_v37 = vpop.f32.mrf.mxu0 }
 0x33f   :  { %v2116_v52 = vmul.f32 0.01, %v11192_v37  ;;  %vm2100_vm14 = vcmp.gt.f32.partialorder %v11192_v37, 0.0 }
 0x340   :  { %v11202_v53 = vpop.f32.mrf.mxu0 }
 0x341   :  { %v2115_v35 = vmul.f32 0.01, %v11202_v53  ;;  %vm2099_vm15 = vcmp.gt.f32.partialorder %v11202_v53, 0.0  ;;  %v11373_v9 = vsel %vm2100_vm14, %v11192_v37, %v2116_v52 }
 0x342   :  { %v11214_v45 = vpop.f32.mrf.mxu0 }
 0x343   :  { %v11222_v6 = vpop.f32.mrf.mxu1  ;;  %v2864_v63 = vmul.f32 0.01, %v11214_v45  ;;  %vm2848_vm1 = vcmp.gt.f32.partialorder %v11214_v45, 0.0  ;;  %v11377_v8 = vsel %vm2099_vm15, %v11202_v53, %v2115_v35 }
 0x344   :  { %v11250_v18 = vpop.f32.mrf.mxu0  ;;  %v2118_v28 = vmul.f32 0.01, %v11222_v6  ;;  %vm2102_vm2 = vcmp.gt.f32.partialorder %v11222_v6, 0.0 }
 0x345   :  { %v11248_v36 = vpop.f32.mrf.mxu1  ;;  %v2880_v59 = vsel %vm2848_vm1, %v11214_v45, %v2864_v63  ;;  %v2863_v24 = vmul.f32 0.01, %v11250_v18  ;;  %vm2847_vm3 = vcmp.gt.f32.partialorder %v11250_v18, 0.0 }
 0x346   :  { %v11400_v17 = vsel %vm2102_vm2, %v11222_v6, %v2118_v28  ;;  %v11402_v4 = vmax.f32 %v2136_v7, %v2880_v59  ;;  %vm2101_vm6 = vcmp.gt.f32.partialorder %v11248_v36, 0.0  ;;  %v2117_v35 = vmul.f32 0.01, %v11248_v36 }
 0x347   :  { %v2879_v62 = vsel %vm2847_vm3, %v11250_v18, %v2863_v24  ;;  %v12878_v18 = vmax.f32 %v11183_v57, %v11272_v15 }
 0x348   :  { %v11278_v29 = vpop.f32.mrf.mxu1 }
 0x349   :  { %v11286_v39 = vpop.f32.mrf.mxu0  ;;  %v2866_v61 = vmul.f32 0.01, %v11278_v29  ;;  %vm2850_vm4 = vcmp.gt.f32.partialorder %v11278_v29, 0.0 }
 0x34a   :  { %v11292_v30 = vpop.f32.mrf.mxu1  ;;  %v2868_v37 = vmul.f32 0.01, %v11286_v39  ;;  %vm2852_vm5 = vcmp.gt.f32.partialorder %v11286_v39, 0.0 }
 0x34b   :  { %v11304_v11 = vpop.f32.mrf.mxu0  ;;  %v2865_v2 = vmul.f32 0.01, %v11292_v30  ;;  %vm2849_vm7 = vcmp.gt.f32.partialorder %v11292_v30, 0.0  ;;  %v2882_v6 = vsel %vm2850_vm4, %v11278_v29, %v2866_v61  ;;  %v12877_v61 = vmax.f32 %v11178_v26, %v11269_v23 }
 0x34c   :  { %v2884_v7 = vsel %vm2852_vm5, %v11286_v39, %v2868_v37  ;;  %v2867_v28 = vmul.f32 0.01, %v11304_v11  ;;  %vm2851_vm8 = vcmp.gt.f32.partialorder %v11304_v11, 0.0  ;;  %v11431_v39 = vsel %vm2101_vm6, %v11248_v36, %v2117_v35 }
 0x34d   :  { %v2881_v24 = vsel %vm2849_vm7, %v11292_v30, %v2865_v2  ;;  %v11436_v37 = vmax.f32 %v12877_v61, %v2879_v62  ;;  %v11441_v54 = vmax.f32 %v12878_v18, %v2882_v6  ;;  %v11443_v2 = vmax.f32 %v2140_v13, %v2884_v7 }
 0x34e   :  { %v11336_v19 = vpop.f32.mrf.mxu1  ;;  %v2883_v50 = vsel %vm2851_vm8, %v11304_v11, %v2867_v28  ;;  %v12879_v62 = vmax.f32 %v11186_v47, %v11281_v33  ;;  %v12880_v6 = vmax.f32 %v11190_v40, %v11318_v14  ;;  %v12881_v47 = vmax.f32 %v11194_v44, %v11321_v22 }
 0x34f   :  { %v11342_v3 = vpop.f32.mrf.mxu0  ;;  %v2870_v59 = vmul.f32 0.01, %v11336_v19  ;;  %vm2854_vm9 = vcmp.gt.f32.partialorder %v11336_v19, 0.0  ;;  %v12883_v40 = vmax.f32 %v11196_v42, %v11324_v21 }
 0x350   :  { %v2490_v49 = vpop.f32.mrf.mxu1  ;;  %v2872_v60 = vmul.f32 0.01, %v11342_v3  ;;  %vm2856_vm10 = vcmp.gt.f32.partialorder %v11342_v3, 0.0  ;;  %v11452_v26 = vmax.f32 %v12879_v62, %v2881_v24  ;;  %v11462_v7 = vmax.f32 %v12880_v6, %v2883_v50 }
 0x351   :  { %v11361_v0 = vpop.f32.mrf.mxu0  ;;  %v2869_v56 = vmul.f32 0.01, %v2490_v49  ;;  %vm2853_vm11 = vcmp.gt.f32.partialorder %v2490_v49, 0.0  ;;  %v2886_v48 = vsel %vm2854_vm9, %v11336_v19, %v2870_v59  ;;  %v12884_v62 = vmax.f32 %v11227_v27, %v11331_v38 }
 0x352   :  { %v2888_v57 = vsel %vm2856_vm10, %v11342_v3, %v2872_v60  ;;  %v2871_v15 = vmul.f32 0.01, %v11361_v0  ;;  %vm2855_vm13 = vcmp.gt.f32.partialorder %v11361_v0, 0.0  ;;  %v11467_v33 = vmax.f32 %v12881_v47, %v2886_v48 }
 0x353   :  { %v2885_v23 = vsel %vm2853_vm11, %v2490_v49, %v2869_v56  ;;  %v12882_v3 = vmax.f32 %v11217_v51, %v11327_v10 }
 0x354   :  { %v11387_v52 = vpop.f32.mrf.mxu1  ;;  %v11480_v50 = vmax.f32 %v12883_v40, %v2885_v23  ;;  %v2887_v14 = vsel %vm2855_vm13, %v11361_v0, %v2871_v15 }
 0x355   :  { %v11395_v45 = vpop.f32.mrf.mxu0  ;;  %v2874_v56 = vmul.f32 0.01, %v11387_v52  ;;  %v11475_v49 = vmax.f32 %v12882_v3, %v2888_v57  ;;  %vm2858_vm15 = vcmp.gt.f32.partialorder %v11387_v52, 0.0  ;;  %v11500_v57 = vmax.f32 %v12884_v62, %v2887_v14 }
 0x356   :  { %v11405_v53 = vpop.f32.mrf.mxu1  ;;  %vm2860_vm2 = vcmp.gt.f32.partialorder %v11395_v45, 0.0  ;;  %v2876_v51 = vmul.f32 0.01, %v11395_v45  ;;  %v12887_v62 = vmax.f32 %v11240_v31, %v11368_v5 }
 0x357   :  { %v11413_v63 = vpop.f32.mrf.mxu0  ;;  %v2890_v59 = vsel %vm2858_vm15, %v11387_v52, %v2874_v56  ;;  %v2873_v23 = vmul.f32 0.01, %v11405_v53  ;;  %vm2857_vm6 = vcmp.gt.f32.partialorder %v11405_v53, 0.0 }
 0x358   :  { %v2892_v47 = vsel %vm2860_vm2, %v11395_v45, %v2876_v51  ;;  %vm2859_vm8 = vcmp.gt.f32.partialorder %v11413_v63, 0.0 }
 0x359   :  { %v2889_v14 = vsel %vm2857_vm6, %v11405_v53, %v2873_v23 }
 0x35a   :  { %v11426_v29 = vpop.f32.mrf.mxu1  ;;  %v2905_v23 = vmax.f32 %v12887_v62, %v2889_v14 }
 0x35b   :  { %v9281_v30 = vpop.f32.mrf.mxu0 }
 0x35c   :  { %vm3608_vm12 = vcmp.gt.f32.partialorder %v9281_v30, 0.0  ;;  %v3624_v36 = vmul.f32 0.01, %v9281_v30  ;;  %v11447_v35 = vpop.f32.mrf.mxu1 }
 0x35d   :  { %v2989_v13 = vpop.f32.mrf.mxu0 }
 0x35e   :  { %v11457_v11 = vsel %vm3608_vm12, %v9281_v30, %v3624_v36  ;;  %vm3607_vm14 = vcmp.gt.f32.partialorder %v2989_v13, 0.0  ;;  %v3623_v19 = vmul.f32 0.01, %v2989_v13  ;;  %vm2862_vm12 = vcmp.gt.f32.partialorder %v11426_v29, 0.0 }
 0x35f   :  { %v3656_v60 = vmax.f32 %v11402_v4, %v11457_v11  }
 0x360   :  { %v11483_v44 = vsel %vm3607_vm14, %v2989_v13, %v3623_v19  ;;  %v9288_v48 = vpop.f32.mrf.mxu1  ;;  %v12885_v13 = vmax.f32 %v11235_v1, %v11359_v46  ;;  %v2875_v46 = vmul.f32 0.01, %v11413_v63  ;;  %vm2861_vm14 = vcmp.gt.f32.partialorder %v11447_v35, 0.0 }
 0x361   :  { %v3655_v22 = vmax.f32 %v11436_v37, %v11483_v44   ;;  %vm3610_vm1 = vcmp.gt.f32.partialorder %v9288_v48, 0.0  ;;  %v3626_v28 = vmul.f32 0.01, %v9288_v48  ;;  %v9295_v10 = vpop.f32.mrf.mxu0 }
 0x362   :  { %vm3612_vm3 = vcmp.gt.f32.partialorder %v9295_v10, 0.0  ;;  %v3628_v42 = vmul.f32 0.01, %v9295_v10  ;;  %v3076_v21 = vpop.f32.mrf.mxu1  ;;  %v11510_v19 = vmax.f32 %v12885_v13, %v2890_v59  ;;  %v12886_v59 = vmax.f32 %v11245_v16, %v11373_v9 }
 0x363   :  { %v11491_v18 = vsel %vm3610_vm1, %v9288_v48, %v3626_v28  ;;  %vm3609_vm4 = vcmp.gt.f32.partialorder %v3076_v21, 0.0  ;;  %v3625_v24 = vmul.f32 0.01, %v3076_v21  ;;  %v3163_v0 = vpop.f32.mrf.mxu0 }
 0x364   :  { %v3658_v61 = vmax.f32 %v11441_v54, %v11491_v18   ;;  %v11495_v30 = vsel %vm3612_vm3, %v9295_v10, %v3628_v42  ;;  %vm3611_vm5 = vcmp.gt.f32.partialorder %v3163_v0, 0.0  ;;  %v3627_v36 = vmul.f32 0.01, %v3163_v0 }
 0x365   :  { %v3660_v52 = vmax.f32 %v11443_v2, %v11495_v30   ;;  %v11505_v15 = vsel %vm3609_vm4, %v3076_v21, %v3625_v24  ;;  %v2908_v24 = vmax.f32 %v12886_v59, %v2892_v47 }
 0x366   :  { %v3657_v6 = vmax.f32 %v11452_v26, %v11505_v15   ;;  %v11515_v38 = vsel %vm3611_vm5, %v3163_v0, %v3627_v36  ;;  %v9302_v27 = vpop.f32.mrf.mxu1  ;;  %v2878_v0 = vmul.f32 0.01, %v11426_v29 }
 0x367   :  { %v3659_v56 = vmax.f32 %v11462_v7, %v11515_v38   ;;  %vm3614_vm7 = vcmp.gt.f32.partialorder %v9302_v27, 0.0  ;;  %v3630_v3 = vmul.f32 0.01, %v9302_v27  ;;  %v9309_v1 = vpop.f32.mrf.mxu0 }
 0x368   :  { %vm3616_vm9 = vcmp.gt.f32.partialorder %v9309_v1, 0.0  ;;  %v3632_v40 = vmul.f32 0.01, %v9309_v1  ;;  %v3250_v48 = vpop.f32.mrf.mxu1 }
 0x369   :  { %v11525_v28 = vsel %vm3614_vm7, %v9302_v27, %v3630_v3  ;;  %vm3613_vm10 = vcmp.gt.f32.partialorder %v3250_v48, 0.0  ;;  %v3629_v10 = vmul.f32 0.01, %v3250_v48  ;;  %v3337_v45 = vpop.f32.mrf.mxu0  ;;  %v2877_v3 = vmul.f32 0.01, %v11447_v35 }
 0x36a   :  { %v3662_v51 = vmax.f32 %v11467_v33, %v11525_v28   ;;  %v3648_v42 = vsel %vm3616_vm9, %v9309_v1, %v3632_v40  ;;  %vm3615_vm11 = vcmp.gt.f32.partialorder %v3337_v45, 0.0  ;;  %v3631_v21 = vmul.f32 0.01, %v3337_v45 }
 0x36b   :  { %v3664_v36 = vmax.f32 %v11475_v49, %v3648_v42   ;;  %v3645_v53 = vsel %vm3613_vm10, %v3250_v48, %v3629_v10  ;;  %v2891_v49 = vsel %vm2859_vm8, %v11413_v63, %v2875_v46  ;;  %v12888_v10 = vmax.f32 %v11255_v58, %v11377_v8 }
 0x36c   :  { %v3661_v33 = vmax.f32 %v11480_v50, %v3645_v53   ;;  %v3647_v13 = vsel %vm3615_vm11, %v3337_v45, %v3631_v21  ;;  %v9316_v27 = vpop.f32.mrf.mxu1  ;;  %v2894_v50 = vsel %vm2862_vm12, %v11426_v29, %v2878_v0  ;;  %v2893_v46 = vsel %vm2861_vm14, %v11447_v35, %v2877_v3 }
 0x36d   :  { %v3663_v16 = vmax.f32 %v11500_v57, %v3647_v13   ;;  %vm3618_vm13 = vcmp.gt.f32.partialorder %v9316_v27, 0.0  ;;  %v3634_v9 = vmul.f32 0.01, %v9316_v27  ;;  %v9323_v47 = vpop.f32.mrf.mxu0  ;;  %v2907_v63 = vmax.f32 %v12888_v10, %v2891_v49 }
 0x36e   :  { %vm3620_vm15 = vcmp.gt.f32.partialorder %v9323_v47, 0.0  ;;  %v3636_v31 = vmul.f32 0.01, %v9323_v47  ;;  %v3424_v5 = vpop.f32.mrf.mxu1  ;;  %v2149_v53 = vmax.f32 %v11299_v55, %v11431_v39 }
 0x36f   :  { %v3650_v1 = vsel %vm3618_vm13, %v9316_v27, %v3634_v9  ;;  %vm3617_vm1 = vcmp.gt.f32.partialorder %v3424_v5, 0.0  ;;  %v3633_v40 = vmul.f32 0.01, %v3424_v5  ;;  %v3511_v48 = vpop.f32.mrf.mxu0 }
 0x370   :  { %v3666_v57 = vmax.f32 %v11510_v19, %v3650_v1   ;;  %v3652_v14 = vsel %vm3620_vm15, %v9323_v47, %v3636_v31  ;;  %vm3619_vm2 = vcmp.gt.f32.partialorder %v3511_v48, 0.0  ;;  %v3635_v28 = vmul.f32 0.01, %v3511_v48 }
 0x371   :  { %v3668_v45 = vmax.f32 %v2908_v24, %v3652_v14   ;;  %v3649_v42 = vsel %vm3617_vm1, %v3424_v5, %v3633_v40  ;;  %v9330_v21 = vpop.f32.mrf.mxu1  ;;  %v12889_v19 = vmax.f32 %v11260_v25, %v11400_v17  ;;  %v2909_v35 = vmax.f32 %v2149_v53, %v2893_v46 }
 0x372   :  { %v3665_v59 = vmax.f32 %v2905_v23, %v3649_v42   ;;  %v3651_v29 = vsel %vm3619_vm2, %v3511_v48, %v3635_v28  ;;  %vm3622_vm3 = vcmp.gt.f32.partialorder %v9330_v21, 0.0  ;;  %v3638_v0 = vmul.f32 0.01, %v9330_v21 }
 0x373   :  { %v2910_v62 = vmax.f32 %v12889_v19, %v2894_v50  ;;  %v3667_v13 = vmax.f32 %v2907_v63, %v3651_v29   ;;  %v3598_v27 = vpop.f32.mrf.mxu1 }
 0x374   :  { %v3654_v58 = vsel %vm3622_vm3, %v9330_v21, %v3638_v0  ;;  %vm3621_vm4 = vcmp.gt.f32.partialorder %v3598_v27, 0.0  ;;  %v3637_v8 = vmul.f32 0.01, %v3598_v27 }
 0x375   :  { %v3670_v24 = vmax.f32 %v2910_v62, %v3654_v58  }
 0x376   :  { %v3653_v3 = vsel %vm3621_vm4, %v3598_v27, %v3637_v8 }
 0x377   :  { %v3669_v9 = vmax.f32 %v2909_v35, %v3653_v3  }
 0x378 LB: > { %12890 = vst [vmem:[#allocation97_spill] sm:$0xff] %v10228_v24  ;;  %12891 = vst [vmem:[#allocation98_spill] sm:$0xff] %v10232_v9  ;;  %vm3707_vm5 = vcmask 261120   ;;  %v12898_v20 = vld [vmem:[#allocation33_spill] sm:$0xff]  ;;  %s8624_s16 = sshll.u32 %s10292_s11, 5  ;;  %v12899_v12 = vld [vmem:[#allocation50_spill] sm:$0xff]  ;;  %s10292_s11 = sphi %s11606_s11, %s3676_s11   ;;  %v10288_v22 = vphi %v3655_v22, %v13020_v22   ;;  %v10284_v60 = vphi %v3656_v60, %v13019_v60   ;;  %v10280_v6 = vphi %v3657_v6, %v13018_v6   ;;  %v10276_v61 = vphi %v3658_v61, %v13017_v61   ;;  %v10272_v56 = vphi %v3659_v56, %v13016_v56   ;;  %v10268_v52 = vphi %v3660_v52, %v13015_v52   ;;  %v10264_v33 = vphi %v3661_v33, %v13014_v33   ;;  %v10260_v51 = vphi %v3662_v51, %v13013_v51   ;;  %v10256_v16 = vphi %v3663_v16, %v13012_v16   ;;  %v10252_v36 = vphi %v3664_v36, %v13011_v36   ;;  %v10248_v59 = vphi %v3665_v59, %v13010_v59   ;;  %v10244_v57 = vphi %v3666_v57, %v13009_v57   ;;  %v10240_v13 = vphi %v3667_v13, %v13008_v13   ;;  %v10236_v45 = vphi %v3668_v45, %v13007_v45   ;;  %v10232_v9 = vphi %v3669_v9, %v13006_v9   ;;  %v10228_v24 = vphi %v3670_v24, %v13005_v24  }
 0x379   : > { %12892 = vst [vmem:[#allocation99_spill] sm:$0xff] %v10236_v45  ;;  %12893 = vst [vmem:[#allocation100_spill] sm:$0xff] %v10240_v13  ;;  %9367 = vmatprep.mubr.msk.f32.mxu1 %vm485_vm0, %v12898_v20  ;;  %9339 = vmatprep.mubr.msk.f32.mxu0 %vm3707_vm5, %v10288_v22  ;;  %s3694_s20 = scalar_lea.vmem [#allocation17], %s8624_s16  ;;  %s3699_s1 = scalar_lea.vmem [#allocation18], %s10292_s11  ;;  %v12900_v32 = vld [vmem:[#allocation34_spill] sm:$0xff]  ;;  %v12901_v34 = vld [vmem:[#allocation35_spill] sm:$0xff] }
 0x37a   : > { %12894 = vst [vmem:[#allocation101_spill] sm:$0xff] %v10244_v57  ;;  %12895 = vst [vmem:[#allocation102_spill] sm:$0xff] %v10248_v59  ;;  %v3698_v54 = vld [vmem:[%s3694_s20 + $0x18] sm:$0xff]  ;;  %v3697_v4 = vld [vmem:[%s3694_s20 + $0x10] sm:$0xff]  ;;  %s10312_s21 = smov 96   ;;  %s10313_s6 = smov 64  }
 0x37b   : > { %12896 = vst [vmem:[#allocation103_spill] sm:$0xff] %v10252_v36  ;;  %12897 = vst [vmem:[#allocation104_spill] sm:$0xff] %v10256_v16  ;;  %9331 = vmatprep.subr.mxu0 %v3698_v54  ;;  %v3696_v25 = vld [vmem:[%s3694_s20 + $0x8] sm:$0xff]  ;;  %v3695_v55 = vld [vmem:[%s3694_s20] sm:$0xff]  ;;  %s10314_s19 = smov 32   ;;  %s3676_s11 = sadd.s32 1, %s10292_s11  }
 0x37c   : > { %9332 = vmatpush3.msra.mxu0 %v3698_v54  ;;  %v11697_v17 = vld [vmem:[%s3699_s1] ss:$0 sm:$0xff]  ;;  %v12903_v43 = vld [vmem:[#allocation38_spill] sm:$0xff]  ;;  %v12904_v50 = vld [vmem:[#allocation39_spill] sm:$0xff]  ;;  %p12381_p8 = scmp.ge.s32.totalorder %s3676_s11, 2  }
 0x37d   : > { %9333 = vmatprep.subr.mxu0 %v3697_v4  ;;  %v12902_v41 = vld [vmem:[#allocation37_spill] sm:$0xff]  ;;  %v12905_v14 = vld [vmem:[#allocation40_spill] sm:$0xff]  ;;  %v12907_v21 = vld [vmem:[#allocation42_spill] sm:$0xff] }
 0x37e   : > { %9334 = vmatpush3.msra.mxu0 %v3697_v4  ;;  %v12906_v63 = vld [vmem:[#allocation41_spill] sm:$0xff]  ;;  %v12908_v0 = vld [vmem:[#allocation43_spill] sm:$0xff]  ;;  %v12909_v27 = vld [vmem:[#allocation44_spill] sm:$0xff] }
 0x37f   : > { %9335 = vmatprep.subr.mxu0 %v3696_v25  ;;  %v12910_v35 = vld [vmem:[#allocation45_spill] sm:$0xff]  ;;  %v12911_v4 = vld [vmem:[#allocation46_spill] sm:$0xff] }
 0x380   : > { %9336 = vmatpush3.msra.mxu0 %v3696_v25 }
 0x381   : > { %9337 = vmatprep.subr.mxu0 %v3695_v55 }
 0x382   : > { %9338 = vmatpush3.msra.mxu0 %v3695_v55  ;;  %v12912_v55 = vld [vmem:[#allocation47_spill] sm:$0xff] }
 0x383   : > { %9340 = vmatmul.mubr.msk.f32.vlgmr.msra.gmra.mxu0 %vm3707_vm5, %v10284_v60 }
 0x384   : > { %9342 = vmatprep.mubr.msk.f32.mxu0 %vm3707_vm5, %v10280_v6 }
 0x387   : > { %9343 = vmatmul.mubr.msk.f32.gmra.mxu0 %vm3707_vm5, %v10276_v61 }
 0x388   : > { %9345 = vmatprep.mubr.msk.f32.mxu0 %vm3707_vm5, %v10272_v56 }
 0x38b   : > { %9346 = vmatmul.mubr.msk.f32.gmra.mxu0 %vm3707_vm5, %v10268_v52 }
 0x38c   : > { %9348 = vmatprep.mubr.msk.f32.mxu0 %vm3707_vm5, %v10264_v33 }
 0x38f   : > { %9349 = vmatmul.mubr.msk.f32.gmra.mxu0 %vm3707_vm5, %v10260_v51 }
 0x390   : > { %9351 = vmatprep.mubr.msk.f32.mxu0 %vm3707_vm5, %v10256_v16 }
 0x393   : > { %9352 = vmatmul.mubr.msk.f32.gmra.mxu0 %vm3707_vm5, %v10252_v36 }
 0x394   : > { %9354 = vmatprep.mubr.msk.f32.mxu0 %vm3707_vm5, %v10248_v59 }
 0x397   : > { %9355 = vmatmul.mubr.msk.f32.gmra.mxu0 %vm3707_vm5, %v10244_v57 }
 0x398   : > { %9357 = vmatprep.mubr.msk.f32.mxu0 %vm3707_vm5, %v10240_v13 }
 0x39b   : > { %9358 = vmatmul.mubr.msk.f32.gmra.mxu0 %vm3707_vm5, %v10236_v45 }
 0x39c   : > { %9360 = vmatprep.mubr.msk.f32.mxu0 %vm3707_vm5, %v10232_v9 }
 0x39f   : > { %9361 = vmatmul.mubr.msk.f32.gmra.mxu0 %vm3707_vm5, %v10228_v24 }
 0x3a0   : > { %9430 = vmatprep.mubr.msk.f32.mxu0 %vm485_vm0, %v12899_v12 }
 0x443   : > { %v9341_v39 = vpop.f32.mrf.mxu0 }
 0x444   : > { %v3828_v37 = vadd.f32 %v9341_v39, %v11697_v17  ;;  %v12913_v39 = vld [vmem:[#allocation48_spill] sm:$0xff] }
 0x445   : > { %v3822_v2 = vpop.f32.mrf.mxu0 }
 0x446   : > { %v11701_v26 = vadd.f32 %v11697_v17, %v3822_v2  ;;  %4553 = vrot.lane.b32.xlu0 %v3828_v37, %s10312_s21  ;;  %9363 = vmatprep.subr.mxu1 %v3828_v37 }
 0x447   : > { %v9344_v11 = vpop.f32.mrf.mxu0  ;;  %9364 = vmatpush3.msra.mxu1 %v3828_v37 }
 0x448   : > { %v3838_v7 = vadd.f32 %v9344_v11, %v11697_v17  ;;  %4551 = vrot.lane.b32.xlu1 %v11701_v26, %s10312_s21  ;;  %9365 = vmatprep.subr.mxu1 %v11701_v26 }
 0x449   : > { %v3832_v44 = vpop.f32.mrf.mxu0  ;;  %9366 = vmatpush3.msra.mxu1 %v11701_v26 }
 0x44a   : > { %v11710_v18 = vadd.f32 %v11697_v17, %v3832_v44  ;;  %5279 = vrot.lane.b32.xlu0 %v3828_v37, %s10313_s6  ;;  %9370 = vmatprep.subr.mxu1 %v3838_v7 }
 0x44b   : > { %9368 = vmatmul.mubr.msk.f32.vlgmr.msra.gmra.mxu1 %vm485_vm0, %v12900_v32  ;;  %v9347_v30 = vpop.f32.mrf.mxu0 }
 0x44c   : > { %9371 = vmatpush3.msra.mxu1 %v3838_v7  ;;  %5360 = vrot.lane.b32.xlu1 %v3838_v7, %s10313_s6  ;;  %v11717_v15 = vadd.f32 %v9347_v30, %v11697_v17 }
 0x44d   : > { %9372 = vmatprep.subr.mxu1 %v11710_v18  ;;  %v3842_v38 = vpop.f32.mrf.mxu0  ;;  %9374 = vmatprep.mubr.msk.f32.mxu1 %vm485_vm0, %v12901_v34 }
 0x44e   : > { %9373 = vmatpush3.msra.mxu1 %v11710_v18  ;;  %5991 = vrot.lane.b32.xlu0 %v3828_v37, %s10314_s19  ;;  %v11725_v23 = vadd.f32 %v11697_v17, %v3842_v38  ;;  %v12914_v37 = vld [vmem:[#allocation49_spill] sm:$0xff] }
 0x44f   : > { %9377 = vmatprep.subr.mxu1 %v11717_v15  ;;  %v9350_v47 = vpop.f32.mrf.mxu0  ;;  %9375 = vmatmul.mubr.msk.f32.vlgmr.msra.gmra.mxu1 %vm485_vm0, %v12902_v41 }
 0x450   : > { %6072 = vrot.lane.b32.xlu1 %v3838_v7, %s10314_s19  ;;  %v11732_v49 = vadd.f32 %v9350_v47, %v11697_v17  ;;  %9378 = vmatpush3.msra.mxu1 %v11717_v15 }
 0x451   : > { %9379 = vmatprep.subr.mxu1 %v11725_v23  ;;  %v3852_v31 = vpop.f32.mrf.mxu0  ;;  %9381 = vmatprep.mubr.msk.f32.mxu1 %vm485_vm0, %v12903_v43 }
 0x452   : > { %5277 = vrot.lane.b32.xlu0 %v11701_v26, %s10313_s6  ;;  %v11741_v5 = vadd.f32 %v11697_v17, %v3852_v31  ;;  %9380 = vmatpush3.msra.mxu1 %v11725_v23 }
 0x453   : > { %9384 = vmatprep.subr.mxu1 %v11732_v49  ;;  %9382 = vmatmul.mubr.msk.f32.vlgmr.msra.gmra.mxu1 %vm485_vm0, %v12904_v50  ;;  %v9353_v1 = vpop.f32.mrf.mxu0 }
 0x454   : > { %4634 = vrot.lane.b32.xlu1 %v11710_v18, %s10312_s21  ;;  %9385 = vmatpush3.msra.mxu1 %v11732_v49  ;;  %v11751_v40 = vadd.f32 %v9353_v1, %v11697_v17  ;;  %v12919_v1 = vld [vmem:[#allocation54_spill] sm:$0xff] }
 0x455   : > { %9386 = vmatprep.subr.mxu1 %v11741_v5  ;;  %v3862_v48 = vpop.f32.mrf.mxu0  ;;  %9388 = vmatprep.mubr.msk.f32.mxu1 %vm485_vm0, %v12905_v14 }
 0x456   : > { %4636 = vrot.lane.b32.xlu0 %v3838_v7, %s10312_s21  ;;  %9387 = vmatpush3.msra.mxu1 %v11741_v5  ;;  %v11759_v28 = vadd.f32 %v11697_v17, %v3862_v48  ;;  %v12916_v7 = vld [vmem:[#allocation51_spill] sm:$0xff] }
 0x457   : > { %9391 = vmatprep.subr.mxu1 %v11751_v40  ;;  %v9356_v10 = vpop.f32.mrf.mxu0  ;;  %9389 = vmatmul.mubr.msk.f32.vlgmr.msra.gmra.mxu1 %vm485_vm0, %v12906_v63 }
 0x458   : > { %5358 = vrot.lane.b32.xlu1 %v11710_v18, %s10313_s6  ;;  %v11767_v46 = vadd.f32 %v9356_v10, %v11697_v17  ;;  %9392 = vmatpush3.msra.mxu1 %v11751_v40  ;;  %v12920_v10 = vld [vmem:[#allocation55_spill] sm:$0xff] }
 0x459   : > { %9393 = vmatprep.subr.mxu1 %v11759_v28  ;;  %v3872_v42 = vpop.f32.mrf.mxu0  ;;  %9395 = vmatprep.mubr.msk.f32.mxu1 %vm485_vm0, %v12907_v21 }
 0x45a   : > { %4719 = vrot.lane.b32.xlu0 %v11717_v15, %s10312_s21  ;;  %v3873_v29 = vadd.f32 %v11697_v17, %v3872_v42  ;;  %9394 = vmatpush3.msra.mxu1 %v11759_v28  ;;  %v12922_v42 = vld [vmem:[#allocation57_spill] sm:$0xff] }
 0x45b   : > { %9398 = vmatprep.subr.mxu1 %v11767_v46  ;;  %9396 = vmatmul.mubr.msk.f32.vlgmr.msra.gmra.mxu1 %vm485_vm0, %v12908_v0  ;;  %v9359_v53 = vpop.f32.mrf.mxu0 }
 0x45c   : > { %4802 = vrot.lane.b32.xlu1 %v11732_v49, %s10312_s21  ;;  %9399 = vmatpush3.msra.mxu1 %v11767_v46  ;;  %v3888_v19 = vadd.f32 %v9359_v53, %v11697_v17 }
 0x45d   : > { %9400 = vmatprep.subr.mxu1 %v3873_v29  ;;  %v3882_v62 = vpop.f32.mrf.mxu0  ;;  %9402 = vmatprep.mubr.msk.f32.mxu1 %vm485_vm0, %v12909_v27 }
 0x45e   : > { %5441 = vrot.lane.b32.xlu0 %v11717_v15, %s10313_s6  ;;  %9401 = vmatpush3.msra.mxu1 %v3873_v29  ;;  %v3883_v58 = vadd.f32 %v11697_v17, %v3882_v62 }
 0x45f   : > { %9405 = vmatprep.subr.mxu1 %v3888_v19  ;;  %v9362_v8 = vpop.f32.mrf.mxu0  ;;  %9403 = vmatmul.mubr.msk.f32.vlgmr.msra.gmra.mxu1 %vm485_vm0, %v12910_v35 }
 0x460   : > { %5522 = vrot.lane.b32.xlu1 %v11732_v49, %s10313_s6  ;;  %v3898_v3 = vadd.f32 %v9362_v8, %v11697_v17  ;;  %9406 = vmatpush3.msra.mxu1 %v3888_v19  ;;  %v12924_v8 = vld [vmem:[#allocation59_spill] sm:$0xff] }
 0x461   : > { %9407 = vmatprep.subr.mxu1 %v3883_v58  ;;  %v3892_v54 = vpop.f32.mrf.mxu0  ;;  %9409 = vmatprep.mubr.msk.f32.mxu1 %vm485_vm0, %v12911_v4 }
 0x462   : > { %4717 = vrot.lane.b32.xlu0 %v11725_v23, %s10312_s21  ;;  %v3893_v25 = vadd.f32 %v11697_v17, %v3892_v54  ;;  %9408 = vmatpush3.msra.mxu1 %v3883_v58  ;;  %v12915_v17 = vld [vmem:[#allocation36_spill] sm:$0xff]  ;;  %v12926_v54 = vld [vmem:[#allocation61_spill] sm:$0xff] }
 0x463   : > { %9412 = vmatprep.subr.mxu1 %v3898_v3  ;;  %9410 = vmatmul.mubr.msk.f32.vlgmr.msra.gmra.mxu1 %vm485_vm0, %v12912_v55 }
 0x464   : > { %4800 = vrot.lane.b32.xlu1 %v11741_v5, %s10312_s21  ;;  %9413 = vmatpush3.msra.mxu1 %v3898_v3 }
 0x465   : > { %9414 = vmatprep.subr.mxu1 %v3893_v25  ;;  %9416 = vmatprep.mubr.msk.f32.mxu1 %vm485_vm0, %v12913_v39 }
 0x466   : > { %5439 = vrot.lane.b32.xlu0 %v11725_v23, %s10313_s6  ;;  %9415 = vmatpush3.msra.mxu1 %v3893_v25 }
 0x467   : > { %9417 = vmatmul.mubr.msk.f32.vlgmr.msra.gmra.mxu1 %vm485_vm0, %v12914_v37 }
 0x468   : > { %5520 = vrot.lane.b32.xlu1 %v11741_v5, %s10313_s6  ;;  %9423 = vmatprep.mubr.msk.f32.mxu1 %vm485_vm0, %v12915_v17 }
 0x46a   : > { %4885 = vrot.lane.b32.xlu0 %v11751_v40, %s10312_s21 }
 0x46c   : > { %4968 = vrot.lane.b32.xlu1 %v11767_v46, %s10312_s21 }
 0x46e   : > { %5603 = vrot.lane.b32.xlu0 %v11751_v40, %s10313_s6 }
 0x470   : > { %5684 = vrot.lane.b32.xlu1 %v11767_v46, %s10313_s6 }
 0x472   : > { %4883 = vrot.lane.b32.xlu0 %v11759_v28, %s10312_s21 }
 0x474   : > { %4966 = vrot.lane.b32.xlu1 %v3873_v29, %s10312_s21 }
 0x476   : > { %5601 = vrot.lane.b32.xlu0 %v11759_v28, %s10313_s6 }
 0x478   : > { %5682 = vrot.lane.b32.xlu1 %v3873_v29, %s10313_s6 }
 0x47a   : > { %5051 = vrot.lane.b32.xlu0 %v3888_v19, %s10312_s21 }
 0x47c   : > { %5134 = vrot.lane.b32.xlu1 %v3898_v3, %s10312_s21 }
 0x47e   : > { %5765 = vrot.lane.b32.xlu0 %v3888_v19, %s10313_s6 }
 0x480   : > { %5846 = vrot.lane.b32.xlu1 %v3898_v3, %s10313_s6 }
 0x482   : > { %5049 = vrot.lane.b32.xlu0 %v3883_v58, %s10312_s21 }
 0x484   : > { %5132 = vrot.lane.b32.xlu1 %v3893_v25, %s10312_s21 }
 0x486   : > { %5989 = vrot.lane.b32.xlu0 %v11701_v26, %s10314_s19 }
 0x488   : > { %6070 = vrot.lane.b32.xlu1 %v11710_v18, %s10314_s19  ;;  %v12917_v18 = vld [vmem:[#allocation52_spill] sm:$0xff] }
 0x48a   : > { %5763 = vrot.lane.b32.xlu0 %v3883_v58, %s10313_s6 }
 0x48c   : > { %6234 = vrot.lane.b32.xlu1 %v11732_v49, %s10314_s19 }
 0x48e   : > { %6153 = vrot.lane.b32.xlu0 %v11717_v15, %s10314_s19 }
 0x490   : > { %6232 = vrot.lane.b32.xlu1 %v11741_v5, %s10314_s19  ;;  %v12918_v5 = vld [vmem:[#allocation53_spill] sm:$0xff] }
 0x492   : > { %6151 = vrot.lane.b32.xlu0 %v11725_v23, %s10314_s19 }
 0x494   : > { %5844 = vrot.lane.b32.xlu1 %v3893_v25, %s10313_s6 }
 0x496   : > { %6315 = vrot.lane.b32.xlu0 %v11751_v40, %s10314_s19 }
 0x498   : > { %6396 = vrot.lane.b32.xlu1 %v11767_v46, %s10314_s19  ;;  %v12921_v46 = vld [vmem:[#allocation56_spill] sm:$0xff] }
 0x49a   : > { %6313 = vrot.lane.b32.xlu0 %v11759_v28, %s10314_s19 }
 0x49c   : > { %6394 = vrot.lane.b32.xlu1 %v3873_v29, %s10314_s19  ;;  %v12923_v29 = vld [vmem:[#allocation58_spill] sm:$0xff] }
 0x49e   : > { %6477 = vrot.lane.b32.xlu0 %v3888_v19, %s10314_s19 }
 0x4a0   : > { %6558 = vrot.lane.b32.xlu1 %v3898_v3, %s10314_s19  ;;  %v12925_v3 = vld [vmem:[#allocation60_spill] sm:$0xff] }
 0x4a2   : > { %6475 = vrot.lane.b32.xlu0 %v3883_v58, %s10314_s19 }
 0x4a4   : > { %6556 = vrot.lane.b32.xlu1 %v3893_v25, %s10314_s19  ;;  %v12927_v25 = vld [vmem:[#allocation62_spill] sm:$0xff] }
 0x4b8   : > { %v4554_v2 = vpop.permute.xlu0 %4553 }
 0x4b9   : > { %9419 = vmatprep.subr.mxu1 %v4554_v2 }
 0x4ba   : > { %v4552_v26 = vpop.permute.xlu1 %4551  ;;  %9420 = vmatpush3.msra.mxu1 %v4554_v2 }
 0x4bb   : > { %9421 = vmatprep.subr.mxu1 %v4552_v26 }
 0x4bc   : > { %v11858_v11 = vpop.permute.xlu0 %5279  ;;  %9422 = vmatpush3.msra.mxu1 %v4552_v26 }
 0x4bd   : > { %9424 = vmatmul.mubr.msk.f32.vlgmr.msra.gmra.mxu1 %vm485_vm0, %v12916_v7  ;;  %v12928_v7 = vld [vmem:[#allocation63_spill] sm:$0xff] }
 0x4be   : > { %v11862_v44 = vpop.permute.xlu1 %5360  ;;  %9437 = vmatprep.mubr.msk.f32.mxu1 %vm485_vm0, %v12917_v18 }
 0x4c0   : > { %v11866_v30 = vpop.permute.xlu0 %5991 }
 0x4c2   : > { %v11868_v15 = vpop.permute.xlu1 %6072 }
 0x4c4   : > { %v11870_v38 = vpop.permute.xlu0 %5277 }
 0x4c6   : > { %v4635_v23 = vpop.permute.xlu1 %4634 }
 0x4c8   : > { %v4637_v47 = vpop.permute.xlu0 %4636 }
 0x4c9   : > { %9426 = vmatprep.subr.mxu0 %v4637_v47 }
 0x4ca   : > { %9427 = vmatpush3.msra.mxu0 %v4637_v47  ;;  %v11872_v49 = vpop.permute.xlu1 %5358 }
 0x4cb   : > { %9428 = vmatprep.subr.mxu0 %v4635_v23 }
 0x4cc   : > { %9429 = vmatpush3.msra.mxu0 %v4635_v23  ;;  %v4720_v31 = vpop.permute.xlu0 %4719  ;;  %v12929_v23 = vld [vmem:[#allocation66_spill] sm:$0xff] }
 0x4cd   : > { %9433 = vmatprep.subr.mxu1 %v4720_v31  ;;  %9431 = vmatmul.mubr.msk.f32.vlgmr.msra.gmra.mxu0 %vm485_vm0, %v12918_v5  ;;  %v12931_v5 = vld [vmem:[#allocation65_spill] sm:$0xff] }
 0x4ce   : > { %v4803_v50 = vpop.permute.xlu1 %4802  ;;  %9434 = vmatpush3.msra.mxu1 %v4720_v31  ;;  %9444 = vmatprep.mubr.msk.f32.mxu0 %vm485_vm0, %v12919_v1  ;;  %v12930_v31 = vld [vmem:[#allocation64_spill] sm:$0xff] }
 0x4cf   : > { %9440 = vmatprep.subr.mxu0 %v4803_v50  ;;  %v12934_v1 = vld [vmem:[#allocation68_spill] sm:$0xff] }
 0x4d0   : > { %v11878_v40 = vpop.permute.xlu0 %5441  ;;  %9441 = vmatpush3.msra.mxu0 %v4803_v50  ;;  %v12932_v50 = vld [vmem:[#allocation67_spill] sm:$0xff] }
 0x4d2   : > { %v11880_v48 = vpop.permute.xlu1 %5522 }
 0x4d4   : > { %v4718_v14 = vpop.permute.xlu0 %4717 }
 0x4d5   : > { %9435 = vmatprep.subr.mxu1 %v4718_v14 }
 0x4d6   : > { %v4801_v28 = vpop.permute.xlu1 %4800  ;;  %9436 = vmatpush3.msra.mxu1 %v4718_v14  ;;  %v12936_v14 = vld [vmem:[#allocation71_spill] sm:$0xff] }
 0x4d7   : > { %9438 = vmatmul.mubr.msk.f32.vlgmr.msra.gmra.mxu1 %vm485_vm0, %v12920_v10  ;;  %9442 = vmatprep.subr.mxu0 %v4801_v28  ;;  %v12938_v10 = vld [vmem:[#allocation72_spill] sm:$0xff] }
 0x4d8   : > { %v5440_v63 = vpop.permute.xlu0 %5439  ;;  %9443 = vmatpush3.msra.mxu0 %v4801_v28  ;;  %9451 = vmatprep.mubr.msk.f32.mxu1 %vm485_vm0, %v12921_v46  ;;  %v12937_v28 = vld [vmem:[#allocation73_spill] sm:$0xff] }
 0x4d9   : > { %9445 = vmatmul.mubr.msk.f32.vlgmr.msra.gmra.mxu0 %vm485_vm0, %v12922_v42  ;;  %v12940_v42 = vld [vmem:[#allocation75_spill] sm:$0xff] }
 0x4da   : > { %v11888_v21 = vpop.permute.xlu1 %5520  ;;  %9458 = vmatprep.mubr.msk.f32.mxu0 %vm485_vm0, %v12923_v29 }
 0x4dc   : > { %v4886_v0 = vpop.permute.xlu0 %4885 }
 0x4dd   : > { %9447 = vmatprep.subr.mxu1 %v4886_v0 }
 0x4de   : > { %v4969_v53 = vpop.permute.xlu1 %4968  ;;  %9448 = vmatpush3.msra.mxu1 %v4886_v0  ;;  %v12942_v0 = vld [vmem:[#allocation76_spill] sm:$0xff] }
 0x4df   : > { %9454 = vmatprep.subr.mxu0 %v4969_v53 }
 0x4e0   : > { %v5604_v19 = vpop.permute.xlu0 %5603  ;;  %9455 = vmatpush3.msra.mxu0 %v4969_v53  ;;  %v12943_v53 = vld [vmem:[#allocation78_spill] sm:$0xff] }
 0x4e2   : > { %v5685_v62 = vpop.permute.xlu1 %5684 }
 0x4e4   : > { %v4884_v27 = vpop.permute.xlu0 %4883 }
 0x4e5   : > { %9449 = vmatprep.subr.mxu1 %v4884_v27 }
 0x4e6   : > { %v4967_v58 = vpop.permute.xlu1 %4966  ;;  %9450 = vmatpush3.msra.mxu1 %v4884_v27  ;;  %v12945_v27 = vld [vmem:[#allocation81_spill] sm:$0xff] }
 0x4e7   : > { %9452 = vmatmul.mubr.msk.f32.vlgmr.msra.gmra.mxu1 %vm485_vm0, %v12924_v8  ;;  %9456 = vmatprep.subr.mxu0 %v4967_v58  ;;  %v12946_v8 = vld [vmem:[#allocation80_spill] sm:$0xff] }
 0x4e8   : > { %v5602_v35 = vpop.permute.xlu0 %5601  ;;  %9457 = vmatpush3.msra.mxu0 %v4967_v58  ;;  %9465 = vmatprep.mubr.msk.f32.mxu1 %vm485_vm0, %v12925_v3  ;;  %v12948_v3 = vld [vmem:[#allocation83_spill] sm:$0xff] }
 0x4e9   : > { %9459 = vmatmul.mubr.msk.f32.vlgmr.msra.gmra.mxu0 %vm485_vm0, %v12926_v54  ;;  %v12949_v54 = vld [vmem:[#allocation85_spill] sm:$0xff] }
 0x4ea   : > { %v5683_v4 = vpop.permute.xlu1 %5682  ;;  %9472 = vmatprep.mubr.msk.f32.mxu0 %vm485_vm0, %v12927_v25  ;;  %v12951_v25 = vld [vmem:[#allocation86_spill] sm:$0xff] }
 0x4ec   : > { %v5052_v55 = vpop.permute.xlu0 %5051 }
 0x4ed   : > { %9461 = vmatprep.subr.mxu1 %v5052_v55 }
 0x4ee   : > { %v5135_v39 = vpop.permute.xlu1 %5134  ;;  %9462 = vmatpush3.msra.mxu1 %v5052_v55 }
 0x4ef   : > { %9468 = vmatprep.subr.mxu0 %v5135_v39 }
 0x4f0   : > { %v5766_v37 = vpop.permute.xlu0 %5765  ;;  %9469 = vmatpush3.msra.mxu0 %v5135_v39  ;;  %v12952_v39 = vld [vmem:[#allocation87_spill] sm:$0xff] }
 0x4f2   : > { %v5847_v17 = vpop.permute.xlu1 %5846 }
 0x4f4   : > { %v5050_v2 = vpop.permute.xlu0 %5049 }
 0x4f5   : > { %9463 = vmatprep.subr.mxu1 %v5050_v2 }
 0x4f6   : > { %v5133_v26 = vpop.permute.xlu1 %5132  ;;  %9464 = vmatpush3.msra.mxu1 %v5050_v2  ;;  %v12954_v2 = vld [vmem:[#allocation88_spill] sm:$0xff] }
 0x4f7   : > { %9466 = vmatmul.mubr.msk.f32.vlgmr.msra.gmra.mxu1 %vm485_vm0, %v12928_v7  ;;  %9470 = vmatprep.subr.mxu0 %v5133_v26 }
 0x4f8   : > { %9475 = vmatprep.subr.mxu1 %v11858_v11  ;;  %v11903_v18 = vpop.permute.xlu0 %5989  ;;  %9471 = vmatpush3.msra.mxu0 %v5133_v26  ;;  %v12955_v26 = vld [vmem:[#allocation90_spill] sm:$0xff] }
 0x4f9   : > { %9476 = vmatpush3.msra.mxu1 %v11858_v11  ;;  %9473 = vmatmul.mubr.msk.f32.vlgmr.msra.gmra.mxu0 %vm485_vm0, %v12929_v23  ;;  %v12957_v23 = vld [vmem:[#allocation93_spill] sm:$0xff] }
 0x4fa   : > { %9477 = vmatprep.subr.mxu1 %v11870_v38  ;;  %9482 = vmatprep.subr.mxu0 %v11862_v44  ;;  %v11910_v47 = vpop.permute.xlu1 %6070 }
 0x4fb   : > { %9483 = vmatpush3.msra.mxu0 %v11862_v44  ;;  %9478 = vmatpush3.msra.mxu1 %v11870_v38  ;;  %v12933_v44 = vld [vmem:[#allocation69_spill] sm:$0xff] }
 0x4fc   : > { %9479 = vmatprep.mubr.msk.f32.mxu1 %vm485_vm0, %v12930_v31  ;;  %9484 = vmatprep.subr.mxu0 %v11872_v49  ;;  %v5764_v11 = vpop.permute.xlu0 %5763  ;;  %v12958_v31 = vld [vmem:[#allocation92_spill] sm:$0xff] }
 0x4fd   : > { %9480 = vmatmul.mubr.msk.f32.vlgmr.msra.gmra.mxu1 %vm485_vm0, %v12931_v5  ;;  %9489 = vmatprep.subr.mxu1 %v11878_v40  ;;  %v12959_v5 = vld [vmem:[#allocation94_spill] sm:$0xff] }
 0x4fe   : > { %9485 = vmatpush3.msra.mxu0 %v11872_v49  ;;  %9486 = vmatprep.mubr.msk.f32.mxu0 %vm485_vm0, %v12932_v50  ;;  %v6235_v38 = vpop.permute.xlu1 %6234  ;;  %v12935_v49 = vld [vmem:[#allocation70_spill] sm:$0xff]  ;;  %v12961_v50 = vld [vmem:[#allocation96_spill] sm:$0xff] }
 0x4ff   : > { %9490 = vmatpush3.msra.mxu1 %v11878_v40  ;;  %9487 = vmatmul.mubr.msk.f32.vlgmr.msra.gmra.mxu0 %vm485_vm0, %v12933_v44 }
 0x500   : > { %9491 = vmatprep.subr.mxu1 %v5440_v63  ;;  %9496 = vmatprep.subr.mxu0 %v11880_v48  ;;  %v6154_v40 = vpop.permute.xlu0 %6153 }
 0x501   : > { %9497 = vmatpush3.msra.mxu0 %v11880_v48  ;;  %9492 = vmatpush3.msra.mxu1 %v5440_v63  ;;  %v12939_v63 = vld [vmem:[#allocation74_spill] sm:$0xff] }
 0x502   : > { %9493 = vmatprep.mubr.msk.f32.mxu1 %vm485_vm0, %v12934_v1  ;;  %9498 = vmatprep.subr.mxu0 %v11888_v21  ;;  %v6233_v48 = vpop.permute.xlu1 %6232 }
 0x503   : > { %9494 = vmatmul.mubr.msk.f32.vlgmr.msra.gmra.mxu1 %vm485_vm0, %v12935_v49  ;;  %9503 = vmatprep.subr.mxu1 %v5604_v19 }
 0x504   : > { %9499 = vmatpush3.msra.mxu0 %v11888_v21  ;;  %9500 = vmatprep.mubr.msk.f32.mxu0 %vm485_vm0, %v12936_v14  ;;  %v6152_v46 = vpop.permute.xlu0 %6151  ;;  %v12941_v21 = vld [vmem:[#allocation77_spill] sm:$0xff] }
 0x505   : > { %9504 = vmatpush3.msra.mxu1 %v5604_v19  ;;  %9501 = vmatmul.mubr.msk.f32.vlgmr.msra.gmra.mxu0 %vm485_vm0, %v12937_v28 }
 0x506   : > { %9505 = vmatprep.subr.mxu1 %v5602_v35  ;;  %9510 = vmatprep.subr.mxu0 %v5685_v62  ;;  %v5845_v29 = vpop.permute.xlu1 %5844 }
 0x507   : > { %9511 = vmatpush3.msra.mxu0 %v5685_v62  ;;  %9506 = vmatpush3.msra.mxu1 %v5602_v35  ;;  %v12944_v62 = vld [vmem:[#allocation79_spill] sm:$0xff]  ;;  %v12947_v35 = vld [vmem:[#allocation82_spill] sm:$0xff] }
 0x508   : > { %9507 = vmatprep.mubr.msk.f32.mxu1 %vm485_vm0, %v12938_v10  ;;  %9512 = vmatprep.subr.mxu0 %v5683_v4  ;;  %v6316_v19 = vpop.permute.xlu0 %6315 }
 0x509   : > { %9508 = vmatmul.mubr.msk.f32.vlgmr.msra.gmra.mxu1 %vm485_vm0, %v12939_v63  ;;  %9517 = vmatprep.subr.mxu1 %v5766_v37 }
 0x50a   : > { %9513 = vmatpush3.msra.mxu0 %v5683_v4  ;;  %9514 = vmatprep.mubr.msk.f32.mxu0 %vm485_vm0, %v12940_v42  ;;  %v6397_v58 = vpop.permute.xlu1 %6396  ;;  %v12950_v4 = vld [vmem:[#allocation84_spill] sm:$0xff] }
 0x50b   : > { %9518 = vmatpush3.msra.mxu1 %v5766_v37  ;;  %9515 = vmatmul.mubr.msk.f32.vlgmr.msra.gmra.mxu0 %vm485_vm0, %v12941_v21  ;;  %v12953_v37 = vld [vmem:[#allocation89_spill] sm:$0xff]  ;;  %v9369_v44 = vpop.f32.mrf.mxu1 }
 0x50c   : > { %9519 = vmatprep.subr.mxu1 %v5764_v11  ;;  %9524 = vmatprep.subr.mxu0 %v5847_v17  ;;  %vm4502_vm6 = vcmp.gt.f32.partialorder %v9369_v44, 0.0 }
 0x50d   : > { %9525 = vmatpush3.msra.mxu0 %v5847_v17  ;;  %9520 = vmatpush3.msra.mxu1 %v5764_v11  ;;  %v12960_v11 = vld [vmem:[#allocation95_spill] sm:$0xff] }
 0x50e   : > { %9521 = vmatprep.mubr.msk.f32.mxu1 %vm485_vm0, %v12942_v0  ;;  %9526 = vmatprep.subr.mxu0 %v5845_v29 }
 0x50f   : > { %9522 = vmatmul.mubr.msk.f32.vlgmr.msra.gmra.mxu1 %vm485_vm0, %v12943_v53  ;;  %9531 = vmatprep.subr.mxu1 %v11866_v30 }
 0x510   : > { %9527 = vmatpush3.msra.mxu0 %v5845_v29  ;;  %9528 = vmatprep.mubr.msk.f32.mxu0 %vm485_vm0, %v12944_v62 }
 0x511   : > { %9532 = vmatpush3.msra.mxu1 %v11866_v30  ;;  %9529 = vmatmul.mubr.msk.f32.vlgmr.msra.gmra.mxu0 %vm485_vm0, %v12945_v27  ;;  %v6314_v30 = vpop.permute.xlu0 %6313 }
 0x512   : > { %9533 = vmatprep.subr.mxu1 %v11903_v18  ;;  %9538 = vmatprep.subr.mxu0 %v11868_v15 }
 0x513   : > { %9539 = vmatpush3.msra.mxu0 %v11868_v15  ;;  %9534 = vmatpush3.msra.mxu1 %v11903_v18  ;;  %v6395_v15 = vpop.permute.xlu1 %6394  ;;  %v12956_v18 = vld [vmem:[#allocation91_spill] sm:$0xff] }
 0x514   : > { %9535 = vmatprep.mubr.msk.f32.mxu1 %vm485_vm0, %v12946_v8  ;;  %9540 = vmatprep.subr.mxu0 %v11910_v47 }
 0x515   : > { %9536 = vmatmul.mubr.msk.f32.vlgmr.msra.gmra.mxu1 %vm485_vm0, %v12947_v35  ;;  %9545 = vmatprep.subr.mxu1 %v6154_v40  ;;  %v6478_v55 = vpop.permute.xlu0 %6477 }
 0x516   : > { %9541 = vmatpush3.msra.mxu0 %v11910_v47  ;;  %9542 = vmatprep.mubr.msk.f32.mxu0 %vm485_vm0, %v12948_v3 }
 0x517   : > { %9546 = vmatpush3.msra.mxu1 %v6154_v40  ;;  %9543 = vmatmul.mubr.msk.f32.vlgmr.msra.gmra.mxu0 %vm485_vm0, %v12949_v54  ;;  %v6559_v17 = vpop.permute.xlu1 %6558 }
 0x518   : > { %9547 = vmatprep.subr.mxu1 %v6152_v46  ;;  %9552 = vmatprep.subr.mxu0 %v6235_v38 }
 0x519   : > { %9553 = vmatpush3.msra.mxu0 %v6235_v38  ;;  %9548 = vmatpush3.msra.mxu1 %v6152_v46  ;;  %v6476_v7 = vpop.permute.xlu0 %6475  ;;  %v3967_v38 = vpop.f32.mrf.mxu1 }
 0x51a   : > { %9549 = vmatprep.mubr.msk.f32.mxu1 %vm485_vm0, %v12950_v4  ;;  %9554 = vmatprep.subr.mxu0 %v6233_v48  ;;  %vm4501_vm7 = vcmp.gt.f32.partialorder %v3967_v38, 0.0  ;;  %v4517_v54 = vmul.f32 0.01, %v3967_v38 }
 0x51b   : > { %9550 = vmatmul.mubr.msk.f32.vlgmr.msra.gmra.mxu1 %vm485_vm0, %v12951_v25  ;;  %9559 = vmatprep.subr.mxu1 %v6316_v19  ;;  %v6557_v47 = vpop.permute.xlu1 %6556  ;;  %v9376_v1 = vpop.f32.mrf.mxu1 }
 0x51c   : > { %9555 = vmatpush3.msra.mxu0 %v6233_v48  ;;  %9556 = vmatprep.mubr.msk.f32.mxu0 %vm485_vm0, %v12952_v39  ;;  %vm4504_vm8 = vcmp.gt.f32.partialorder %v9376_v1, 0.0 }
 0x51d   : > { %9560 = vmatpush3.msra.mxu1 %v6316_v19  ;;  %9557 = vmatmul.mubr.msk.f32.vlgmr.msra.gmra.mxu0 %vm485_vm0, %v12953_v37  ;;  %v4042_v49 = vpop.f32.mrf.mxu1 }
 0x51e   : > { %9561 = vmatprep.subr.mxu1 %v6314_v30  ;;  %9566 = vmatprep.subr.mxu0 %v6397_v58  ;;  %vm4503_vm9 = vcmp.gt.f32.partialorder %v4042_v49, 0.0  ;;  %v4519_v4 = vmul.f32 0.01, %v4042_v49 }
 0x51f   : > { %9567 = vmatpush3.msra.mxu0 %v6397_v58  ;;  %9562 = vmatpush3.msra.mxu1 %v6314_v30  ;;  %v9383_v40 = vpop.f32.mrf.mxu1  ;;  %v4518_v30 = vmul.f32 0.01, %v9369_v44 }
 0x520   : > { %9563 = vmatprep.mubr.msk.f32.mxu1 %vm485_vm0, %v12954_v2  ;;  %9568 = vmatprep.subr.mxu0 %v6395_v15  ;;  %vm4506_vm10 = vcmp.gt.f32.partialorder %v9383_v40, 0.0  ;;  %v4522_v25 = vmul.f32 0.01, %v9383_v40 }
 0x521   : > { %9564 = vmatmul.mubr.msk.f32.vlgmr.msra.gmra.mxu1 %vm485_vm0, %v12955_v26  ;;  %9573 = vmatprep.subr.mxu1 %v6478_v55  ;;  %v4117_v14 = vpop.f32.mrf.mxu1 }
 0x522   : > { %9569 = vmatpush3.msra.mxu0 %v6395_v15  ;;  %9570 = vmatprep.mubr.msk.f32.mxu0 %vm485_vm0, %v12956_v18  ;;  %v4520_v15 = vmul.f32 0.01, %v9376_v1  ;;  %vm4505_vm11 = vcmp.gt.f32.partialorder %v4117_v14, 0.0  ;;  %v4521_v37 = vmul.f32 0.01, %v4117_v14  ;;  %v12039_v12 = vsel %vm4506_vm10, %v9383_v40, %v4522_v25 }
 0x523   : > { %9574 = vmatpush3.msra.mxu1 %v6478_v55  ;;  %9571 = vmatmul.mubr.msk.f32.vlgmr.msra.gmra.mxu0 %vm485_vm0, %v12957_v23  ;;  %v9390_v28 = vpop.f32.mrf.mxu1 }
 0x524   : > { %9575 = vmatprep.subr.mxu1 %v6476_v7  ;;  %9580 = vmatprep.subr.mxu0 %v6559_v17  ;;  %vm4508_vm12 = vcmp.gt.f32.partialorder %v9390_v28, 0.0  ;;  %v12042_v20 = vsel %vm4505_vm11, %v4117_v14, %v4521_v37 }
 0x525   : > { %9581 = vmatpush3.msra.mxu0 %v6559_v17  ;;  %9576 = vmatpush3.msra.mxu1 %v6476_v7  ;;  %v4192_v48 = vpop.f32.mrf.mxu1  ;;  %v4524_v17 = vmul.f32 0.01, %v9390_v28 }
 0x526   : > { %9577 = vmatprep.mubr.msk.f32.mxu1 %vm485_vm0, %v12958_v31  ;;  %9582 = vmatprep.subr.mxu0 %v6557_v47  ;;  %v4523_v2 = vmul.f32 0.01, %v4192_v48  ;;  %vm4507_vm13 = vcmp.gt.f32.partialorder %v4192_v48, 0.0  ;;  %v12028_v31 = vsel %vm4501_vm7, %v3967_v38, %v4517_v54 }
 0x527   : > { %9578 = vmatmul.mubr.msk.f32.vlgmr.msra.gmra.mxu1 %vm485_vm0, %v12959_v5  ;;  %9583 = vmatpush3.msra.mxu0 %v6557_v47  ;;  %v9397_v10 = vpop.f32.mrf.mxu1  ;;  %v12025_v47 = vsel %vm4502_vm6, %v9369_v44, %v4518_v30  ;;  %v12031_v5 = vsel %vm4504_vm8, %v9376_v1, %v4520_v15  ;;  %v12045_v44 = vsel %vm4508_vm12, %v9390_v28, %v4524_v17 }
 0x528   : > { %9584 = vmatprep.mubr.msk.f32.mxu0 %vm485_vm0, %v12960_v11  ;;  %v4526_v26 = vmul.f32 0.01, %v9397_v10  ;;  %vm4510_vm14 = vcmp.gt.f32.partialorder %v9397_v10, 0.0  ;;  %v12047_v38 = vsel %vm4507_vm13, %v4192_v48, %v4523_v2 }
 0x529   : > { %9585 = vmatmul.mubr.msk.f32.vlgmr.msra.gmra.mxu0 %vm485_vm0, %v12961_v50  ;;  %v4267_v63 = vpop.f32.mrf.mxu1  ;;  %v12036_v50 = vsel %vm4503_vm9, %v4042_v49, %v4519_v4 }
 0x52a   : > { %v4525_v7 = vmul.f32 0.01, %v4267_v63  ;;  %vm4509_vm15 = vcmp.gt.f32.partialorder %v4267_v63, 0.0  ;;  %v12049_v30 = vsel %vm4510_vm14, %v9397_v10, %v4526_v26 }
 0x52b   : > { %v9404_v46 = vpop.f32.mrf.mxu1 }
 0x52c   : > { %v4528_v23 = vmul.f32 0.01, %v9404_v46  ;;  %vm4512_vm1 = vcmp.gt.f32.partialorder %v9404_v46, 0.0  ;;  %v12051_v1 = vsel %vm4509_vm15, %v4267_v63, %v4525_v7 }
 0x52d   : > { %v11994_v42 = vpop.f32.mrf.mxu1 }
 0x52e   : > { %vm4511_vm2 = vcmp.gt.f32.partialorder %v11994_v42, 0.0  ;;  %v12058_v40 = vsel %vm4512_vm1, %v9404_v46, %v4528_v23  ;;  %v4527_v14 = vmul.f32 0.01, %v11994_v42 }
 0x52f   : > { %v11996_v21 = vpop.f32.mrf.mxu1 }
 0x530   : > { %v4530_v48 = vmul.f32 0.01, %v11996_v21  ;;  %vm4514_vm6 = vcmp.gt.f32.partialorder %v11996_v21, 0.0  ;;  %v12092_v32 = vsel %vm4511_vm2, %v11994_v42, %v4527_v14 }
 0x531   : > { %v11998_v29 = vpop.f32.mrf.mxu1 }
 0x532   : > { %v4529_v46 = vmul.f32 0.01, %v11998_v29  ;;  %vm4513_vm8 = vcmp.gt.f32.partialorder %v11998_v29, 0.0 }
 0x533   : > { %v12000_v0 = vpop.f32.mrf.mxu1 }
 0x534   : > { %v4532_v25 = vmul.f32 0.01, %v12000_v0  ;;  %vm4516_vm9 = vcmp.gt.f32.partialorder %v12000_v0, 0.0 }
 0x535   : > { %v12002_v53 = vpop.f32.mrf.mxu1 }
 0x536   : > { %vm4515_vm10 = vcmp.gt.f32.partialorder %v12002_v53, 0.0  ;;  %v4531_v37 = vmul.f32 0.01, %v12002_v53  ;;  %v12110_v42 = vsel %vm4516_vm9, %v12000_v0, %v4532_v25 }
 0x538   : > { %v12116_v14 = vsel %vm4515_vm10, %v12002_v53, %v4531_v37 }
 0x539   : > { %12962 = vst [vmem:[#allocation105_spill] sm:$0xff] %v12116_v14 }
 0x57d   : > { %v12004_v19 = vpop.f32.mrf.mxu1 }
 0x57e   : > { %v5230_v15 = vmul.f32 0.01, %v12004_v19  ;;  %vm5214_vm3 = vcmp.gt.f32.partialorder %v12004_v19, 0.0 }
 0x57f   : > { %v12008_v27 = vpop.f32.mrf.mxu1 }
 0x580   : > { %v5229_v28 = vmul.f32 0.01, %v12008_v27  ;;  %vm5213_vm4 = vcmp.gt.f32.partialorder %v12008_v27, 0.0  ;;  %v12082_v2 = vsel %vm5214_vm3, %v12004_v19, %v5230_v15  ;;  %v12107_v15 = vsel %vm4513_vm8, %v11998_v29, %v4529_v46 }
 0x582   : > { %v12085_v26 = vsel %vm5213_vm4, %v12008_v27, %v5229_v28  ;;  %v12104_v27 = vsel %vm4514_vm6, %v11996_v21, %v4530_v48 }
 0x58d   : > { %v12006_v62 = vpop.f32.mrf.mxu0 }
 0x58e   : > { %v5232_v10 = vmul.f32 0.01, %v12006_v62  ;;  %vm5216_vm7 = vcmp.gt.f32.partialorder %v12006_v62, 0.0 }
 0x58f   : > { %v12010_v58 = vpop.f32.mrf.mxu0 }
 0x590   : > { %v5231_v7 = vmul.f32 0.01, %v12010_v58  ;;  %v12095_v34 = vsel %vm5216_vm7, %v12006_v62, %v5232_v10  ;;  %vm5215_vm11 = vcmp.gt.f32.partialorder %v12010_v58, 0.0 }
 0x592   : > { %v12130_v10 = vsel %vm5215_vm11, %v12010_v58, %v5231_v7 }
 0x597   : > { %v12012_v8 = vpop.f32.mrf.mxu1 }
 0x598   : > { %v5234_v23 = vmul.f32 0.01, %v12012_v8  ;;  %vm5218_vm12 = vcmp.gt.f32.partialorder %v12012_v8, 0.0 }
 0x599   : > { %v12014_v35 = vpop.f32.mrf.mxu0  ;;  %v12016_v3 = vpop.f32.mrf.mxu1 }
 0x59a   : > { %v5233_v62 = vmul.f32 0.01, %v12016_v3  ;;  %vm5217_vm13 = vcmp.gt.f32.partialorder %v12016_v3, 0.0  ;;  %v12133_v53 = vsel %vm5218_vm12, %v12012_v8, %v5234_v23  ;;  %vm5220_vm14 = vcmp.gt.f32.partialorder %v12014_v35, 0.0 }
 0x59b   : > { %v12018_v55 = vpop.f32.mrf.mxu0  ;;  %v5236_v46 = vmul.f32 0.01, %v12014_v35 }
 0x59c   : > { %vm5219_vm15 = vcmp.gt.f32.partialorder %v12018_v55, 0.0  ;;  %v5235_v25 = vmul.f32 0.01, %v12018_v55  ;;  %v12143_v0 = vsel %vm5217_vm13, %v12016_v3, %v5233_v62 }
 0x59d   : > { %v12166_v9 = vsel %vm5220_vm14, %v12014_v35, %v5236_v46 }
 0x59e   : > { %v12172_v13 = vsel %vm5219_vm15, %v12018_v55, %v5235_v25 }
 0x5a7   : > { %v12020_v39 = vpop.f32.mrf.mxu1 }
 0x5a8   : > { %vm5222_vm1 = vcmp.gt.f32.partialorder %v12020_v39, 0.0  ;;  %v5238_v58 = vmul.f32 0.01, %v12020_v39 }
 0x5a9   : > { %v12022_v18 = vpop.f32.mrf.mxu0  ;;  %v12033_v11 = vpop.f32.mrf.mxu1 }
 0x5aa   : > { %v5237_v8 = vmul.f32 0.01, %v12033_v11  ;;  %v5240_v7 = vmul.f32 0.01, %v12022_v18  ;;  %vm5221_vm2 = vcmp.gt.f32.partialorder %v12033_v11, 0.0  ;;  %vm5224_vm3 = vcmp.gt.f32.partialorder %v12022_v18, 0.0 }
 0x5ab   : > { %v12054_v54 = vpop.f32.mrf.mxu0  ;;  %v12177_v41 = vsel %vm5222_vm1, %v12020_v39, %v5238_v58 }
 0x5ac   : > { %v5239_v23 = vmul.f32 0.01, %v12054_v54  ;;  %vm5223_vm4 = vcmp.gt.f32.partialorder %v12054_v54, 0.0  ;;  %v12182_v43 = vsel %vm5221_vm2, %v12033_v11, %v5237_v8  ;;  %v12187_v35 = vsel %vm5224_vm3, %v12022_v18, %v5240_v7 }
 0x5ad   : > { %v5268_v11 = vmax.f32 %v12045_v44, %v12166_v9  ;;  %v5267_v18 = vmax.f32 %v12047_v38, %v12172_v13 }
 0x5ae   : > { %v12190_v46 = vsel %vm5223_vm4, %v12054_v54, %v5239_v23 }
 0x5b7   : > { %v12056_v49 = vpop.f32.mrf.mxu1 }
 0x5b8   : > { %v5242_v21 = vmul.f32 0.01, %v12056_v49  ;;  %vm5226_vm6 = vcmp.gt.f32.partialorder %v12056_v49, 0.0 }
 0x5b9   : > { %v12067_v63 = vpop.f32.mrf.mxu1  ;;  %v12069_v4 = vpop.f32.mrf.mxu0 }
 0x5ba   : > { %v5241_v62 = vmul.f32 0.01, %v12067_v63  ;;  %vm5225_vm7 = vcmp.gt.f32.partialorder %v12067_v63, 0.0  ;;  %v12193_v55 = vsel %vm5226_vm6, %v12056_v49, %v5242_v21  ;;  %v5244_v25 = vmul.f32 0.01, %v12069_v4 }
 0x5bb   : > { %v12079_v17 = vpop.f32.mrf.mxu0  ;;  %vm5228_vm8 = vcmp.gt.f32.partialorder %v12069_v4, 0.0 }
 0x5bc   : > { %v5243_v39 = vmul.f32 0.01, %v12079_v17  ;;  %v12200_v8 = vsel %vm5225_vm7, %v12067_v63, %v5241_v62  ;;  %vm5227_vm9 = vcmp.gt.f32.partialorder %v12079_v17, 0.0  ;;  %v12221_v38 = vsel %vm5228_vm8, %v12069_v4, %v5244_v25 }
 0x5bd   : > { %v12099_v19 = vpop.f32.mrf.mxu1  ;;  %12963 = vst [vmem:[#allocation106_spill] sm:$0xff] %v12200_v8 }
 0x5be   : > { %v5942_v21 = vmul.f32 0.01, %v12099_v19  ;;  %vm5926_vm10 = vcmp.gt.f32.partialorder %v12099_v19, 0.0  ;;  %v12224_v23 = vsel %vm5227_vm9, %v12079_v17, %v5243_v39 }
 0x5bf   : > { %v12123_v29 = vpop.f32.mrf.mxu1  ;;  %v12125_v48 = vpop.f32.mrf.mxu0  ;;  %12964 = vst [vmem:[#allocation107_spill] sm:$0xff] %v12224_v23 }
 0x5c0   : > { %vm5925_vm11 = vcmp.gt.f32.partialorder %v12123_v29, 0.0  ;;  %v5941_v44 = vmul.f32 0.01, %v12123_v29  ;;  %vm5928_vm12 = vcmp.gt.f32.partialorder %v12125_v48, 0.0  ;;  %v5944_v63 = vmul.f32 0.01, %v12125_v48 }
 0x5c1   : > { %v12140_v37 = vpop.f32.mrf.mxu0  ;;  %v5958_v13 = vsel %vm5926_vm10, %v12099_v19, %v5942_v21  ;;  %v12965_v21 = vmax.f32 %v12025_v47, %v12082_v2 }
 0x5c2   : > { %vm5927_vm13 = vcmp.gt.f32.partialorder %v12140_v37, 0.0  ;;  %v5943_v4 = vmul.f32 0.01, %v12140_v37  ;;  %v5957_v16 = vsel %vm5925_vm11, %v12123_v29, %v5941_v44  ;;  %v5960_v36 = vsel %vm5928_vm12, %v12125_v48, %v5944_v63 }
 0x5c3   : > { %v12152_v28 = vpop.f32.mrf.mxu1  ;;  %v5974_v57 = vmax.f32 %v12965_v21, %v5958_v13  ;;  %v12966_v48 = vmax.f32 %v12028_v31, %v12085_v26 }
 0x5c4   : > { %v5946_v25 = vmul.f32 0.01, %v12152_v28  ;;  %vm5930_vm14 = vcmp.gt.f32.partialorder %v12152_v28, 0.0  ;;  %v5959_v59 = vsel %vm5927_vm13, %v12140_v37, %v5943_v4  ;;  %v12968_v4 = vmax.f32 %v12036_v50, %v12130_v10 }
 0x5c5   : > { %v5511_v3 = vpop.f32.mrf.mxu1  ;;  %v9502_v24 = vpop.f32.mrf.mxu0  ;;  %v5973_v63 = vmax.f32 %v12966_v48, %v5957_v16  ;;  %v12970_v16 = vmax.f32 %v12042_v20, %v12143_v0  ;;  %v12971_v50 = vmax.f32 %v12049_v30, %v12177_v41 }
 0x5c6   : > { %v5945_v17 = vmul.f32 0.01, %v5511_v3  ;;  %vm5929_vm15 = vcmp.gt.f32.partialorder %v5511_v3, 0.0  ;;  %v5948_v49 = vmul.f32 0.01, %v9502_v24  ;;  %vm5932_vm1 = vcmp.gt.f32.partialorder %v9502_v24, 0.0 }
 0x5c7   : > { %v5592_v58 = vpop.f32.mrf.mxu0  ;;  %v5962_v45 = vsel %vm5930_vm14, %v12152_v28, %v5946_v25  ;;  %v12967_v28 = vmax.f32 %v12031_v5, %v12095_v34 }
 0x5c8   : > { %v5947_v54 = vmul.f32 0.01, %v5592_v58  ;;  %vm5931_vm2 = vcmp.gt.f32.partialorder %v5592_v58, 0.0  ;;  %v5961_v23 = vsel %vm5929_vm15, %v5511_v3, %v5945_v17  ;;  %v5964_v2 = vsel %vm5932_vm1, %v9502_v24, %v5948_v49 }
 0x5c9   : > { %v9509_v7 = vpop.f32.mrf.mxu1  ;;  %v5976_v3 = vmax.f32 %v12967_v28, %v5960_v36  ;;  %v5975_v24 = vmax.f32 %v12968_v4, %v5959_v59  ;;  %v12273_v26 = vmax.f32 %v12970_v16, %v5961_v23  ;;  %v12275_v49 = vmax.f32 %v5268_v11, %v5964_v2 }
 0x5ca   : > { %v5950_v8 = vmul.f32 0.01, %v9509_v7  ;;  %vm5934_vm3 = vcmp.gt.f32.partialorder %v9509_v7, 0.0  ;;  %v5963_v13 = vsel %vm5931_vm2, %v5592_v58, %v5947_v54  ;;  %v12969_v54 = vmax.f32 %v12039_v12, %v12133_v53 }
 0x5cb   : > { %v5673_v62 = vpop.f32.mrf.mxu1  ;;  %v9516_v9 = vpop.f32.mrf.mxu0  ;;  %v12277_v25 = vmax.f32 %v5267_v18, %v5963_v13 }
 0x5cc   : > { %v5949_v29 = vmul.f32 0.01, %v5673_v62  ;;  %v5952_v44 = vmul.f32 0.01, %v9516_v9  ;;  %vm5933_vm4 = vcmp.gt.f32.partialorder %v5673_v62, 0.0  ;;  %vm5936_vm6 = vcmp.gt.f32.partialorder %v9516_v9, 0.0 }
 0x5cd   : > { %v5754_v39 = vpop.f32.mrf.mxu0  ;;  %v5966_v58 = vsel %vm5934_vm3, %v9509_v7, %v5950_v8  ;;  %v5978_v31 = vmax.f32 %v12969_v54, %v5962_v45  ;;  %v12972_v8 = vmax.f32 %v12051_v1, %v12182_v43  ;;  %v12973_v7 = vmax.f32 %v12058_v40, %v12187_v35 }
 0x5ce   : > { %v5951_v21 = vmul.f32 0.01, %v5754_v39  ;;  %vm5935_vm7 = vcmp.gt.f32.partialorder %v5754_v39, 0.0  ;;  %v5965_v36 = vsel %vm5933_vm4, %v5673_v62, %v5949_v29  ;;  %v5968_v5 = vsel %vm5936_vm6, %v9516_v9, %v5952_v44 }
 0x5cf   : > { %v9523_v19 = vpop.f32.mrf.mxu1  ;;  %v12282_v10 = vmax.f32 %v12971_v50, %v5966_v58  ;;  %v12287_v18 = vmax.f32 %v12972_v8, %v5965_v36  ;;  %v12292_v41 = vmax.f32 %v12973_v7, %v5968_v5  ;;  %v12974_v62 = vmax.f32 %v12092_v32, %v12190_v46 }
 0x5d0   : > { %v5967_v12 = vsel %vm5935_vm7, %v5754_v39, %v5951_v21  ;;  %vm5938_vm9 = vcmp.gt.f32.partialorder %v9523_v19, 0.0  ;;  %v5954_v45 = vmul.f32 0.01, %v9523_v19 }
 0x5d1   : > { %v12252_v14 = vpop.f32.mrf.mxu1  ;;  %v12254_v47 = vpop.f32.mrf.mxu0  ;;  %v12297_v17 = vmax.f32 %v12974_v62, %v5967_v12 }
 0x5d2   : > { %v5970_v43 = vsel %vm5938_vm9, %v9523_v19, %v5954_v45  ;;  %vm5937_vm14 = vcmp.gt.f32.partialorder %v12252_v14, 0.0  ;;  %v5953_v32 = vmul.f32 0.01, %v12252_v14  ;;  %vm5940_vm15 = vcmp.gt.f32.partialorder %v12254_v47, 0.0 }
 0x5d3   : > { %v12259_v37 = vpop.f32.mrf.mxu0  ;;  %v5956_v36 = vmul.f32 0.01, %v12254_v47 }
 0x5d5   : > { %v9537_v34 = vpop.f32.mrf.mxu1 }
 0x5d6   : > { %vm6638_vm8 = vcmp.gt.f32.partialorder %v9537_v34, 0.0  ;;  %v6654_v59 = vmul.f32 0.01, %v9537_v34 }
 0x5d7   : > { %v6061_v20 = vpop.f32.mrf.mxu1  ;;  %v9544_v0 = vpop.f32.mrf.mxu0 }
 0x5d8   : > { %v6670_v53 = vsel %vm6638_vm8, %v9537_v34, %v6654_v59  ;;  %vm6637_vm10 = vcmp.gt.f32.partialorder %v6061_v20, 0.0  ;;  %v6653_v11 = vmul.f32 0.01, %v6061_v20  ;;  %vm6640_vm11 = vcmp.gt.f32.partialorder %v9544_v0, 0.0 }
 0x5d9   : > { %v6686_v30 = vmax.f32 %v5974_v57, %v6670_v53  ;;  %v6656_v9 = vmul.f32 0.01, %v9544_v0  ;;  %v6142_v23 = vpop.f32.mrf.mxu0  ;;  %vm5939_vm8 = vcmp.gt.f32.partialorder %v12259_v37, 0.0 }
 0x5da   : > { %v6669_v39 = vsel %vm6637_vm10, %v6061_v20, %v6653_v11  ;;  %vm6639_vm12 = vcmp.gt.f32.partialorder %v6142_v23, 0.0  ;;  %v6655_v2 = vmul.f32 0.01, %v6142_v23 }
 0x5db   : > { %v12301_v60 = vadd.f32 %v10284_v60, %v6686_v30   ;;  %v6685_v13 = vmax.f32 %v5973_v63, %v6669_v39  ;;  %v6672_v40 = vsel %vm6640_vm11, %v9544_v0, %v6656_v9  ;;  %v9551_v35 = vpop.f32.mrf.mxu1  ;;  %v12984_v30 = vld [vmem:[#allocation106_spill] sm:$0xff] }
 0x5dc   : > { %v6688_v29 = vmax.f32 %v5976_v3, %v6672_v40  ;;  %v6671_v57 = vsel %vm6639_vm12, %v6142_v23, %v6655_v2  ;;  %vm6642_vm13 = vcmp.gt.f32.partialorder %v9551_v35, 0.0  ;;  %v6658_v44 = vmul.f32 0.01, %v9551_v35  ;;  %v12986_v23 = vld [vmem:[#allocation103_spill] sm:$0xff] }
 0x5dd   : > { %v12975_v1 = vmov %v12301_v60  ;;  %v12306_v22 = vadd.f32 %v10288_v22, %v6685_v13   ;;  %v6687_v48 = vmax.f32 %v5975_v24, %v6671_v57  ;;  %v6223_v21 = vpop.f32.mrf.mxu1  ;;  %v9558_v19 = vpop.f32.mrf.mxu0  ;;  %v12985_v9 = vmax.f32 %v12107_v15, %v12984_v30  ;;  %v12987_v15 = vld [vmem:[#allocation104_spill] sm:$0xff] }
 0x5de   : > { %v12310_v61 = vadd.f32 %v10276_v61, %v6688_v29   ;;  %v6674_v60 = vsel %vm6642_vm13, %v9551_v35, %v6658_v44  ;;  %vm6641_vm1 = vcmp.gt.f32.partialorder %v6223_v21, 0.0  ;;  %v6657_v28 = vmul.f32 0.01, %v6223_v21 }
 0x5df   : > { %v12976_v46 = vmov %v12306_v22  ;;  %v12313_v6 = vadd.f32 %v10280_v6, %v6687_v48   ;;  %v6690_v4 = vmax.f32 %v5978_v31, %v6674_v60  ;;  %vm6644_vm2 = vcmp.gt.f32.partialorder %v9558_v19, 0.0  ;;  %v6304_v54 = vpop.f32.mrf.mxu0 }
 0x5e0   : > { %v12977_v63 = vmov %v12310_v61  ;;  %v6660_v58 = vmul.f32 0.01, %v9558_v19  ;;  %v12979_v22 = vmax.f32 %v12104_v27, %v12193_v55  ;;  %v6673_v16 = vsel %vm6641_vm1, %v6223_v21, %v6657_v28 }
 0x5e1   : > { %v12978_v3 = vmov %v12313_v6  ;;  %vm6643_vm3 = vcmp.gt.f32.partialorder %v6304_v54, 0.0  ;;  %v6659_v34 = vmul.f32 0.01, %v6304_v54  ;;  %v12320_v52 = vadd.f32 %v10268_v52, %v6690_v4   ;;  %v9565_v6 = vpop.f32.mrf.mxu1 }
 0x5e2   : > { %v5986_v24 = vmax.f32 %v12979_v22, %v5970_v43  ;;  %v6689_v61 = vmax.f32 %v12273_v26, %v6673_v16  ;;  %v6676_v59 = vsel %vm6644_vm2, %v9558_v19, %v6660_v58  ;;  %vm6646_vm4 = vcmp.gt.f32.partialorder %v9565_v6, 0.0  ;;  %v12990_v19 = vld [vmem:[#allocation102_spill] sm:$0xff]  ;;  %v12993_v22 = vld [vmem:[#allocation105_spill] sm:$0xff] }
 0x5e3   : > { %v12980_v5 = vmov %v12320_v52  ;;  %v6692_v31 = vmax.f32 %v12275_v49, %v6676_v59  ;;  %v6675_v50 = vsel %vm6643_vm3, %v6304_v54, %v6659_v34  ;;  %v6662_v12 = vmul.f32 0.01, %v9565_v6  ;;  %v6385_v45 = vpop.f32.mrf.mxu1  ;;  %v9572_v26 = vpop.f32.mrf.mxu0 }
 0x5e4   : > { %v5969_v27 = vsel %vm5937_vm14, %v12252_v14, %v5953_v32  ;;  %v5955_v55 = vmul.f32 0.01, %v12259_v37  ;;  %v12329_v56 = vadd.f32 %v10272_v56, %v6689_v61   ;;  %v6691_v52 = vmax.f32 %v12277_v25, %v6675_v50  ;;  %v12989_v32 = vld [vmem:[#allocation101_spill] sm:$0xff]  ;;  %v12996_v61 = vld [vmem:[#allocation99_spill] sm:$0xff] }
 0x5e5   : > { %v12333_v51 = vadd.f32 %v10260_v51, %v6692_v31   ;;  %v6678_v49 = vsel %vm6646_vm4, %v9565_v6, %v6662_v12  ;;  %vm6645_vm6 = vcmp.gt.f32.partialorder %v6385_v45, 0.0  ;;  %v6661_v53 = vmul.f32 0.01, %v6385_v45  ;;  %v6466_v7 = vpop.f32.mrf.mxu0  ;;  %v12998_v12 = vld [vmem:[#allocation100_spill] sm:$0xff] }
 0x5e6   : > { %v12981_v20 = vmov %v12329_v56  ;;  %v12336_v33 = vadd.f32 %v10264_v33, %v6691_v52   ;;  %v6694_v14 = vmax.f32 %v12282_v10, %v6678_v49  ;;  %vm6648_vm7 = vcmp.gt.f32.partialorder %v9572_v26, 0.0  ;;  %v13002_v52 = vld [vmem:[#allocation98_spill] sm:$0xff] }
 0x5e7   : > { %v12982_v0 = vmov %v12333_v51  ;;  %v6664_v8 = vmul.f32 0.01, %v9572_v26  ;;  %v6677_v56 = vsel %vm6645_vm6, %v6385_v45, %v6661_v53  ;;  %vm6647_vm9 = vcmp.gt.f32.partialorder %v6466_v7, 0.0  ;;  %v9579_v2 = vpop.f32.mrf.mxu1 }
 0x5e8   : > { %v12983_v11 = vmov %v12336_v33  ;;  %v6663_v25 = vmul.f32 0.01, %v6466_v7  ;;  %v5985_v51 = vmax.f32 %v12985_v9, %v5969_v27  ;;  %v12344_v62 = vadd.f32 %v12986_v23, %v6694_v14   ;;  %v6717_v14 = vld [vmem:[#allocation6] sm:$0xff] (%p12381_p8) }
 0x5e9   : > { %v6693_v39 = vmax.f32 %v12287_v18, %v6677_v56  ;;  %v6680_v33 = vsel %vm6648_vm7, %v9572_v26, %v6664_v8  ;;  %vm6650_vm10 = vcmp.gt.f32.partialorder %v9579_v2, 0.0  ;;  %v6666_v13 = vmul.f32 0.01, %v9579_v2  ;;  %v6547_v44 = vpop.f32.mrf.mxu1  ;;  %v9586_v18 = vpop.f32.mrf.mxu0  ;;  %v6718_v8 = vld [vmem:[#allocation6 + $0x8] sm:$0xff] (%p12381_p8) }
 0x5ea   : > { %v6696_v10 = vmax.f32 %v12292_v41, %v6680_v33  ;;  %v6679_v43 = vsel %vm6647_vm9, %v6466_v7, %v6663_v25  ;;  %v5972_v40 = vsel %vm5940_vm15, %v12254_v47, %v5956_v36  ;;  %v5971_v35 = vsel %vm5939_vm8, %v12259_v37, %v5955_v55  ;;  %v7309_v7 = vld [vmem:[%s12715_s13] sm:$0xff] (%p12381_p8) }
 0x5eb   : > { %v12353_v16 = vadd.f32 %v12987_v15, %v6693_v39   ;;  %v6695_v57 = vmax.f32 %v12297_v17, %v6679_v43  ;;  %v6682_v41 = vsel %vm6650_vm10, %v9579_v2, %v6666_v13  ;;  %vm6649_vm11 = vcmp.gt.f32.partialorder %v6547_v44, 0.0  ;;  %v6628_v37 = vpop.f32.mrf.mxu0 }
 0x5ec   : > { %v12357_v48 = vadd.f32 %v12989_v32, %v6696_v10   ;;  %v6665_v21 = vmul.f32 0.01, %v6547_v44  ;;  %v6698_v60 = vmax.f32 %v5986_v24, %v6682_v41  ;;  %vm6652_vm12 = vcmp.gt.f32.partialorder %v9586_v18, 0.0  ;;  %v8723_v32 = vld [vmem:[%s12717_s15] ss:$0 sm:$0xff] (%p12381_p8) }
 0x5ed   : > { %v12988_v29 = vmov %v12353_v16  ;;  %v12360_v59 = vadd.f32 %v12990_v19, %v6695_v57   ;;  %v6668_v47 = vmul.f32 0.01, %v9586_v18  ;;  %v12992_v4 = vmax.f32 %v12110_v42, %v12221_v38  ;;  %v12994_v16 = vld [vmem:[#allocation107_spill] sm:$0xff]  ;;  %v13000_v42 = vld [vmem:[#allocation97_spill] sm:$0xff] }
 0x5ee   : > { %v6681_v17 = vsel %vm6649_vm11, %v6547_v44, %v6665_v21  ;;  %vm6651_vm13 = vcmp.gt.f32.partialorder %v6628_v37, 0.0  ;;  %v6667_v54 = vmul.f32 0.01, %v6628_v37  ;;  %v12995_v34 = vmax.f32 %v12993_v22, %v12994_v16 }
 0x5ef   : > { %v12991_v28 = vmov %v12360_v59  ;;  %v5988_v58 = vmax.f32 %v12992_v4, %v5972_v40  ;;  %v12369_v45 = vadd.f32 %v12996_v61, %v6698_v60   ;;  %v6697_v6 = vmax.f32 %v5985_v51, %v6681_v17 }
 0x5f0   : > { %v5987_v36 = vmax.f32 %v12995_v34, %v5971_v35  ;;  %v6684_v59 = vsel %vm6652_vm12, %v9586_v18, %v6668_v47  ;;  %v6683_v50 = vsel %vm6651_vm13, %v6628_v37, %v6667_v54  ;;  %v13009_v57 = vmov %v12357_v48 }
 0x5f1   : > { %v12997_v31 = vmov %v12369_v45  ;;  %v6700_v24 = vmax.f32 %v5988_v58, %v6684_v59  ;;  %v12372_v13 = vadd.f32 %v12998_v12, %v6697_v6   ;;  %v13010_v59 = vmov %v12991_v28 }
 0x5f2   : > { %v6699_v55 = vmax.f32 %v5987_v36, %v6683_v50  ;;  %v13007_v45 = vmov %v12997_v31  ;;  %v13011_v36 = vmov %v12344_v62  ;;  %v13012_v16 = vmov %v12988_v29 }
 0x5f3   : > { %v12999_v27 = vmov %v12372_v13  ;;  %v12375_v24 = vadd.f32 %v13000_v42, %v6700_v24   ;;  %v13013_v51 = vmov %v12982_v0  ;;  %v13014_v33 = vmov %v12983_v11  ;;  %3675 = sbr.rel (!%p12381_p8) target bundleno = 888 (0x378), region = 145  ;;  %v7312_v45 = vld [vmem:[%s12715_s13 + $0x18] sm:$0xff] (%p12381_p8) }
 0x5f4   : > { %v12378_v9 = vadd.f32 %v13002_v52, %v6699_v55   ;;  %v13008_v13 = vmov %v12999_v27  ;;  %v13015_v52 = vmov %v12980_v5  ;;  %v13016_v56 = vmov %v12981_v20 }
 0x5f5   : > { %v13001_v38 = vmov %v12375_v24  ;;  %v13017_v61 = vmov %v12977_v63  ;;  %v13018_v6 = vmov %v12978_v3  ;;  %v13019_v60 = vmov %v12975_v1 }
 0x5f6   : > { %v13003_v26 = vmov %v12378_v9  ;;  %v13005_v24 = vmov %v13001_v38  ;;  %v13020_v22 = vmov %v12976_v46  ;;  %v13021_v49 = vmov (%p12381_p8), 0  }
 0x5f7   : > { %v13006_v9 = vmov %v13003_v26  ;;  %9868 = vset.pattern.permute.xlu0 (%p12381_p8), %v13021_v49  ;;  %9869 = vset.pattern.permute.xlu1 (%p12381_p8), %v13021_v49  ;;  %v10315_v53 = vmov (%p12381_p8), 0.0   ;;  %vm10316_vm14 = vmmov (%p12381_p8), 0   ;;  %vm7561_vm15 = vcmask (%p12381_p8), 1043459  }
 0x5f8   :  { %9587 = vmatprep.subr.mxu0 %v10315_v53  ;;  %9594 = vmatprep.subr.mxu1 %v10315_v53  ;;  %vm7563_vm1 = vcmask 1044484   ;;  %vm7565_vm2 = vcmask 1045509   ;;  %vm7567_vm3 = vcmask 1046534   ;;  %vm7569_vm4 = vcmask 1047559  }
 0x5f9   :  { %9588 = vmatpush3.msra.mxu0 %v12975_v1  ;;  %9595 = vmatpush3.msra.mxu1 %v12977_v63  ;;  %v6719_v1 = vld [vmem:[#allocation6 + $0x10] sm:$0xff]  ;;  %v6721_v63 = vld [vmem:[#allocation6 + $0x20] sm:$0xff]  ;;  %vm7572_vm6 = vcmask 64512   ;;  %vm7845_vm7 = vcmask 57344  }
 0x5fa   :  { %9589 = vmatprep.subr.mxu0 %v10315_v53  ;;  %9596 = vmatprep.subr.mxu1 %v10315_v53 }
 0x5fb   :  { %9590 = vmatpush3.msra.mxu0 %v12976_v46  ;;  %9591 = vmatprep.mubr.msk.f32.mxu0 %vm10316_vm14, %v10315_v53  ;;  %v6720_v46 = vld [vmem:[#allocation6 + $0x18] sm:$0xff] }
 0x5fc   :  { %9597 = vmatpush3.msra.mxu1 %v12978_v3  ;;  %9598 = vmatprep.mubr.msk.f32.mxu1 %vm10316_vm14, %v10315_v53  ;;  %v6722_v3 = vld [vmem:[#allocation6 + $0x28] sm:$0xff] }
 0x5fd   :  { %9592 = vmatmul.mubr.msk.f32.vlgmr.msra.gmra.mxu0 %vm485_vm0, %v6717_v14  ;;  %9599 = vmatmul.mubr.msk.f32.vlgmr.msra.gmra.mxu1 %vm485_vm0, %v6718_v8 }
 0x5fe   :  { %9601 = vmatprep.subr.mxu0 %v10315_v53  ;;  %9608 = vmatprep.subr.mxu1 %v10315_v53 }
 0x5ff   :  { %9602 = vmatpush3.msra.mxu0 %v12980_v5  ;;  %9609 = vmatpush3.msra.mxu1 %v12982_v0  ;;  %v6723_v5 = vld [vmem:[#allocation6 + $0x30] sm:$0xff] }
 0x600   :  { %9603 = vmatprep.subr.mxu0 %v10315_v53  ;;  %9610 = vmatprep.subr.mxu1 %v10315_v53  ;;  %v7311_v0 = vld [vmem:[%s12715_s13 + $0x10] sm:$0xff] }
 0x601   :  { %9604 = vmatpush3.msra.mxu0 %v12981_v20  ;;  %9605 = vmatprep.mubr.msk.f32.mxu0 %vm10316_vm14, %v10315_v53  ;;  %v6724_v20 = vld [vmem:[#allocation6 + $0x38] sm:$0xff] }
 0x602   :  { %9611 = vmatpush3.msra.mxu1 %v12983_v11  ;;  %9612 = vmatprep.mubr.msk.f32.mxu1 %vm10316_vm14, %v10315_v53  ;;  %v7310_v11 = vld [vmem:[%s12715_s13 + $0x8] sm:$0xff] }
 0x603   :  { %9606 = vmatmul.mubr.msk.f32.vlgmr.msra.gmra.mxu0 %vm485_vm0, %v6719_v1  ;;  %9613 = vmatmul.mubr.msk.f32.vlgmr.msra.gmra.mxu1 %vm485_vm0, %v6720_v46 }
 0x604   :  { %9615 = vmatprep.subr.mxu0 %v10315_v53  ;;  %9622 = vmatprep.subr.mxu1 %v10315_v53 }
 0x605   :  { %9616 = vmatpush3.msra.mxu0 %v12344_v62  ;;  %9623 = vmatpush3.msra.mxu1 %v12357_v48 }
 0x606   :  { %9617 = vmatprep.subr.mxu0 %v10315_v53  ;;  %9624 = vmatprep.subr.mxu1 %v10315_v53 }
 0x607   :  { %9618 = vmatpush3.msra.mxu0 %v12988_v29  ;;  %9619 = vmatprep.mubr.msk.f32.mxu0 %vm10316_vm14, %v10315_v53  ;;  %v8714_v29 = vld [vmem:[%s12716_s14] ss:$0 sm:$0xff]  ;;  %s10317_s14 = smov [#allocation21]  }
 0x608   :  { %9625 = vmatpush3.msra.mxu1 %v12991_v28  ;;  %9626 = vmatprep.mubr.msk.f32.mxu1 %vm10316_vm14, %v10315_v53  ;;  %s8463_s15 = sshll.u32 %s10317_s14, 4  ;;  %s8464_s15 = int_to_ptr.vmem [resolvable:$true] %s8463_s15 }
 0x609   :  { %9620 = vmatmul.mubr.msk.f32.vlgmr.msra.gmra.mxu0 %vm485_vm0, %v6721_v63  ;;  %9627 = vmatmul.mubr.msk.f32.vlgmr.msra.gmra.mxu1 %vm485_vm0, %v6722_v3  ;;  %s10102_s10 = scalar_lea.vmem %s8464_s15, 128  ;;  %p10107_p10 = scmp.lt.s32.totalorder %s8464_s15, %s8464_s15 }
 0x60a   :  { %9629 = vmatprep.subr.mxu0 %v10315_v53  ;;  %9636 = vmatprep.subr.mxu1 %v10315_v53  ;;  %p10103_p9 = scmp.ne.s32.totalorder %s8464_s15, %s10102_s10  ;;  %p10108_p11 = scmp.lt.s32.totalorder %s10102_s10, %s10102_s10 }
 0x60b   :  { %9630 = vmatpush3.msra.mxu0 %v12997_v31  ;;  %9637 = vmatpush3.msra.mxu1 %v13001_v38 }
 0x60c   :  { %9631 = vmatprep.subr.mxu0 %v10315_v53  ;;  %9638 = vmatprep.subr.mxu1 %v10315_v53  ;;  %p10109_p12 = por %p10108_p11, %p10107_p10 }
 0x60d   :  { %9632 = vmatpush3.msra.mxu0 %v12999_v27  ;;  %9633 = vmatprep.mubr.msk.f32.mxu0 %vm10316_vm14, %v10315_v53 }
 0x60e   :  { %9639 = vmatpush3.msra.mxu1 %v13003_v26  ;;  %9640 = vmatprep.mubr.msk.f32.mxu1 %vm10316_vm14, %v10315_v53  ;;  %p10110_p13 = pnand %p10109_p12, %p10103_p9 }
 0x60f   :  { %9634 = vmatmul.mubr.msk.f32.vlgmr.msra.gmra.mxu0 %vm485_vm0, %v6723_v5  ;;  %9641 = vmatmul.mubr.msk.f32.vlgmr.msra.gmra.mxu1 %vm485_vm0, %v6724_v20  ;;  %v8724_v20 = vld [vmem:[#allocation2] ss:$0 sm:$0xff]  ;;  %vm7557_vm0 = vcmask 1041409  }
 0x610   :  { %9643 = vmatprep.subr.mxu0 %v7312_v45  ;;  %9663 = vmatprep.subr.mxu1 %v10315_v53 }
 0x611   :  { %9644 = vmatpush3.msra.mxu0 %v7312_v45  ;;  %9665 = vmatprep.mubr.msk.f32.mxu1 %vm10316_vm14, %v10315_v53 }
 0x612   :  { %9645 = vmatprep.subr.mxu0 %v7311_v0 }
 0x613   :  { %9646 = vmatpush3.msra.mxu0 %v7311_v0 }
 0x614   :  { %9647 = vmatprep.subr.mxu0 %v7310_v11 }
 0x615   :  { %9648 = vmatpush3.msra.mxu0 %v7310_v11 }
 0x616   :  { %9649 = vmatprep.subr.mxu0 %v7309_v7 }
 0x617   :  { %9650 = vmatpush3.msra.mxu0 %v7309_v7 }
 0x618   :  { %9688 = vmatprep.subr.mxu0 %v10315_v53 }
 0x6bd   :  { %v6794_v56 = vpop.f32.mrf.mxu0  ;;  %v6867_v25 = vpop.f32.mrf.mxu1 }
 0x6be   :  { %9651 = vmatprep.mubr.msk.f32.mxu0 %vm3707_vm5, %v6794_v56 }
 0x6bf   :  { %v9593_v30 = vpop.f32.mrf.mxu0  ;;  %v9600_v9 = vpop.f32.mrf.mxu1  ;;  %9652 = vmatmul.mubr.msk.f32.vlgmr.msra.gmra.mxu0 %vm3707_vm5, %v6867_v25  ;;  %v13022_v25 = vlaneseq }
 0x6c1   :  { %v7524_v30 = vand.u32 127, %v13022_v25 }
 0x6c3   :  { %v6940_v51 = vpop.f32.mrf.mxu0  ;;  %v7013_v23 = vpop.f32.mrf.mxu1 }
 0x6c4   :  { %9654 = vmatprep.mubr.msk.f32.mxu0 %vm3707_vm5, %v6940_v51 }
 0x6c5   :  { %v9607_v62 = vpop.f32.mrf.mxu0  ;;  %v9614_v39 = vpop.f32.mrf.mxu1  ;;  %9655 = vmatmul.mubr.msk.f32.gmra.mxu0 %vm3707_vm5, %v7013_v23  ;;  %v13023_v23 = vld [vmem:[#allocation31_spill] sm:$0xff] }
 0x6c6   :  { %v12537_v62 = vsub.s32 %v7524_v30, %v13023_v23 }
 0x6c9   :  { %v7086_v33 = vpop.f32.mrf.mxu0  ;;  %v7159_v2 = vpop.f32.mrf.mxu1 }
 0x6ca   :  { %9657 = vmatprep.mubr.msk.f32.mxu0 %vm3707_vm5, %v7086_v33 }
 0x6cb   :  { %v9621_v10 = vpop.f32.mrf.mxu0  ;;  %v9628_v43 = vpop.f32.mrf.mxu1  ;;  %9658 = vmatmul.mubr.msk.f32.gmra.mxu0 %vm3707_vm5, %v7159_v2 }
 0x6cf   :  { %v7232_v13 = vpop.f32.mrf.mxu0  ;;  %v7305_v40 = vpop.f32.mrf.mxu1 }
 0x6d0   :  { %9660 = vmatprep.mubr.msk.f32.mxu0 %vm3707_vm5, %v7232_v13 }
 0x6d1   :  { %v9635_v35 = vpop.f32.mrf.mxu0  ;;  %v9642_v15 = vpop.f32.mrf.mxu1  ;;  %9661 = vmatmul.mubr.msk.f32.gmra.mxu0 %vm3707_vm5, %v7305_v40 }
 0x6d2   :  { %9690 = vmatprep.mubr.msk.f32.mxu0 %vm10316_vm14, %v10315_v53 }
 0x77f   :  { %v9653_v57 = vpop.f32.mrf.mxu0 }
 0x780   :  { %v7417_v44 = vadd.f32 %v9653_v57, %v8714_v29 }
 0x781   :  { %v7411_v18 = vpop.f32.mrf.mxu0 }
 0x782   :  { %v7451_v48 = vmax.f32 %v7417_v44, 0.0  ;;  %v7412_v41 = vadd.f32 %v8714_v29, %v7411_v18 }
 0x784   :  { %v7450_v21 = vmax.f32 %v7412_v41, 0.0  ;;  %v7466_v19 = vmul.f32 %v8723_v32, %v7451_v48 }
 0x785   :  { %v9656_v28 = vpop.f32.mrf.mxu0 }
 0x786   :  { %v7427_v60 = vadd.f32 %v9656_v28, %v8714_v29  ;;  %v7476_v47 = vsel %vm3707_vm5, %v7466_v19, 0.0  ;;  %v7465_v37 = vmul.f32 %v8723_v32, %v7450_v21 }
 0x787   :  { %v7421_v4 = vpop.f32.mrf.mxu0  ;;  %7477 = vadd.xlane.f32.xlu0 %v7476_v47 }
 0x788   :  { %v7453_v58 = vmax.f32 %v7427_v60, 0.0  ;;  %v7422_v17 = vadd.f32 %v8714_v29, %v7421_v4  ;;  %v7473_v16 = vsel %vm3707_vm5, %v7465_v37, 0.0 }
 0x78a   :  { %v7452_v54 = vmax.f32 %v7422_v17, 0.0  ;;  %v7468_v22 = vmul.f32 %v8723_v32, %v7453_v58 }
 0x78b   :  { %v9659_v34 = vpop.f32.mrf.mxu0  ;;  %7474 = vadd.xlane.f32.xlu0 %v7473_v16  ;;  %v7607_v16 = vsub.s32 7, %v13023_v23 }
 0x78c   :  { %v7437_v36 = vadd.f32 %v9659_v34, %v8714_v29  ;;  %v7482_v61 = vsel %vm3707_vm5, %v7468_v22, 0.0  ;;  %v7467_v31 = vmul.f32 %v8723_v32, %v7452_v54  ;;  %v7583_v22 = vsub.s32 1, %v13023_v23 }
 0x78d   :  { %v7431_v6 = vpop.f32.mrf.mxu0  ;;  %7483 = vadd.xlane.f32.xlu1 %v7482_v61  ;;  %v7587_v34 = vsub.s32 2, %v13023_v23  ;;  %v13024_v61 = vld [vmem:[#allocation32_spill] sm:$0xff] }
 0x78e   :  { %v7455_v59 = vmax.f32 %v7437_v36, 0.0  ;;  %v7432_v24 = vadd.f32 %v8714_v29, %v7431_v6  ;;  %v7479_v12 = vsel %vm3707_vm5, %v7467_v31, 0.0 }
 0x790   :  { %v7454_v50 = vmax.f32 %v7432_v24, 0.0  ;;  %v7470_v27 = vmul.f32 %v8723_v32, %v7455_v59  ;;  %v7591_v24 = vsub.s32 3, %v13023_v23 }
 0x791   :  { %v9662_v55 = vpop.f32.mrf.mxu0  ;;  %7480 = vadd.xlane.f32.xlu1 %v7479_v12 }
 0x792   :  { %v7447_v42 = vadd.f32 %v9662_v55, %v8714_v29  ;;  %v7469_v38 = vmul.f32 %v8723_v32, %v7454_v50  ;;  %v7488_v8 = vsel %vm3707_vm5, %v7470_v27, 0.0 }
 0x793   :  { %v7441_v52 = vpop.f32.mrf.mxu0 }
 0x794   :  { %v7457_v26 = vmax.f32 %v7447_v42, 0.0  ;;  %v7442_v49 = vadd.f32 %v8714_v29, %v7441_v52  ;;  %v7485_v14 = vsel %vm3707_vm5, %v7469_v38, 0.0  ;;  %v7595_v42 = vsub.s32 4, %v13023_v23 }
 0x795   :  { %7486 = vadd.xlane.f32.xlu0 %v7485_v14  ;;  %7489 = vadd.xlane.f32.xlu1 %v7488_v8  ;;  %v7599_v14 = vsub.s32 5, %v13023_v23 }
 0x796   :  { %v7456_v1 = vmax.f32 %v7442_v49, 0.0  ;;  %v7472_v46 = vmul.f32 %v8723_v32, %v7457_v26 }
 0x798   :  { %v7471_v63 = vmul.f32 %v8723_v32, %v7456_v1  ;;  %v7494_v3 = vsel %vm3707_vm5, %v7472_v46, 0.0 }
 0x799   :  { %7495 = vadd.xlane.f32.xlu1 %v7494_v3  ;;  %v7603_v3 = vsub.s32 6, %v13023_v23 }
 0x79a   :  { %v7491_v5 = vsel %vm3707_vm5, %v7471_v63, 0.0  ;;  %vm7559_vm5 = vcmask 1042434  }
 0x79b   :  { %7492 = vadd.xlane.f32.xlu0 %v7491_v5 }
 0x7b1   :  { %7504 = vperm.xlu0 %9868, %v8724_v20  }
 0x810   :  { %v7478_v45 = vpop.xlane.xlu0 %7477 }
 0x814   :  { %v7475_v11 = vpop.xlane.xlu0 %7474 }
 0x816   :  { %v7484_v0 = vpop.xlane.xlu1 %7483 }
 0x81a   :  { %v7481_v56 = vpop.xlane.xlu1 %7480 }
 0x81e   :  { %v7487_v7 = vpop.xlane.xlu0 %7486  ;;  %v7490_v51 = vpop.xlane.xlu1 %7489 }
 0x822   :  { %v7496_v57 = vpop.xlane.xlu1 %7495 }
 0x824   :  { %v7493_v9 = vpop.xlane.xlu0 %7492 }
 0x82c   :  { %v7505_v39 = vpop.permute.xlu0 %7504 }
 0x82d   :  { %v7507_v33 = vadd.f32 %v7505_v39, %v7475_v11  ;;  %v7508_v2 = vadd.f32 %v7505_v39, %v7478_v45  ;;  %v7509_v10 = vadd.f32 %v7505_v39, %v7481_v56  ;;  %v7510_v43 = vadd.f32 %v7505_v39, %v7484_v0 }
 0x82e   :  { %v12539_v13 = vadd.f32 %v7505_v39, %v7487_v7  ;;  %v12541_v40 = vadd.f32 %v7505_v39, %v7490_v51  ;;  %v12546_v44 = vadd.f32 %v7505_v39, %v7493_v9  ;;  %v7514_v18 = vadd.f32 %v7505_v39, %v7496_v57 }
 0x82f   :  { %v7528_v35 = vrot.slane %v7507_v33, %v12537_v62  ;;  %v7532_v15 = vrot.slane %v7508_v2, %v12537_v62  ;;  %v7536_v29 = vrot.slane %v7509_v10, %v12537_v62  ;;  %v7540_v32 = vrot.slane %v7510_v43, %v12537_v62 }
 0x830   :  { %v7544_v41 = vrot.slane %v12539_v13, %v12537_v62  ;;  %v7548_v19 = vrot.slane %v12541_v40, %v12537_v62  ;;  %v7552_v60 = vrot.slane %v12546_v44, %v12537_v62  ;;  %v7556_v37 = vrot.slane %v7514_v18, %v12537_v62 }
 0x831   :  { %v7558_v48 = vsel %vm7557_vm0, %v7532_v15, %v7528_v35 }
 0x832   :  { %v7560_v21 = vsel %vm7559_vm5, %v7536_v29, %v7558_v48 }
 0x833   :  { %v7562_v28 = vsel %vm7561_vm15, %v7540_v32, %v7560_v21 }
 0x834   :  { %v7564_v47 = vsel %vm7563_vm1, %v7544_v41, %v7562_v28 }
 0x835   :  { %v7566_v4 = vsel %vm7565_vm2, %v7548_v19, %v7564_v47 }
 0x836   :  { %v7568_v58 = vsel %vm7567_vm3, %v7552_v60, %v7566_v4 }
 0x837   :  { %v7570_v17 = vsel %vm7569_vm4, %v7556_v37, %v7568_v58 }
 0x838   :  { %v7573_v54 = vsel %vm7572_vm6, %v7570_v17, -inf }
 0x839   :  { %7574 = vmax.xlane.f32.xlu1 %v7573_v54 }
 0x8c2   :  { %v7575_v36 = vpop.xlane.xlu1 %7574 }
 0x8c3   :  { %v7580_v31 = vrot.slane %v7575_v36, %v13024_v61  ;;  %v7584_v6 = vrot.slane %v7575_v36, %v7583_v22  ;;  %v7608_v59 = vrot.slane %v7575_v36, %v7607_v16  ;;  %v7588_v50 = vrot.slane %v7575_v36, %v7587_v34 }
 0x8c4   :  { %v7592_v52 = vrot.slane %v7575_v36, %v7591_v24  ;;  %v7596_v1 = vrot.slane %v7575_v36, %v7595_v42  ;;  %v7600_v5 = vrot.slane %v7575_v36, %v7599_v14  ;;  %v7604_v0 = vrot.slane %v7575_v36, %v7603_v3 }
 0x8c5   :  { %v7617_v12 = vsub.f32 %v7507_v33, %v7580_v31  ;;  %v7618_v27 = vsub.f32 %v7508_v2, %v7584_v6  ;;  %v7624_v38 = vsub.f32 %v7514_v18, %v7608_v59  ;;  %v7619_v26 = vsub.f32 %v7509_v10, %v7588_v50 }
 0x8c6   :  { %v7620_v46 = vsub.f32 %v7510_v43, %v7592_v52  ;;  %v7621_v20 = vsub.f32 %v12539_v13, %v7596_v1  ;;  %v7622_v11 = vsub.f32 %v12541_v40, %v7600_v5  ;;  %v7623_v25 = vsub.f32 %v12546_v44, %v7604_v0 }
 0x8c7   :  { %v7625_v55 = vmul.f32 1.442695, %v7617_v12  ;;  %v7627_v49 = vmul.f32 1.442695, %v7618_v27  ;;  %v7639_v8 = vmul.f32 1.442695, %v7624_v38 }
 0x8c8   :  { %v7629_v63 = vmul.f32 1.442695, %v7619_v26  ;;  %v7631_v45 = vmul.f32 1.442695, %v7620_v46  ;;  %v7633_v7 = vmul.f32 1.442695, %v7621_v20 }
 0x8c9   :  { %9870 = vpow2.f32 %v7625_v55  ;;  %v7635_v30 = vmul.f32 1.442695, %v7622_v11  ;;  %v7637_v39 = vmul.f32 1.442695, %v7623_v25  ;;  %v7859_v46 = vld [vmem:[#allocation8 + $0x28] sm:$0xff] }
 0x8ca   :  { %9872 = vpow2.f32 %v7627_v49  ;;  %9689 = vmatpush3.msra.mxu0 %v7859_v46 }
 0x8cb   :  { %9874 = vpow2.f32 %v7639_v8  ;;  %9698 = vmatprep.subr.mxu0 %v10315_v53 }
 0x8cc   :  { %9876 = vpow2.f32 %v7629_v63 }
 0x8cd   :  { %9878 = vpow2.f32 %v7631_v45 }
 0x8ce   :  { %9880 = vpow2.f32 %v7633_v7 }
 0x8cf   :  { %9882 = vpow2.f32 %v7635_v30  ;;  %v7855_v30 = vld [vmem:[#allocation8 + $0x8] sm:$0xff] }
 0x8d0   :  { %9884 = vpow2.f32 %v7637_v39 }
 0x8d6   :  { %v9871_v56 = vpop.eup %9870 }
 0x8d7   :  { %7650 = vperm.xlu1 %9869, %v9871_v56   ;;  %v12589_v9 = vpop.eup %9872 }
 0x8d8   :  { %v12592_v51 = vpop.eup %9874 }
 0x8d9   :  { %v12594_v33 = vpop.eup %9876  ;;  %7671 = vperm.xlu0 %9868, %v12592_v51  }
 0x8da   :  { %v12598_v2 = vpop.eup %9878 }
 0x8db   :  { %7653 = vperm.xlu1 %9869, %v12589_v9   ;;  %v12601_v10 = vpop.eup %9880 }
 0x8dc   :  { %v12604_v43 = vpop.eup %9882 }
 0x8dd   :  { %v12607_v13 = vpop.eup %9884 }
 0x8df   :  { %7656 = vperm.xlu1 %9869, %v12594_v33  }
 0x8e3   :  { %7659 = vperm.xlu1 %9869, %v12598_v2  }
 0x8e7   :  { %7662 = vperm.xlu1 %9869, %v12601_v10  }
 0x8eb   :  { %7665 = vperm.xlu1 %9869, %v12604_v43  }
 0x8ef   :  { %7668 = vperm.xlu1 %9869, %v12607_v13  }
 0x952   :  { %v7651_v40 = vpop.permute.xlu1 %7650 }
 0x953   :  { %v7676_v32 = vrot.slane %v7651_v40, %v12537_v62  ;;  %v7858_v40 = vld [vmem:[#allocation8 + $0x20] sm:$0xff] }
 0x954   :  { %v7672_v60 = vpop.permute.xlu0 %7671 }
 0x955   :  { %v7704_v54 = vrot.slane %v7672_v60, %v12537_v62 }
 0x956   :  { %v7654_v35 = vpop.permute.xlu1 %7653 }
 0x957   :  { %v7680_v44 = vrot.slane %v7654_v35, %v12537_v62 }
 0x959   :  { %v7705_v19 = vsel %vm7557_vm0, %v7680_v44, %v7676_v32 }
 0x95a   :  { %v7657_v15 = vpop.permute.xlu1 %7656 }
 0x95b   :  { %v7684_v18 = vrot.slane %v7657_v15, %v12537_v62 }
 0x95d   :  { %v7706_v47 = vsel %vm7559_vm5, %v7684_v18, %v7705_v19  ;;  %v7861_v18 = vld [vmem:[#allocation8 + $0x38] sm:$0xff] }
 0x95e   :  { %v7660_v29 = vpop.permute.xlu1 %7659 }
 0x95f   :  { %v7688_v48 = vrot.slane %v7660_v29, %v12537_v62  ;;  %v7860_v29 = vld [vmem:[#allocation8 + $0x30] sm:$0xff] }
 0x961   :  { %v7707_v37 = vsel %vm7561_vm15, %v7688_v48, %v7706_v47 }
 0x962   :  { %v7663_v57 = vpop.permute.xlu1 %7662 }
 0x963   :  { %v7692_v21 = vrot.slane %v7663_v57, %v12537_v62 }
 0x965   :  { %v7708_v58 = vsel %vm7563_vm1, %v7692_v21, %v7707_v37 }
 0x966   :  { %v7666_v41 = vpop.permute.xlu1 %7665 }
 0x967   :  { %v7696_v28 = vrot.slane %v7666_v41, %v12537_v62 }
 0x969   :  { %v7709_v36 = vsel %vm7565_vm2, %v7696_v28, %v7708_v58 }
 0x96a   :  { %v7669_v4 = vpop.permute.xlu1 %7668 }
 0x96b   :  { %v7700_v17 = vrot.slane %v7669_v4, %v12537_v62 }
 0x96d   :  { %v7710_v31 = vsel %vm7567_vm3, %v7700_v17, %v7709_v36 }
 0x96e   :  { %v7711_v6 = vsel %vm7569_vm4, %v7704_v54, %v7710_v31 }
 0x96f   :  { %v7713_v59 = vsel %vm7572_vm6, %v7711_v6, 0.0 }
 0x970   :  { %7714 = vadd.xlane.f32.xlu1 %v7713_v59 }
 0x9f9   :  { %v7715_v50 = vpop.xlane.xlu1 %7714 }
 0x9fa   :  { %v7720_v12 = vrot.slane %v7715_v50, %v13024_v61  ;;  %v7724_v27 = vrot.slane %v7715_v50, %v7583_v22  ;;  %v7728_v55 = vrot.slane %v7715_v50, %v7587_v34  ;;  %v7732_v38 = vrot.slane %v7715_v50, %v7591_v24  ;;  %v7854_v22 = vld [vmem:[#allocation8] sm:$0xff] }
 0x9fb   :  { %v7736_v52 = vrot.slane %v7715_v50, %v7595_v42  ;;  %v7740_v61 = vrot.slane %v7715_v50, %v7599_v14  ;;  %9664 = vmatpush3.msra.mxu1 %v7854_v22  ;;  %v7744_v34 = vrot.slane %v7715_v50, %v7603_v3  ;;  %v7748_v1 = vrot.slane %v7715_v50, %v7607_v16 }
 0x9fc   :  { %9886 = vrcp.f32 %v7720_v12  ;;  %9668 = vmatprep.subr.mxu1 %v10315_v53 }
 0x9fd   :  { %9888 = vrcp.f32 %v7724_v27 }
 0x9fe   :  { %9890 = vrcp.f32 %v7728_v55 }
 0x9ff   :  { %9892 = vrcp.f32 %v7732_v38 }
 0xa00   :  { %9894 = vrcp.f32 %v7736_v52 }
 0xa01   :  { %9896 = vrcp.f32 %v7740_v61 }
 0xa02   :  { %9898 = vrcp.f32 %v7744_v34 }
 0xa03   :  { %9900 = vrcp.f32 %v7748_v1 }
 0xa09   :  { %v9887_v26 = vpop.eup %9886 }
 0xa0a   :  { %v7758_v49 = vmul.f32 %v9887_v26, %v9871_v56  ;;  %v9889_v8 = vpop.eup %9888 }
 0xa0b   :  { %v7760_v24 = vmul.f32 %v9889_v8, %v12589_v9  ;;  %v9891_v42 = vpop.eup %9890 }
 0xa0c   :  { %7782 = vperm.xlu0 %9868, %v7758_v49   ;;  %v7762_v14 = vmul.f32 %v9891_v42, %v12594_v33  ;;  %v9893_v63 = vpop.eup %9892 }
 0xa0d   :  { %v7764_v3 = vmul.f32 %v9893_v63, %v12598_v2  ;;  %v9895_v5 = vpop.eup %9894 }
 0xa0e   :  { %v7766_v20 = vmul.f32 %v9895_v5, %v12601_v10  ;;  %v9897_v45 = vpop.eup %9896  ;;  %v7857_v10 = vld [vmem:[#allocation8 + $0x18] sm:$0xff] }
 0xa0f   :  { %v7768_v23 = vmul.f32 %v9897_v45, %v12604_v43  ;;  %v9899_v16 = vpop.eup %9898 }
 0xa10   :  { %7785 = vperm.xlu0 %9868, %v7760_v24   ;;  %v7770_v0 = vmul.f32 %v9899_v16, %v12607_v13  ;;  %v9901_v11 = vpop.eup %9900 }
 0xa11   :  { %v7772_v7 = vmul.f32 %v9901_v11, %v12592_v51  ;;  %v7856_v51 = vld [vmem:[#allocation8 + $0x10] sm:$0xff] }
 0xa14   :  { %7788 = vperm.xlu0 %9868, %v7762_v14  }
 0xa18   :  { %7791 = vperm.xlu0 %9868, %v7764_v3  }
 0xa1c   :  { %7794 = vperm.xlu0 %9868, %v7766_v20  }
 0xa20   :  { %7797 = vperm.xlu0 %9868, %v7768_v23  }
 0xa24   :  { %7800 = vperm.xlu0 %9868, %v7770_v0  }
 0xa28   :  { %7803 = vperm.xlu0 %9868, %v7772_v7  }
 0xa87   :  { %v7783_v56 = vpop.permute.xlu0 %7782 }
 0xa88   :  { %v7808_v25 = vrot.slane %v7783_v56, %v12537_v62 }
 0xa8a   :  { %7846 = vst.msk [vmem:[#allocation21] sm:$0x1] %vm7845_vm7, %v7808_v25  ;;  %9666 = vmatmul.mubr.msk.f32.vlgmr.msra.gmra.mxu1 %vm7572_vm6, %v7808_v25 }
 0xa8b   :  { %v7786_v9 = vpop.permute.xlu0 %7785  ;;  %9669 = vmatpush3.msra.mxu1 %v7855_v30  ;;  %9670 = vmatprep.mubr.msk.f32.mxu1 %vm10316_vm14, %v10315_v53 }
 0xa8c   :  { %v7812_v39 = vrot.slane %v7786_v9, %v12537_v62  ;;  %9673 = vmatprep.subr.mxu1 %v10315_v53 }
 0xa8e   :  { %7847 = vst.msk [vmem:[#allocation21 + $0x1] sm:$0x1] %vm7845_vm7, %v7812_v39  ;;  %9671 = vmatmul.mubr.msk.f32.vlgmr.msra.gmra.mxu1 %vm7572_vm6, %v7812_v39 }
 0xa8f   :  { %v7789_v33 = vpop.permute.xlu0 %7788  ;;  %9674 = vmatpush3.msra.mxu1 %v7856_v51  ;;  %9675 = vmatprep.mubr.msk.f32.mxu1 %vm10316_vm14, %v10315_v53 }
 0xa90   :  { %v7816_v2 = vrot.slane %v7789_v33, %v12537_v62  ;;  %9678 = vmatprep.subr.mxu1 %v10315_v53 }
 0xa92   :  { %7848 = vst.msk [vmem:[#allocation21 + $0x2] sm:$0x1] %vm7845_vm7, %v7816_v2  ;;  %9676 = vmatmul.mubr.msk.f32.vlgmr.msra.gmra.mxu1 %vm7572_vm6, %v7816_v2 }
 0xa93   :  { %v7792_v43 = vpop.permute.xlu0 %7791  ;;  %9679 = vmatpush3.msra.mxu1 %v7857_v10  ;;  %9680 = vmatprep.mubr.msk.f32.mxu1 %vm10316_vm14, %v10315_v53 }
 0xa94   :  { %v7820_v13 = vrot.slane %v7792_v43, %v12537_v62  ;;  %9683 = vmatprep.subr.mxu1 %v10315_v53 }
 0xa96   :  { %7849 = vst.msk [vmem:[#allocation21 + $0x3] sm:$0x1] %vm7845_vm7, %v7820_v13  ;;  %9681 = vmatmul.mubr.msk.f32.vlgmr.msra.gmra.mxu1 %vm7572_vm6, %v7820_v13 }
 0xa97   :  { %v7795_v35 = vpop.permute.xlu0 %7794  ;;  %9684 = vmatpush3.msra.mxu1 %v7858_v40  ;;  %9685 = vmatprep.mubr.msk.f32.mxu1 %vm10316_vm14, %v10315_v53 }
 0xa98   :  { %v7824_v15 = vrot.slane %v7795_v35, %v12537_v62  ;;  %9693 = vmatprep.subr.mxu1 %v10315_v53 }
 0xa9a   :  { %7850 = vst.msk [vmem:[#allocation21 + $0x4] sm:$0x1] %vm7845_vm7, %v7824_v15  ;;  %9686 = vmatmul.mubr.msk.f32.vlgmr.msra.gmra.mxu1 %vm7572_vm6, %v7824_v15 }
 0xa9b   :  { %v7798_v57 = vpop.permute.xlu0 %7797  ;;  %9694 = vmatpush3.msra.mxu1 %v7860_v29  ;;  %9695 = vmatprep.mubr.msk.f32.mxu1 %vm10316_vm14, %v10315_v53 }
 0xa9c   :  { %v7828_v44 = vrot.slane %v7798_v57, %v12537_v62 }
 0xa9e   :  { %7851 = vst.msk [vmem:[#allocation21 + $0x5] sm:$0x1] %vm7845_vm7, %v7828_v44  ;;  %9691 = vmatmul.mubr.msk.f32.vlgmr.msra.gmra.mxu0 %vm7572_vm6, %v7828_v44 }
 0xa9f   :  { %v7801_v32 = vpop.permute.xlu0 %7800  ;;  %9699 = vmatpush3.msra.mxu0 %v7861_v18  ;;  %9700 = vmatprep.mubr.msk.f32.mxu0 %vm10316_vm14, %v10315_v53 }
 0xaa0   :  { %v7832_v48 = vrot.slane %v7801_v32, %v12537_v62 }
 0xaa2   :  { %7852 = vst.msk [vmem:[#allocation21 + $0x6] sm:$0x1] %vm7845_vm7, %v7832_v48  ;;  %9696 = vmatmul.mubr.msk.f32.vlgmr.msra.gmra.mxu1 %vm7572_vm6, %v7832_v48 }
 0xaa3   :  { %v7804_v41 = vpop.permute.xlu0 %7803 }
 0xaa4   :  { %v7836_v21 = vrot.slane %v7804_v41, %v12537_v62 }
 0xaa6   :  { %7853 = vst.msk [vmem:[#allocation21 + $0x7] sm:$0x1] %vm7845_vm7, %v7836_v21  ;;  %9701 = vmatmul.mubr.msk.f32.vlgmr.msra.gmra.mxu0 %vm7572_vm6, %v7836_v21 }
 0xaa7   :  { %10113 = shalt.err (!%p10110_p13)
}
 0xaa8   :  { %8469 = dma.vmem_to_hbm [thread:$0]  %s8464_s15, 128, %s12720_s18, [#allocation22], %s10306_s29, %s10306_s29, %s10307_s0  }
 0xaa9   :  { %s10318_s18 = smov [#allocation20]  }
 0xaaa   :  { %s8451_s3 = sshll.u32 %s10318_s18, 4  ;;  %s8452_s3 = int_to_ptr.vmem [resolvable:$true] %s8451_s3 }
 0xaab   :  { %s10122_s30 = scalar_lea.vmem %s8452_s3, 128  ;;  %p10127_p1 = scmp.lt.s32.totalorder %s8452_s3, %s8452_s3 }
 0xaac   :  { %p10123_p0 = scmp.ne.s32.totalorder %s8452_s3, %s10122_s30  ;;  %p10128_p2 = scmp.lt.s32.totalorder %s10122_s30, %s10122_s30 }
 0xaae   :  { %p10129_p3 = por %p10128_p2, %p10127_p1 }
 0xab0   :  { %p10130_p4 = pnand %p10129_p3, %p10123_p0 }
 0xb4a   :  { %v7930_v53 = vpop.f32.mrf.mxu1 }
 0xb4b   :  { %8438 = vst [vmem:[#allocation20] sm:$0x1] %v7930_v53 }
 0xb4c   :  { %v9667_v62 = vpop.f32.mrf.mxu1 }
 0xb4e   :  { %v8002_v19 = vpop.f32.mrf.mxu1 }
 0xb4f   :  { %8439 = vst [vmem:[#allocation20 + $0x1] sm:$0x1] %v8002_v19 }
 0xb50   :  { %v9672_v28 = vpop.f32.mrf.mxu1 }
 0xb52   :  { %v8074_v60 = vpop.f32.mrf.mxu1 }
 0xb53   :  { %8440 = vst [vmem:[#allocation20 + $0x2] sm:$0x1] %v8074_v60 }
 0xb54   :  { %v9677_v47 = vpop.f32.mrf.mxu1 }
 0xb56   :  { %v8146_v37 = vpop.f32.mrf.mxu1 }
 0xb57   :  { %8441 = vst [vmem:[#allocation20 + $0x3] sm:$0x1] %v8146_v37 }
 0xb58   :  { %v9682_v4 = vpop.f32.mrf.mxu1 }
 0xb5a   :  { %v8218_v58 = vpop.f32.mrf.mxu1 }
 0xb5b   :  { %8442 = vst [vmem:[#allocation20 + $0x4] sm:$0x1] %v8218_v58 }
 0xb5c   :  { %v9687_v17 = vpop.f32.mrf.mxu1 }
 0xb5e   :  { %v8290_v54 = vpop.f32.mrf.mxu0 }
 0xb5f   :  { %8443 = vst [vmem:[#allocation20 + $0x5] sm:$0x1] %v8290_v54 }
 0xb60   :  { %v9692_v36 = vpop.f32.mrf.mxu0 }
 0xb62   :  { %v8362_v31 = vpop.f32.mrf.mxu1 }
 0xb63   :  { %8444 = vst [vmem:[#allocation20 + $0x6] sm:$0x1] %v8362_v31 }
 0xb64   :  { %v9697_v6 = vpop.f32.mrf.mxu1 }
 0xb66   :  { %v8434_v59 = vpop.f32.mrf.mxu0 }
 0xb67   :  { %8445 = vst [vmem:[#allocation20 + $0x7] sm:$0x1] %v8434_v59 }
 0xb68   :  { %v9702_v50 = vpop.f32.mrf.mxu0 }
 0xb69   :  { %10133 = shalt.err (!%p10130_p4)
}
 0xb6a   :  { %8457 = dma.vmem_to_hbm [thread:$0]  %s8452_s3, 128, %s12719_s17, [#allocation5], %s10306_s29, %s10306_s29, %s10307_s0  }
 0xb6b   :  { %10222 = dma.done.wait [#allocation5], 128  }
 0xb6c   :  { %10223 = vsyncadd [#allocation5], 4294967168 }
 0xb6d   :  { %10224 = dma.done.wait [#allocation22], 128  }
 0xb6e   :  { %10225 = vsyncadd [#allocation22], 4294967168 }
 0xb6f   :  { %8476 = vsyncpa [#allocation4], 1 }
 0xb70   :  { %8477 = vsyncpa [#allocation7], 1 }
 0xb71   :  { %8478 = vsyncpa [#allocation10], 1 }
 0xb72   :  { %8479 = vsyncpa [#allocation13], 1 }
 0xb73   :  { %8480 = vsyncpa [#allocation16], 1 }
 0xb74   :  { %8481 = vsyncpa [#allocation19], 1 }
 0xb75   :  { %8482 = vsyncpa [#allocation5], 1 }
 0xb76   :  { %8483 = vsyncpa [#allocation22], 1 }

</bundles_post_ra>
